<compile_context>
chip_gen: v6e
topology: v6e:2x2x1
jax: 0.10.0
libtpu: 0.0.40
codegen_flags: <defaults>
</compile_context>

<pallas_src>
import functools

import numpy as np
import jax
import jax.numpy as jnp
from jax import lax
from jax.experimental import pallas as pl
from jax.experimental.pallas import tpu as pltpu

EPS = 1e-8


# --------------------------------------------------------------------------
# Fused Pallas kernel: BiLSTM -> dense -> dynamic routing
# --------------------------------------------------------------------------
def fused_seq_routing_kernel(x_ref, w_lstm_ref, b_lstm_ref, w_dense_ref,
                             c_out_ref, v_out_ref, b_out_ref,
                             h_scratch,
                             *, B, T, R, C, D, H, n_iter, eps):
    """x_ref      : (T, N, D) time-major, N = R*B, sequence n = r*B + b
       w_lstm_ref : (2*(D+H), 8*H) block-diagonal [fwd | bwd] of [W_ih; W_hh]
       b_lstm_ref : (1, 8*H) biases [b_fwd | b_bwd]
       w_dense_ref: (2H, C*2H) dense weight (transposed, no bias)
       c_out_ref  : (C, T*B, 2H)   routed capsules, token index = t*B + b
       v_out_ref  : (T*B, R*C)     routing coefficients (lane-dense slab)
       b_out_ref  : (T*B, R*C)     routing logits (lane-dense slab)
       h_scratch  : VMEM (R, T*B, 2H) BiLSTM hidden states grouped by r."""
    N = R * B
    Dh = 2 * H
    TK = T * B

    # ---- BiLSTM recurrence (both directions in one MXU dot per step) ------
    # Hoisted weight/bias loads (stay resident across the recurrence).
    w_lstm = w_lstm_ref[...]                                 # (2(D+H), 8H)
    bias = jnp.broadcast_to(b_lstm_ref[...], (N, 8 * H))     # (N, 8H)

    def cell(g, c_prev):
        # PyTorch gate order: i, f, g, o
        i = jax.nn.sigmoid(g[:, 0 * H:1 * H])
        f = jax.nn.sigmoid(g[:, 1 * H:2 * H])
        gg = jnp.tanh(g[:, 2 * H:3 * H])
        o = jax.nn.sigmoid(g[:, 3 * H:4 * H])
        c_new = f * c_prev + i * gg
        return o * jnp.tanh(c_new), c_new

    def step(t, carry):
        hf, cf, hb, cb = carry
        xf = x_ref[t]                  # (N, D)
        xb = x_ref[T - 1 - t]          # (N, D)
        # One lane-dense dot: (N, 2(D+H)) @ (2(D+H), 8H) -> (N, 8H) = (4, 128)
        inp = jnp.concatenate([xf, hf, xb, hb], axis=-1)
        gates = jnp.dot(inp, w_lstm, preferred_element_type=jnp.float32) + bias
        hf, cf = cell(gates[:, 0:4 * H], cf)
        hb, cb = cell(gates[:, 4 * H:8 * H], cb)
        # Store grouped by r: h_scratch[r, t*B + b, :] = [hf | hb] of seq r*B+b
        for r in range(R):
            h_scratch[r, pl.ds(t * B, B), 0:H] = hf[r * B:(r + 1) * B, :]
            h_scratch[r, pl.ds((T - 1 - t) * B, B), H:2 * H] = \
                hb[r * B:(r + 1) * B, :]
        return hf, cf, hb, cb

    z = jnp.zeros((N, H), jnp.float32)
    lax.fori_loop(0, T, step, (z, z, z, z), unroll=True)

    # ---- dense (no bias), fused right after the recurrence -----------------
    w_dense = w_dense_ref[...]                               # (2H, C*2H)
    u_r = [jnp.dot(h_scratch[r], w_dense, preferred_element_type=jnp.float32)
           for r in range(R)]                                # each (TK, C*Dh)
    # Stacked capsule inputs U[c, r, tok, :] (no relayout: lane slices + stack)
    U = jnp.stack(
        [jnp.stack([u_r[r][:, c * Dh:(c + 1) * Dh] for r in range(R)], axis=0)
         for c in range(C)], axis=0)                         # (C, R, TK, Dh)

    # ---- dynamic routing, vectorized over (C, R, TK) ------------------------
    b_log = jnp.zeros((C, R, TK, 1), jnp.float32)
    v = None
    c_caps = None
    for _ in range(n_iter):                                  # n_iter >= 1
        # softmax over the capsule axis C (independently per (r, token))
        m = jnp.max(b_log, axis=0, keepdims=True)
        e = jnp.exp(b_log - m)
        denom = jnp.sum(e, axis=0, keepdims=True)
        v = e * pl.reciprocal(denom, approx=True)            # (C, R, TK, 1)
        # c_hat = sum_r u * v ; squash along the feature dim (EUP recip/rsqrt)
        c_hat = jnp.sum(U * v, axis=1)                       # (C, TK, Dh)
        sq = jnp.sum(c_hat * c_hat, axis=-1, keepdims=True)  # (C, TK, 1)
        scale = sq * pl.reciprocal(1.0 + sq, approx=True) * lax.rsqrt(sq + eps)
        c_caps = c_hat * scale
        # b <- b + <c, u>
        b_log = b_log + jnp.sum(c_caps[:, None, :, :] * U,
                                axis=-1, keepdims=True)

    # ---- outputs ------------------------------------------------------------
    c_out_ref[...] = c_caps                                  # (C, TK, Dh)
    # v / b go out as lane-dense (TK, R*C) slabs (single dense HBM writeback);
    # columns are ordered r*C + c, the wrapper does the tiny token transpose.
    for r in range(R):
        for c in range(C):
            j = r * C + c
            v_out_ref[:, j:j + 1] = v[c, r]
            b_out_ref[:, j:j + 1] = b_log[c, r]


# --------------------------------------------------------------------------
# pallas_call wrapper (single fused grid step, full-array blocks)
# --------------------------------------------------------------------------
def _full(shape):
    return pl.BlockSpec(shape, lambda i: (0,) * len(shape))


def fused_forward_pallas(x_tm, w_lstm, b_lstm, w_dense, *,
                         B, T, R, C, D, H, n_iter, eps=EPS):
    N = R * B
    TK = T * B
    Dh = 2 * H
    kernel = functools.partial(fused_seq_routing_kernel,
                               B=B, T=T, R=R, C=C, D=D, H=H,
                               n_iter=n_iter, eps=eps)
    return pl.pallas_call(
        kernel,
        out_shape=(jax.ShapeDtypeStruct((C, TK, Dh), jnp.float32),
                   jax.ShapeDtypeStruct((TK, R * C), jnp.float32),
                   jax.ShapeDtypeStruct((TK, R * C), jnp.float32)),
        grid=(1,),
        in_specs=[_full((T, N, D)),
                  _full((2 * (D + H), 8 * H)),
                  _full((1, 8 * H)),
                  _full((Dh, C * Dh))],
        out_specs=(_full((C, TK, Dh)),
                   _full((TK, R * C)),
                   _full((TK, R * C))),
        scratch_shapes=[pltpu.VMEM((R, TK, 2 * H), jnp.float32)],
    )(x_tm, w_lstm, b_lstm, w_dense)


# --------------------------------------------------------------------------
# SeqDynamicRouting forward (thin XLA glue around the single fused kernel)
# --------------------------------------------------------------------------
def seq_dynamic_routing_forward(inputs, params, *, C, n_iter, hidden_dim):
    assert n_iter >= 1, "dynamic routing requires n_iter >= 1"
    B, T, R, D = inputs.shape
    H = hidden_dim // 2
    Dh = hidden_dim

    # time-major input, sequences ordered n = r*B + b
    x_tm = jnp.transpose(inputs, (1, 2, 0, 3)).reshape(T, R * B, D)

    # block-diagonal combined BiLSTM weight / bias (one dot per timestep)
    w_f = jnp.concatenate([params["wih_f"], params["whh_f"]], axis=0)  # (D+H,4H)
    w_b = jnp.concatenate([params["wih_b"], params["whh_b"]], axis=0)
    zero = jnp.zeros((D + H, 4 * H), jnp.float32)
    w_lstm = jnp.concatenate(
        [jnp.concatenate([w_f, zero], axis=1),
         jnp.concatenate([zero, w_b], axis=1)], axis=0)      # (2(D+H), 8H)
    b_lstm = jnp.concatenate([params["bias_f"], params["bias_b"]], axis=1)

    c_k, v_k, b_k = fused_forward_pallas(
        x_tm, w_lstm, b_lstm, params["w_dense_t"],
        B=B, T=T, R=R, C=C, D=D, H=H, n_iter=n_iter)

    # kernel token order is (t, b); reorder to the module's (b, t) = B*T
    out_c = c_k.reshape(C, T, B, Dh).transpose(2, 1, 0, 3).reshape(B * T, C, Dh)
    out_v = v_k.reshape(T, B, R, C).transpose(1, 0, 2, 3).reshape(B * T, R, C)
    out_b = b_k.reshape(T, B, R, C).transpose(1, 0, 2, 3).reshape(B * T, R, C)
    return out_c, out_v, out_b


# --------------------------------------------------------------------------
# Deterministic parameter init
# --------------------------------------------------------------------------
def init_params(key, input_dim, hidden_dim, C):
    H = hidden_dim // 2
    ks = jax.random.split(key, 7)
    lim = 1.0 / np.sqrt(H)

    def unif(k, shape, a):
        return jax.random.uniform(k, shape, jnp.float32, -a, a)

    params = dict(
        wih_f=unif(ks[0], (input_dim, 4 * H), lim),
        whh_f=unif(ks[1], (H, 4 * H), lim),
        bias_f=unif(ks[2], (1, 4 * H), lim),
        wih_b=unif(ks[3], (input_dim, 4 * H), lim),
        whh_b=unif(ks[4], (H, 4 * H), lim),
        bias_b=unif(ks[5], (1, 4 * H), lim),
    )
    dense_lim = np.sqrt(6.0 / (hidden_dim + hidden_dim))
    params["w_dense_t"] = unif(ks[6], (hidden_dim, C * hidden_dim), dense_lim)
    return params


# --------------------------------------------------------------------------
# Pure-JAX reference (for correctness check)
# --------------------------------------------------------------------------
def _ref_bilstm(x, params):
    H = params["whh_f"].shape[0]

    def run(xs, wih, whh, bias):
        def step(carry, xt):
            h, c = carry
            g = xt @ wih + h @ whh + bias
            i = jax.nn.sigmoid(g[:, :H])
            f = jax.nn.sigmoid(g[:, H:2 * H])
            gg = jnp.tanh(g[:, 2 * H:3 * H])
            o = jax.nn.sigmoid(g[:, 3 * H:])
            c = f * c + i * gg
            h = o * jnp.tanh(c)
            return (h, c), h

        z = jnp.zeros((xs.shape[1], H), jnp.float32)
        _, hs = lax.scan(step, (z, z), xs)
        return hs

    x_tm = jnp.transpose(x, (1, 0, 2))
    hf = run(x_tm, params["wih_f"], params["whh_f"], params["bias_f"])
    hb = run(x_tm[::-1], params["wih_b"], params["whh_b"], params["bias_b"])[::-1]
    return jnp.transpose(jnp.concatenate([hf, hb], axis=-1), (1, 0, 2))


def ref_forward(inputs, params, *, C, n_iter, hidden_dim, eps=EPS):
    B, T, R, D = inputs.shape
    Dh = hidden_dim
    u0 = jnp.transpose(inputs, (0, 2, 1, 3)).reshape(B * R, T, D)
    h = _ref_bilstm(u0, params)
    u = (h.reshape(B * R * T, Dh) @ params["w_dense_t"]).reshape(B, R, T, C, Dh)
    u = jnp.transpose(u, (3, 0, 2, 1, 4)).reshape(C, B * T, R, 1, Dh)
    b = jnp.zeros((C, B * T, R, 1, 1), jnp.float32)
    for _ in range(n_iter):
        v = jax.nn.softmax(b, axis=0)
        c_hat = (u * v).sum(2, keepdims=True)
        sq = (c_hat ** 2).sum(-1, keepdims=True)
        c = c_hat * (sq / (1.0 + sq)) / jnp.sqrt(sq + eps)
        b = b + (c * u).sum(-1, keepdims=True)
    out_c = jnp.transpose(c[:, :, 0, 0, :], (1, 0, 2))
    out_v = jnp.transpose(v[:, :, :, 0, 0], (1, 2, 0))
    out_b = jnp.transpose(b[:, :, :, 0, 0], (1, 2, 0))
    return out_c, out_v, out_b


# --------------------------------------------------------------------------
if __name__ == "__main__":
    B, T, R, input_dim = 2, 8, 2, 16
    hidden_dim, C, n_iter = 32, 2, 2

    key = jax.random.PRNGKey(0)
    k_in, k_p = jax.random.split(key)
    inputs = jax.random.normal(k_in, (B, T, R, input_dim), jnp.float32)
    params = init_params(k_p, input_dim, hidden_dim, C)

    out_c, out_v, out_b = seq_dynamic_routing_forward(
        inputs, params, C=C, n_iter=n_iter, hidden_dim=hidden_dim)
    jax.block_until_ready((out_c, out_v, out_b))

    ref_c, ref_v, ref_b = ref_forward(inputs, params, C=C, n_iter=n_iter,
                                      hidden_dim=hidden_dim)
    np.testing.assert_allclose(np.asarray(out_c), np.asarray(ref_c),
                               rtol=2e-2, atol=2e-3)
    np.testing.assert_allclose(np.asarray(out_v), np.asarray(ref_v),
                               rtol=2e-2, atol=2e-3)
    np.testing.assert_allclose(np.asarray(out_b), np.asarray(ref_b),
                               rtol=2e-2, atol=2e-3)
    print("KERNEL_OK")
</pallas_src>

<mosaic_0001>
module attributes {stable_mosaic.version = 11 : i64} {
  func.func @fused_seq_routing_kernel(%arg0: i32, %arg1: memref<8x4x16xf32, #tpu.memory_space<vmem>>, %arg2: memref<64x128xf32, #tpu.memory_space<vmem>>, %arg3: memref<1x128xf32, #tpu.memory_space<vmem>>, %arg4: memref<32x64xf32, #tpu.memory_space<vmem>>, %arg5: memref<2x16x32xf32, #tpu.memory_space<vmem>>, %arg6: memref<16x4xf32, #tpu.memory_space<vmem>>, %arg7: memref<16x4xf32, #tpu.memory_space<vmem>>, %arg8: memref<2x16x32xf32, #tpu.memory_space<vmem>>) attributes {dimension_semantics = [#tpu.dimension_semantics<arbitrary>], iteration_bounds = array<i64: 1>, scalar_prefetch = 0 : i64, scratch_operands = 1 : i64, tpu.core_type = #tpu.core_type<tc>, window_params = [{pipeline_mode = #tpu.pipeline_mode<synchronous>, transform_indices = @transform_0, window_bounds = array<i64: 8, 4, 16>}, {pipeline_mode = #tpu.pipeline_mode<synchronous>, transform_indices = @transform_1, window_bounds = array<i64: 64, 128>}, {pipeline_mode = #tpu.pipeline_mode<synchronous>, transform_indices = @transform_2, window_bounds = array<i64: 1, 128>}, {pipeline_mode = #tpu.pipeline_mode<synchronous>, transform_indices = @transform_3, window_bounds = array<i64: 32, 64>}, {pipeline_mode = #tpu.pipeline_mode<synchronous>, transform_indices = @transform_4, window_bounds = array<i64: 2, 16, 32>}, {pipeline_mode = #tpu.pipeline_mode<synchronous>, transform_indices = @transform_5, window_bounds = array<i64: 16, 4>}, {pipeline_mode = #tpu.pipeline_mode<synchronous>, transform_indices = @transform_6, window_bounds = array<i64: 16, 4>}]} {
    %c0 = arith.constant 0 : index
    %c0_0 = arith.constant 0 : index
    %0 = vector.load %arg2[%c0, %c0_0] : memref<64x128xf32, #tpu.memory_space<vmem>>, vector<64x128xf32>
    %c0_1 = arith.constant 0 : index
    %c0_2 = arith.constant 0 : index
    %1 = vector.load %arg3[%c0_1, %c0_2] : memref<1x128xf32, #tpu.memory_space<vmem>>, vector<1x128xf32>
    %2 = vector.shape_cast %1 : vector<1x128xf32> to vector<1x128xf32>
    %3 = vector.broadcast %2 : vector<1x128xf32> to vector<4x128xf32>
    %cst = arith.constant 0.000000e+00 : f32
    %4 = vector.broadcast %cst : f32 to vector<4x16xf32>
    %c0_i32 = arith.constant 0 : i32
    %5 = arith.index_cast %c0_i32 : i32 to index
    %c0_3 = arith.constant 0 : index
    %c0_4 = arith.constant 0 : index
    %6 = vector.load %arg1[%5, %c0_3, %c0_4] : memref<8x4x16xf32, #tpu.memory_space<vmem>>, vector<1x4x16xf32>
    %7 = vector.shape_cast %6 : vector<1x4x16xf32> to vector<4x16xf32>
    %c7_i32 = arith.constant 7 : i32
    %8 = arith.subi %c7_i32, %c0_i32 : i32
    %9 = arith.index_cast %8 : i32 to index
    %c0_5 = arith.constant 0 : index
    %c0_6 = arith.constant 0 : index
    %10 = vector.load %arg1[%9, %c0_5, %c0_6] : memref<8x4x16xf32, #tpu.memory_space<vmem>>, vector<1x4x16xf32>
    %11 = vector.shape_cast %10 : vector<1x4x16xf32> to vector<4x16xf32>
    %12 = tpu.concatenate %7, %4, %11, %4 in 1 : vector<4x16xf32>, vector<4x16xf32>, vector<4x16xf32>, vector<4x16xf32> -> vector<4x64xf32>
    %cst_7 = arith.constant dense<0.000000e+00> : vector<4x128xf32>
    %13 = tpu.matmul %12, %0, %cst_7 {dimension_numbers = #tpu.dot_dimension_numbers<[1], [0], [0], [1], [0, 0, 1, 1], [], []>} : vector<4x64xf32>, vector<64x128xf32>, vector<4x128xf32> -> vector<4x128xf32>
    %14 = arith.addf %13, %3 : vector<4x128xf32>
    %15 = vector.extract_strided_slice %14 {offsets = [0, 0], sizes = [4, 64], strides = [1, 1]} : vector<4x128xf32> to vector<4x64xf32>
    %16 = vector.extract_strided_slice %15 {offsets = [0, 0], sizes = [4, 16], strides = [1, 1]} : vector<4x64xf32> to vector<4x16xf32>
    %17 = arith.negf %16 : vector<4x16xf32>
    %18 = math.exp %17 : vector<4x16xf32>
    %cst_8 = arith.constant 1.000000e+00 : f32
    %19 = vector.broadcast %cst_8 : f32 to vector<4x16xf32>
    %20 = arith.addf %19, %18 : vector<4x16xf32>
    %21 = arith.divf %19, %20 : vector<4x16xf32>
    %22 = vector.extract_strided_slice %15 {offsets = [0, 16], sizes = [4, 16], strides = [1, 1]} : vector<4x64xf32> to vector<4x16xf32>
    %23 = arith.negf %22 : vector<4x16xf32>
    %24 = math.exp %23 : vector<4x16xf32>
    %cst_9 = arith.constant 1.000000e+00 : f32
    %25 = vector.broadcast %cst_9 : f32 to vector<4x16xf32>
    %26 = arith.addf %25, %24 : vector<4x16xf32>
    %27 = arith.divf %25, %26 : vector<4x16xf32>
    %28 = vector.extract_strided_slice %15 {offsets = [0, 32], sizes = [4, 16], strides = [1, 1]} : vector<4x64xf32> to vector<4x16xf32>
    %29 = math.tanh %28 : vector<4x16xf32>
    %30 = vector.extract_strided_slice %15 {offsets = [0, 48], sizes = [4, 16], strides = [1, 1]} : vector<4x64xf32> to vector<4x16xf32>
    %31 = arith.negf %30 : vector<4x16xf32>
    %32 = math.exp %31 : vector<4x16xf32>
    %cst_10 = arith.constant 1.000000e+00 : f32
    %33 = vector.broadcast %cst_10 : f32 to vector<4x16xf32>
    %34 = arith.addf %33, %32 : vector<4x16xf32>
    %35 = arith.divf %33, %34 : vector<4x16xf32>
    %36 = arith.mulf %27, %4 : vector<4x16xf32>
    %37 = arith.mulf %21, %29 : vector<4x16xf32>
    %38 = arith.addf %36, %37 : vector<4x16xf32>
    %39 = math.tanh %38 : vector<4x16xf32>
    %40 = arith.mulf %35, %39 : vector<4x16xf32>
    %41 = vector.extract_strided_slice %14 {offsets = [0, 64], sizes = [4, 64], strides = [1, 1]} : vector<4x128xf32> to vector<4x64xf32>
    %42 = vector.extract_strided_slice %41 {offsets = [0, 0], sizes = [4, 16], strides = [1, 1]} : vector<4x64xf32> to vector<4x16xf32>
    %43 = arith.negf %42 : vector<4x16xf32>
    %44 = math.exp %43 : vector<4x16xf32>
    %cst_11 = arith.constant 1.000000e+00 : f32
    %45 = vector.broadcast %cst_11 : f32 to vector<4x16xf32>
    %46 = arith.addf %45, %44 : vector<4x16xf32>
    %47 = arith.divf %45, %46 : vector<4x16xf32>
    %48 = vector.extract_strided_slice %41 {offsets = [0, 16], sizes = [4, 16], strides = [1, 1]} : vector<4x64xf32> to vector<4x16xf32>
    %49 = arith.negf %48 : vector<4x16xf32>
    %50 = math.exp %49 : vector<4x16xf32>
    %cst_12 = arith.constant 1.000000e+00 : f32
    %51 = vector.broadcast %cst_12 : f32 to vector<4x16xf32>
    %52 = arith.addf %51, %50 : vector<4x16xf32>
    %53 = arith.divf %51, %52 : vector<4x16xf32>
    %54 = vector.extract_strided_slice %41 {offsets = [0, 32], sizes = [4, 16], strides = [1, 1]} : vector<4x64xf32> to vector<4x16xf32>
    %55 = math.tanh %54 : vector<4x16xf32>
    %56 = vector.extract_strided_slice %41 {offsets = [0, 48], sizes = [4, 16], strides = [1, 1]} : vector<4x64xf32> to vector<4x16xf32>
    %57 = arith.negf %56 : vector<4x16xf32>
    %58 = math.exp %57 : vector<4x16xf32>
    %cst_13 = arith.constant 1.000000e+00 : f32
    %59 = vector.broadcast %cst_13 : f32 to vector<4x16xf32>
    %60 = arith.addf %59, %58 : vector<4x16xf32>
    %61 = arith.divf %59, %60 : vector<4x16xf32>
    %62 = arith.mulf %53, %4 : vector<4x16xf32>
    %63 = arith.mulf %47, %55 : vector<4x16xf32>
    %64 = arith.addf %62, %63 : vector<4x16xf32>
    %65 = math.tanh %64 : vector<4x16xf32>
    %66 = arith.mulf %61, %65 : vector<4x16xf32>
    %67 = vector.extract_strided_slice %40 {offsets = [0, 0], sizes = [2, 16], strides = [1, 1]} : vector<4x16xf32> to vector<2x16xf32>
    %c2_i32 = arith.constant 2 : i32
    %68 = arith.muli %c0_i32, %c2_i32 : i32
    %c0_14 = arith.constant 0 : index
    %69 = arith.index_cast %68 : i32 to index
    %c0_15 = arith.constant 0 : index
    %70 = vector.load %arg8[%c0_14, %69, %c0_15] : memref<2x16x32xf32, #tpu.memory_space<vmem>>, vector<1x2x16xf32>
    %71 = vector.shape_cast %70 : vector<1x2x16xf32> to vector<2x16xf32>
    %72 = vector.shape_cast %67 : vector<2x16xf32> to vector<1x2x16xf32>
    tpu.vector_store %arg8[%c0_14, %69, %c0_15], %72 {strides = array<i32>} : memref<2x16x32xf32, #tpu.memory_space<vmem>>, vector<1x2x16xf32>,
    %73 = vector.extract_strided_slice %66 {offsets = [0, 0], sizes = [2, 16], strides = [1, 1]} : vector<4x16xf32> to vector<2x16xf32>
    %c7_i32_16 = arith.constant 7 : i32
    %74 = arith.subi %c7_i32_16, %c0_i32 : i32
    %c2_i32_17 = arith.constant 2 : i32
    %75 = arith.muli %74, %c2_i32_17 : i32
    %c0_18 = arith.constant 0 : index
    %76 = arith.index_cast %75 : i32 to index
    %c16 = arith.constant 16 : index
    %77 = vector.load %arg8[%c0_18, %76, %c16] : memref<2x16x32xf32, #tpu.memory_space<vmem>>, vector<1x2x16xf32>
    %78 = vector.shape_cast %77 : vector<1x2x16xf32> to vector<2x16xf32>
    %79 = vector.shape_cast %73 : vector<2x16xf32> to vector<1x2x16xf32>
    tpu.vector_store %arg8[%c0_18, %76, %c16], %79 {strides = array<i32>} : memref<2x16x32xf32, #tpu.memory_space<vmem>>, vector<1x2x16xf32>,
    %80 = vector.extract_strided_slice %40 {offsets = [2, 0], sizes = [2, 16], strides = [1, 1]} : vector<4x16xf32> to vector<2x16xf32>
    %c2_i32_19 = arith.constant 2 : i32
    %81 = arith.muli %c0_i32, %c2_i32_19 : i32
    %c1 = arith.constant 1 : index
    %82 = arith.index_cast %81 : i32 to index
    %c0_20 = arith.constant 0 : index
    %83 = vector.load %arg8[%c1, %82, %c0_20] : memref<2x16x32xf32, #tpu.memory_space<vmem>>, vector<1x2x16xf32>
    %84 = vector.shape_cast %83 : vector<1x2x16xf32> to vector<2x16xf32>
    %85 = vector.shape_cast %80 : vector<2x16xf32> to vector<1x2x16xf32>
    tpu.vector_store %arg8[%c1, %82, %c0_20], %85 {strides = array<i32>} : memref<2x16x32xf32, #tpu.memory_space<vmem>>, vector<1x2x16xf32>,
    %86 = vector.extract_strided_slice %66 {offsets = [2, 0], sizes = [2, 16], strides = [1, 1]} : vector<4x16xf32> to vector<2x16xf32>
    %c7_i32_21 = arith.constant 7 : i32
    %87 = arith.subi %c7_i32_21, %c0_i32 : i32
    %c2_i32_22 = arith.constant 2 : i32
    %88 = arith.muli %87, %c2_i32_22 : i32
    %c1_23 = arith.constant 1 : index
    %89 = arith.index_cast %88 : i32 to index
    %c16_24 = arith.constant 16 : index
    %90 = vector.load %arg8[%c1_23, %89, %c16_24] : memref<2x16x32xf32, #tpu.memory_space<vmem>>, vector<1x2x16xf32>
    %91 = vector.shape_cast %90 : vector<1x2x16xf32> to vector<2x16xf32>
    %92 = vector.shape_cast %86 : vector<2x16xf32> to vector<1x2x16xf32>
    tpu.vector_store %arg8[%c1_23, %89, %c16_24], %92 {strides = array<i32>} : memref<2x16x32xf32, #tpu.memory_space<vmem>>, vector<1x2x16xf32>,
    %c1_i32 = arith.constant 1 : i32
    %93 = arith.index_cast %c1_i32 : i32 to index
    %c0_25 = arith.constant 0 : index
    %c0_26 = arith.constant 0 : index
    %94 = vector.load %arg1[%93, %c0_25, %c0_26] : memref<8x4x16xf32, #tpu.memory_space<vmem>>, vector<1x4x16xf32>
    %95 = vector.shape_cast %94 : vector<1x4x16xf32> to vector<4x16xf32>
    %c7_i32_27 = arith.constant 7 : i32
    %96 = arith.subi %c7_i32_27, %c1_i32 : i32
    %97 = arith.index_cast %96 : i32 to index
    %c0_28 = arith.constant 0 : index
    %c0_29 = arith.constant 0 : index
    %98 = vector.load %arg1[%97, %c0_28, %c0_29] : memref<8x4x16xf32, #tpu.memory_space<vmem>>, vector<1x4x16xf32>
    %99 = vector.shape_cast %98 : vector<1x4x16xf32> to vector<4x16xf32>
    %100 = tpu.concatenate %95, %40, %99, %66 in 1 : vector<4x16xf32>, vector<4x16xf32>, vector<4x16xf32>, vector<4x16xf32> -> vector<4x64xf32>
    %cst_30 = arith.constant dense<0.000000e+00> : vector<4x128xf32>
    %101 = tpu.matmul %100, %0, %cst_30 {dimension_numbers = #tpu.dot_dimension_numbers<[1], [0], [0], [1], [0, 0, 1, 1], [], []>} : vector<4x64xf32>, vector<64x128xf32>, vector<4x128xf32> -> vector<4x128xf32>
    %102 = arith.addf %101, %3 : vector<4x128xf32>
    %103 = vector.extract_strided_slice %102 {offsets = [0, 0], sizes = [4, 64], strides = [1, 1]} : vector<4x128xf32> to vector<4x64xf32>
    %104 = vector.extract_strided_slice %103 {offsets = [0, 0], sizes = [4, 16], strides = [1, 1]} : vector<4x64xf32> to vector<4x16xf32>
    %105 = arith.negf %104 : vector<4x16xf32>
    %106 = math.exp %105 : vector<4x16xf32>
    %cst_31 = arith.constant 1.000000e+00 : f32
    %107 = vector.broadcast %cst_31 : f32 to vector<4x16xf32>
    %108 = arith.addf %107, %106 : vector<4x16xf32>
    %109 = arith.divf %107, %108 : vector<4x16xf32>
    %110 = vector.extract_strided_slice %103 {offsets = [0, 16], sizes = [4, 16], strides = [1, 1]} : vector<4x64xf32> to vector<4x16xf32>
    %111 = arith.negf %110 : vector<4x16xf32>
    %112 = math.exp %111 : vector<4x16xf32>
    %cst_32 = arith.constant 1.000000e+00 : f32
    %113 = vector.broadcast %cst_32 : f32 to vector<4x16xf32>
    %114 = arith.addf %113, %112 : vector<4x16xf32>
    %115 = arith.divf %113, %114 : vector<4x16xf32>
    %116 = vector.extract_strided_slice %103 {offsets = [0, 32], sizes = [4, 16], strides = [1, 1]} : vector<4x64xf32> to vector<4x16xf32>
    %117 = math.tanh %116 : vector<4x16xf32>
    %118 = vector.extract_strided_slice %103 {offsets = [0, 48], sizes = [4, 16], strides = [1, 1]} : vector<4x64xf32> to vector<4x16xf32>
    %119 = arith.negf %118 : vector<4x16xf32>
    %120 = math.exp %119 : vector<4x16xf32>
    %cst_33 = arith.constant 1.000000e+00 : f32
    %121 = vector.broadcast %cst_33 : f32 to vector<4x16xf32>
    %122 = arith.addf %121, %120 : vector<4x16xf32>
    %123 = arith.divf %121, %122 : vector<4x16xf32>
    %124 = arith.mulf %115, %38 : vector<4x16xf32>
    %125 = arith.mulf %109, %117 : vector<4x16xf32>
    %126 = arith.addf %124, %125 : vector<4x16xf32>
    %127 = math.tanh %126 : vector<4x16xf32>
    %128 = arith.mulf %123, %127 : vector<4x16xf32>
    %129 = vector.extract_strided_slice %102 {offsets = [0, 64], sizes = [4, 64], strides = [1, 1]} : vector<4x128xf32> to vector<4x64xf32>
    %130 = vector.extract_strided_slice %129 {offsets = [0, 0], sizes = [4, 16], strides = [1, 1]} : vector<4x64xf32> to vector<4x16xf32>
    %131 = arith.negf %130 : vector<4x16xf32>
    %132 = math.exp %131 : vector<4x16xf32>
    %cst_34 = arith.constant 1.000000e+00 : f32
    %133 = vector.broadcast %cst_34 : f32 to vector<4x16xf32>
    %134 = arith.addf %133, %132 : vector<4x16xf32>
    %135 = arith.divf %133, %134 : vector<4x16xf32>
    %136 = vector.extract_strided_slice %129 {offsets = [0, 16], sizes = [4, 16], strides = [1, 1]} : vector<4x64xf32> to vector<4x16xf32>
    %137 = arith.negf %136 : vector<4x16xf32>
    %138 = math.exp %137 : vector<4x16xf32>
    %cst_35 = arith.constant 1.000000e+00 : f32
    %139 = vector.broadcast %cst_35 : f32 to vector<4x16xf32>
    %140 = arith.addf %139, %138 : vector<4x16xf32>
    %141 = arith.divf %139, %140 : vector<4x16xf32>
    %142 = vector.extract_strided_slice %129 {offsets = [0, 32], sizes = [4, 16], strides = [1, 1]} : vector<4x64xf32> to vector<4x16xf32>
    %143 = math.tanh %142 : vector<4x16xf32>
    %144 = vector.extract_strided_slice %129 {offsets = [0, 48], sizes = [4, 16], strides = [1, 1]} : vector<4x64xf32> to vector<4x16xf32>
    %145 = arith.negf %144 : vector<4x16xf32>
    %146 = math.exp %145 : vector<4x16xf32>
    %cst_36 = arith.constant 1.000000e+00 : f32
    %147 = vector.broadcast %cst_36 : f32 to vector<4x16xf32>
    %148 = arith.addf %147, %146 : vector<4x16xf32>
    %149 = arith.divf %147, %148 : vector<4x16xf32>
    %150 = arith.mulf %141, %64 : vector<4x16xf32>
    %151 = arith.mulf %135, %143 : vector<4x16xf32>
    %152 = arith.addf %150, %151 : vector<4x16xf32>
    %153 = math.tanh %152 : vector<4x16xf32>
    %154 = arith.mulf %149, %153 : vector<4x16xf32>
    %155 = vector.extract_strided_slice %128 {offsets = [0, 0], sizes = [2, 16], strides = [1, 1]} : vector<4x16xf32> to vector<2x16xf32>
    %c2_i32_37 = arith.constant 2 : i32
    %156 = arith.muli %c1_i32, %c2_i32_37 : i32
    %c0_38 = arith.constant 0 : index
    %157 = arith.index_cast %156 : i32 to index
    %c0_39 = arith.constant 0 : index
    %158 = vector.load %arg8[%c0_38, %157, %c0_39] : memref<2x16x32xf32, #tpu.memory_space<vmem>>, vector<1x2x16xf32>
    %159 = vector.shape_cast %158 : vector<1x2x16xf32> to vector<2x16xf32>
    %160 = vector.shape_cast %155 : vector<2x16xf32> to vector<1x2x16xf32>
    tpu.vector_store %arg8[%c0_38, %157, %c0_39], %160 {strides = array<i32>} : memref<2x16x32xf32, #tpu.memory_space<vmem>>, vector<1x2x16xf32>,
    %161 = vector.extract_strided_slice %154 {offsets = [0, 0], sizes = [2, 16], strides = [1, 1]} : vector<4x16xf32> to vector<2x16xf32>
    %c7_i32_40 = arith.constant 7 : i32
    %162 = arith.subi %c7_i32_40, %c1_i32 : i32
    %c2_i32_41 = arith.constant 2 : i32
    %163 = arith.muli %162, %c2_i32_41 : i32
    %c0_42 = arith.constant 0 : index
    %164 = arith.index_cast %163 : i32 to index
    %c16_43 = arith.constant 16 : index
    %165 = vector.load %arg8[%c0_42, %164, %c16_43] : memref<2x16x32xf32, #tpu.memory_space<vmem>>, vector<1x2x16xf32>
    %166 = vector.shape_cast %165 : vector<1x2x16xf32> to vector<2x16xf32>
    %167 = vector.shape_cast %161 : vector<2x16xf32> to vector<1x2x16xf32>
    tpu.vector_store %arg8[%c0_42, %164, %c16_43], %167 {strides = array<i32>} : memref<2x16x32xf32, #tpu.memory_space<vmem>>, vector<1x2x16xf32>,
    %168 = vector.extract_strided_slice %128 {offsets = [2, 0], sizes = [2, 16], strides = [1, 1]} : vector<4x16xf32> to vector<2x16xf32>
    %c2_i32_44 = arith.constant 2 : i32
    %169 = arith.muli %c1_i32, %c2_i32_44 : i32
    %c1_45 = arith.constant 1 : index
    %170 = arith.index_cast %169 : i32 to index
    %c0_46 = arith.constant 0 : index
    %171 = vector.load %arg8[%c1_45, %170, %c0_46] : memref<2x16x32xf32, #tpu.memory_space<vmem>>, vector<1x2x16xf32>
    %172 = vector.shape_cast %171 : vector<1x2x16xf32> to vector<2x16xf32>
    %173 = vector.shape_cast %168 : vector<2x16xf32> to vector<1x2x16xf32>
    tpu.vector_store %arg8[%c1_45, %170, %c0_46], %173 {strides = array<i32>} : memref<2x16x32xf32, #tpu.memory_space<vmem>>, vector<1x2x16xf32>,
    %174 = vector.extract_strided_slice %154 {offsets = [2, 0], sizes = [2, 16], strides = [1, 1]} : vector<4x16xf32> to vector<2x16xf32>
    %c7_i32_47 = arith.constant 7 : i32
    %175 = arith.subi %c7_i32_47, %c1_i32 : i32
    %c2_i32_48 = arith.constant 2 : i32
    %176 = arith.muli %175, %c2_i32_48 : i32
    %c1_49 = arith.constant 1 : index
    %177 = arith.index_cast %176 : i32 to index
    %c16_50 = arith.constant 16 : index
    %178 = vector.load %arg8[%c1_49, %177, %c16_50] : memref<2x16x32xf32, #tpu.memory_space<vmem>>, vector<1x2x16xf32>
    %179 = vector.shape_cast %178 : vector<1x2x16xf32> to vector<2x16xf32>
    %180 = vector.shape_cast %174 : vector<2x16xf32> to vector<1x2x16xf32>
    tpu.vector_store %arg8[%c1_49, %177, %c16_50], %180 {strides = array<i32>} : memref<2x16x32xf32, #tpu.memory_space<vmem>>, vector<1x2x16xf32>,
    %c2_i32_51 = arith.constant 2 : i32
    %181 = arith.index_cast %c2_i32_51 : i32 to index
    %c0_52 = arith.constant 0 : index
    %c0_53 = arith.constant 0 : index
    %182 = vector.load %arg1[%181, %c0_52, %c0_53] : memref<8x4x16xf32, #tpu.memory_space<vmem>>, vector<1x4x16xf32>
    %183 = vector.shape_cast %182 : vector<1x4x16xf32> to vector<4x16xf32>
    %c7_i32_54 = arith.constant 7 : i32
    %184 = arith.subi %c7_i32_54, %c2_i32_51 : i32
    %185 = arith.index_cast %184 : i32 to index
    %c0_55 = arith.constant 0 : index
    %c0_56 = arith.constant 0 : index
    %186 = vector.load %arg1[%185, %c0_55, %c0_56] : memref<8x4x16xf32, #tpu.memory_space<vmem>>, vector<1x4x16xf32>
    %187 = vector.shape_cast %186 : vector<1x4x16xf32> to vector<4x16xf32>
    %188 = tpu.concatenate %183, %128, %187, %154 in 1 : vector<4x16xf32>, vector<4x16xf32>, vector<4x16xf32>, vector<4x16xf32> -> vector<4x64xf32>
    %cst_57 = arith.constant dense<0.000000e+00> : vector<4x128xf32>
    %189 = tpu.matmul %188, %0, %cst_57 {dimension_numbers = #tpu.dot_dimension_numbers<[1], [0], [0], [1], [0, 0, 1, 1], [], []>} : vector<4x64xf32>, vector<64x128xf32>, vector<4x128xf32> -> vector<4x128xf32>
    %190 = arith.addf %189, %3 : vector<4x128xf32>
    %191 = vector.extract_strided_slice %190 {offsets = [0, 0], sizes = [4, 64], strides = [1, 1]} : vector<4x128xf32> to vector<4x64xf32>
    %192 = vector.extract_strided_slice %191 {offsets = [0, 0], sizes = [4, 16], strides = [1, 1]} : vector<4x64xf32> to vector<4x16xf32>
    %193 = arith.negf %192 : vector<4x16xf32>
    %194 = math.exp %193 : vector<4x16xf32>
    %cst_58 = arith.constant 1.000000e+00 : f32
    %195 = vector.broadcast %cst_58 : f32 to vector<4x16xf32>
    %196 = arith.addf %195, %194 : vector<4x16xf32>
    %197 = arith.divf %195, %196 : vector<4x16xf32>
    %198 = vector.extract_strided_slice %191 {offsets = [0, 16], sizes = [4, 16], strides = [1, 1]} : vector<4x64xf32> to vector<4x16xf32>
    %199 = arith.negf %198 : vector<4x16xf32>
    %200 = math.exp %199 : vector<4x16xf32>
    %cst_59 = arith.constant 1.000000e+00 : f32
    %201 = vector.broadcast %cst_59 : f32 to vector<4x16xf32>
    %202 = arith.addf %201, %200 : vector<4x16xf32>
    %203 = arith.divf %201, %202 : vector<4x16xf32>
    %204 = vector.extract_strided_slice %191 {offsets = [0, 32], sizes = [4, 16], strides = [1, 1]} : vector<4x64xf32> to vector<4x16xf32>
    %205 = math.tanh %204 : vector<4x16xf32>
    %206 = vector.extract_strided_slice %191 {offsets = [0, 48], sizes = [4, 16], strides = [1, 1]} : vector<4x64xf32> to vector<4x16xf32>
    %207 = arith.negf %206 : vector<4x16xf32>
    %208 = math.exp %207 : vector<4x16xf32>
    %cst_60 = arith.constant 1.000000e+00 : f32
    %209 = vector.broadcast %cst_60 : f32 to vector<4x16xf32>
    %210 = arith.addf %209, %208 : vector<4x16xf32>
    %211 = arith.divf %209, %210 : vector<4x16xf32>
    %212 = arith.mulf %203, %126 : vector<4x16xf32>
    %213 = arith.mulf %197, %205 : vector<4x16xf32>
    %214 = arith.addf %212, %213 : vector<4x16xf32>
    %215 = math.tanh %214 : vector<4x16xf32>
    %216 = arith.mulf %211, %215 : vector<4x16xf32>
    %217 = vector.extract_strided_slice %190 {offsets = [0, 64], sizes = [4, 64], strides = [1, 1]} : vector<4x128xf32> to vector<4x64xf32>
    %218 = vector.extract_strided_slice %217 {offsets = [0, 0], sizes = [4, 16], strides = [1, 1]} : vector<4x64xf32> to vector<4x16xf32>
    %219 = arith.negf %218 : vector<4x16xf32>
    %220 = math.exp %219 : vector<4x16xf32>
    %cst_61 = arith.constant 1.000000e+00 : f32
    %221 = vector.broadcast %cst_61 : f32 to vector<4x16xf32>
    %222 = arith.addf %221, %220 : vector<4x16xf32>
    %223 = arith.divf %221, %222 : vector<4x16xf32>
    %224 = vector.extract_strided_slice %217 {offsets = [0, 16], sizes = [4, 16], strides = [1, 1]} : vector<4x64xf32> to vector<4x16xf32>
    %225 = arith.negf %224 : vector<4x16xf32>
    %226 = math.exp %225 : vector<4x16xf32>
    %cst_62 = arith.constant 1.000000e+00 : f32
    %227 = vector.broadcast %cst_62 : f32 to vector<4x16xf32>
    %228 = arith.addf %227, %226 : vector<4x16xf32>
    %229 = arith.divf %227, %228 : vector<4x16xf32>
    %230 = vector.extract_strided_slice %217 {offsets = [0, 32], sizes = [4, 16], strides = [1, 1]} : vector<4x64xf32> to vector<4x16xf32>
    %231 = math.tanh %230 : vector<4x16xf32>
    %232 = vector.extract_strided_slice %217 {offsets = [0, 48], sizes = [4, 16], strides = [1, 1]} : vector<4x64xf32> to vector<4x16xf32>
    %233 = arith.negf %232 : vector<4x16xf32>
    %234 = math.exp %233 : vector<4x16xf32>
    %cst_63 = arith.constant 1.000000e+00 : f32
    %235 = vector.broadcast %cst_63 : f32 to vector<4x16xf32>
    %236 = arith.addf %235, %234 : vector<4x16xf32>
    %237 = arith.divf %235, %236 : vector<4x16xf32>
    %238 = arith.mulf %229, %152 : vector<4x16xf32>
    %239 = arith.mulf %223, %231 : vector<4x16xf32>
    %240 = arith.addf %238, %239 : vector<4x16xf32>
    %241 = math.tanh %240 : vector<4x16xf32>
    %242 = arith.mulf %237, %241 : vector<4x16xf32>
    %243 = vector.extract_strided_slice %216 {offsets = [0, 0], sizes = [2, 16], strides = [1, 1]} : vector<4x16xf32> to vector<2x16xf32>
    %c2_i32_64 = arith.constant 2 : i32
    %244 = arith.muli %c2_i32_51, %c2_i32_64 : i32
    %c0_65 = arith.constant 0 : index
    %245 = arith.index_cast %244 : i32 to index
    %c0_66 = arith.constant 0 : index
    %246 = vector.load %arg8[%c0_65, %245, %c0_66] : memref<2x16x32xf32, #tpu.memory_space<vmem>>, vector<1x2x16xf32>
    %247 = vector.shape_cast %246 : vector<1x2x16xf32> to vector<2x16xf32>
    %248 = vector.shape_cast %243 : vector<2x16xf32> to vector<1x2x16xf32>
    tpu.vector_store %arg8[%c0_65, %245, %c0_66], %248 {strides = array<i32>} : memref<2x16x32xf32, #tpu.memory_space<vmem>>, vector<1x2x16xf32>,
    %249 = vector.extract_strided_slice %242 {offsets = [0, 0], sizes = [2, 16], strides = [1, 1]} : vector<4x16xf32> to vector<2x16xf32>
    %c7_i32_67 = arith.constant 7 : i32
    %250 = arith.subi %c7_i32_67, %c2_i32_51 : i32
    %c2_i32_68 = arith.constant 2 : i32
    %251 = arith.muli %250, %c2_i32_68 : i32
    %c0_69 = arith.constant 0 : index
    %252 = arith.index_cast %251 : i32 to index
    %c16_70 = arith.constant 16 : index
    %253 = vector.load %arg8[%c0_69, %252, %c16_70] : memref<2x16x32xf32, #tpu.memory_space<vmem>>, vector<1x2x16xf32>
    %254 = vector.shape_cast %253 : vector<1x2x16xf32> to vector<2x16xf32>
    %255 = vector.shape_cast %249 : vector<2x16xf32> to vector<1x2x16xf32>
    tpu.vector_store %arg8[%c0_69, %252, %c16_70], %255 {strides = array<i32>} : memref<2x16x32xf32, #tpu.memory_space<vmem>>, vector<1x2x16xf32>,
    %256 = vector.extract_strided_slice %216 {offsets = [2, 0], sizes = [2, 16], strides = [1, 1]} : vector<4x16xf32> to vector<2x16xf32>
    %c2_i32_71 = arith.constant 2 : i32
    %257 = arith.muli %c2_i32_51, %c2_i32_71 : i32
    %c1_72 = arith.constant 1 : index
    %258 = arith.index_cast %257 : i32 to index
    %c0_73 = arith.constant 0 : index
    %259 = vector.load %arg8[%c1_72, %258, %c0_73] : memref<2x16x32xf32, #tpu.memory_space<vmem>>, vector<1x2x16xf32>
    %260 = vector.shape_cast %259 : vector<1x2x16xf32> to vector<2x16xf32>
    %261 = vector.shape_cast %256 : vector<2x16xf32> to vector<1x2x16xf32>
    tpu.vector_store %arg8[%c1_72, %258, %c0_73], %261 {strides = array<i32>} : memref<2x16x32xf32, #tpu.memory_space<vmem>>, vector<1x2x16xf32>,
    %262 = vector.extract_strided_slice %242 {offsets = [2, 0], sizes = [2, 16], strides = [1, 1]} : vector<4x16xf32> to vector<2x16xf32>
    %c7_i32_74 = arith.constant 7 : i32
    %263 = arith.subi %c7_i32_74, %c2_i32_51 : i32
    %c2_i32_75 = arith.constant 2 : i32
    %264 = arith.muli %263, %c2_i32_75 : i32
    %c1_76 = arith.constant 1 : index
    %265 = arith.index_cast %264 : i32 to index
    %c16_77 = arith.constant 16 : index
    %266 = vector.load %arg8[%c1_76, %265, %c16_77] : memref<2x16x32xf32, #tpu.memory_space<vmem>>, vector<1x2x16xf32>
    %267 = vector.shape_cast %266 : vector<1x2x16xf32> to vector<2x16xf32>
    %268 = vector.shape_cast %262 : vector<2x16xf32> to vector<1x2x16xf32>
    tpu.vector_store %arg8[%c1_76, %265, %c16_77], %268 {strides = array<i32>} : memref<2x16x32xf32, #tpu.memory_space<vmem>>, vector<1x2x16xf32>,
    %c3_i32 = arith.constant 3 : i32
    %269 = arith.index_cast %c3_i32 : i32 to index
    %c0_78 = arith.constant 0 : index
    %c0_79 = arith.constant 0 : index
    %270 = vector.load %arg1[%269, %c0_78, %c0_79] : memref<8x4x16xf32, #tpu.memory_space<vmem>>, vector<1x4x16xf32>
    %271 = vector.shape_cast %270 : vector<1x4x16xf32> to vector<4x16xf32>
    %c7_i32_80 = arith.constant 7 : i32
    %272 = arith.subi %c7_i32_80, %c3_i32 : i32
    %273 = arith.index_cast %272 : i32 to index
    %c0_81 = arith.constant 0 : index
    %c0_82 = arith.constant 0 : index
    %274 = vector.load %arg1[%273, %c0_81, %c0_82] : memref<8x4x16xf32, #tpu.memory_space<vmem>>, vector<1x4x16xf32>
    %275 = vector.shape_cast %274 : vector<1x4x16xf32> to vector<4x16xf32>
    %276 = tpu.concatenate %271, %216, %275, %242 in 1 : vector<4x16xf32>, vector<4x16xf32>, vector<4x16xf32>, vector<4x16xf32> -> vector<4x64xf32>
    %cst_83 = arith.constant dense<0.000000e+00> : vector<4x128xf32>
    %277 = tpu.matmul %276, %0, %cst_83 {dimension_numbers = #tpu.dot_dimension_numbers<[1], [0], [0], [1], [0, 0, 1, 1], [], []>} : vector<4x64xf32>, vector<64x128xf32>, vector<4x128xf32> -> vector<4x128xf32>
    %278 = arith.addf %277, %3 : vector<4x128xf32>
    %279 = vector.extract_strided_slice %278 {offsets = [0, 0], sizes = [4, 64], strides = [1, 1]} : vector<4x128xf32> to vector<4x64xf32>
    %280 = vector.extract_strided_slice %279 {offsets = [0, 0], sizes = [4, 16], strides = [1, 1]} : vector<4x64xf32> to vector<4x16xf32>
    %281 = arith.negf %280 : vector<4x16xf32>
    %282 = math.exp %281 : vector<4x16xf32>
    %cst_84 = arith.constant 1.000000e+00 : f32
    %283 = vector.broadcast %cst_84 : f32 to vector<4x16xf32>
    %284 = arith.addf %283, %282 : vector<4x16xf32>
    %285 = arith.divf %283, %284 : vector<4x16xf32>
    %286 = vector.extract_strided_slice %279 {offsets = [0, 16], sizes = [4, 16], strides = [1, 1]} : vector<4x64xf32> to vector<4x16xf32>
    %287 = arith.negf %286 : vector<4x16xf32>
    %288 = math.exp %287 : vector<4x16xf32>
    %cst_85 = arith.constant 1.000000e+00 : f32
    %289 = vector.broadcast %cst_85 : f32 to vector<4x16xf32>
    %290 = arith.addf %289, %288 : vector<4x16xf32>
    %291 = arith.divf %289, %290 : vector<4x16xf32>
    %292 = vector.extract_strided_slice %279 {offsets = [0, 32], sizes = [4, 16], strides = [1, 1]} : vector<4x64xf32> to vector<4x16xf32>
    %293 = math.tanh %292 : vector<4x16xf32>
    %294 = vector.extract_strided_slice %279 {offsets = [0, 48], sizes = [4, 16], strides = [1, 1]} : vector<4x64xf32> to vector<4x16xf32>
    %295 = arith.negf %294 : vector<4x16xf32>
    %296 = math.exp %295 : vector<4x16xf32>
    %cst_86 = arith.constant 1.000000e+00 : f32
    %297 = vector.broadcast %cst_86 : f32 to vector<4x16xf32>
    %298 = arith.addf %297, %296 : vector<4x16xf32>
    %299 = arith.divf %297, %298 : vector<4x16xf32>
    %300 = arith.mulf %291, %214 : vector<4x16xf32>
    %301 = arith.mulf %285, %293 : vector<4x16xf32>
    %302 = arith.addf %300, %301 : vector<4x16xf32>
    %303 = math.tanh %302 : vector<4x16xf32>
    %304 = arith.mulf %299, %303 : vector<4x16xf32>
    %305 = vector.extract_strided_slice %278 {offsets = [0, 64], sizes = [4, 64], strides = [1, 1]} : vector<4x128xf32> to vector<4x64xf32>
    %306 = vector.extract_strided_slice %305 {offsets = [0, 0], sizes = [4, 16], strides = [1, 1]} : vector<4x64xf32> to vector<4x16xf32>
    %307 = arith.negf %306 : vector<4x16xf32>
    %308 = math.exp %307 : vector<4x16xf32>
    %cst_87 = arith.constant 1.000000e+00 : f32
    %309 = vector.broadcast %cst_87 : f32 to vector<4x16xf32>
    %310 = arith.addf %309, %308 : vector<4x16xf32>
    %311 = arith.divf %309, %310 : vector<4x16xf32>
    %312 = vector.extract_strided_slice %305 {offsets = [0, 16], sizes = [4, 16], strides = [1, 1]} : vector<4x64xf32> to vector<4x16xf32>
    %313 = arith.negf %312 : vector<4x16xf32>
    %314 = math.exp %313 : vector<4x16xf32>
    %cst_88 = arith.constant 1.000000e+00 : f32
    %315 = vector.broadcast %cst_88 : f32 to vector<4x16xf32>
    %316 = arith.addf %315, %314 : vector<4x16xf32>
    %317 = arith.divf %315, %316 : vector<4x16xf32>
    %318 = vector.extract_strided_slice %305 {offsets = [0, 32], sizes = [4, 16], strides = [1, 1]} : vector<4x64xf32> to vector<4x16xf32>
    %319 = math.tanh %318 : vector<4x16xf32>
    %320 = vector.extract_strided_slice %305 {offsets = [0, 48], sizes = [4, 16], strides = [1, 1]} : vector<4x64xf32> to vector<4x16xf32>
    %321 = arith.negf %320 : vector<4x16xf32>
    %322 = math.exp %321 : vector<4x16xf32>
    %cst_89 = arith.constant 1.000000e+00 : f32
    %323 = vector.broadcast %cst_89 : f32 to vector<4x16xf32>
    %324 = arith.addf %323, %322 : vector<4x16xf32>
    %325 = arith.divf %323, %324 : vector<4x16xf32>
    %326 = arith.mulf %317, %240 : vector<4x16xf32>
    %327 = arith.mulf %311, %319 : vector<4x16xf32>
    %328 = arith.addf %326, %327 : vector<4x16xf32>
    %329 = math.tanh %328 : vector<4x16xf32>
    %330 = arith.mulf %325, %329 : vector<4x16xf32>
    %331 = vector.extract_strided_slice %304 {offsets = [0, 0], sizes = [2, 16], strides = [1, 1]} : vector<4x16xf32> to vector<2x16xf32>
    %c2_i32_90 = arith.constant 2 : i32
    %332 = arith.muli %c3_i32, %c2_i32_90 : i32
    %c0_91 = arith.constant 0 : index
    %333 = arith.index_cast %332 : i32 to index
    %c0_92 = arith.constant 0 : index
    %334 = vector.load %arg8[%c0_91, %333, %c0_92] : memref<2x16x32xf32, #tpu.memory_space<vmem>>, vector<1x2x16xf32>
    %335 = vector.shape_cast %334 : vector<1x2x16xf32> to vector<2x16xf32>
    %336 = vector.shape_cast %331 : vector<2x16xf32> to vector<1x2x16xf32>
    tpu.vector_store %arg8[%c0_91, %333, %c0_92], %336 {strides = array<i32>} : memref<2x16x32xf32, #tpu.memory_space<vmem>>, vector<1x2x16xf32>,
    %337 = vector.extract_strided_slice %330 {offsets = [0, 0], sizes = [2, 16], strides = [1, 1]} : vector<4x16xf32> to vector<2x16xf32>
    %c7_i32_93 = arith.constant 7 : i32
    %338 = arith.subi %c7_i32_93, %c3_i32 : i32
    %c2_i32_94 = arith.constant 2 : i32
    %339 = arith.muli %338, %c2_i32_94 : i32
    %c0_95 = arith.constant 0 : index
    %340 = arith.index_cast %339 : i32 to index
    %c16_96 = arith.constant 16 : index
    %341 = vector.load %arg8[%c0_95, %340, %c16_96] : memref<2x16x32xf32, #tpu.memory_space<vmem>>, vector<1x2x16xf32>
    %342 = vector.shape_cast %341 : vector<1x2x16xf32> to vector<2x16xf32>
    %343 = vector.shape_cast %337 : vector<2x16xf32> to vector<1x2x16xf32>
    tpu.vector_store %arg8[%c0_95, %340, %c16_96], %343 {strides = array<i32>} : memref<2x16x32xf32, #tpu.memory_space<vmem>>, vector<1x2x16xf32>,
    %344 = vector.extract_strided_slice %304 {offsets = [2, 0], sizes = [2, 16], strides = [1, 1]} : vector<4x16xf32> to vector<2x16xf32>
    %c2_i32_97 = arith.constant 2 : i32
    %345 = arith.muli %c3_i32, %c2_i32_97 : i32
    %c1_98 = arith.constant 1 : index
    %346 = arith.index_cast %345 : i32 to index
    %c0_99 = arith.constant 0 : index
    %347 = vector.load %arg8[%c1_98, %346, %c0_99] : memref<2x16x32xf32, #tpu.memory_space<vmem>>, vector<1x2x16xf32>
    %348 = vector.shape_cast %347 : vector<1x2x16xf32> to vector<2x16xf32>
    %349 = vector.shape_cast %344 : vector<2x16xf32> to vector<1x2x16xf32>
    tpu.vector_store %arg8[%c1_98, %346, %c0_99], %349 {strides = array<i32>} : memref<2x16x32xf32, #tpu.memory_space<vmem>>, vector<1x2x16xf32>,
    %350 = vector.extract_strided_slice %330 {offsets = [2, 0], sizes = [2, 16], strides = [1, 1]} : vector<4x16xf32> to vector<2x16xf32>
    %c7_i32_100 = arith.constant 7 : i32
    %351 = arith.subi %c7_i32_100, %c3_i32 : i32
    %c2_i32_101 = arith.constant 2 : i32
    %352 = arith.muli %351, %c2_i32_101 : i32
    %c1_102 = arith.constant 1 : index
    %353 = arith.index_cast %352 : i32 to index
    %c16_103 = arith.constant 16 : index
    %354 = vector.load %arg8[%c1_102, %353, %c16_103] : memref<2x16x32xf32, #tpu.memory_space<vmem>>, vector<1x2x16xf32>
    %355 = vector.shape_cast %354 : vector<1x2x16xf32> to vector<2x16xf32>
    %356 = vector.shape_cast %350 : vector<2x16xf32> to vector<1x2x16xf32>
    tpu.vector_store %arg8[%c1_102, %353, %c16_103], %356 {strides = array<i32>} : memref<2x16x32xf32, #tpu.memory_space<vmem>>, vector<1x2x16xf32>,
    %c4_i32 = arith.constant 4 : i32
    %357 = arith.index_cast %c4_i32 : i32 to index
    %c0_104 = arith.constant 0 : index
    %c0_105 = arith.constant 0 : index
    %358 = vector.load %arg1[%357, %c0_104, %c0_105] : memref<8x4x16xf32, #tpu.memory_space<vmem>>, vector<1x4x16xf32>
    %359 = vector.shape_cast %358 : vector<1x4x16xf32> to vector<4x16xf32>
    %c7_i32_106 = arith.constant 7 : i32
    %360 = arith.subi %c7_i32_106, %c4_i32 : i32
    %361 = arith.index_cast %360 : i32 to index
    %c0_107 = arith.constant 0 : index
    %c0_108 = arith.constant 0 : index
    %362 = vector.load %arg1[%361, %c0_107, %c0_108] : memref<8x4x16xf32, #tpu.memory_space<vmem>>, vector<1x4x16xf32>
    %363 = vector.shape_cast %362 : vector<1x4x16xf32> to vector<4x16xf32>
    %364 = tpu.concatenate %359, %304, %363, %330 in 1 : vector<4x16xf32>, vector<4x16xf32>, vector<4x16xf32>, vector<4x16xf32> -> vector<4x64xf32>
    %cst_109 = arith.constant dense<0.000000e+00> : vector<4x128xf32>
    %365 = tpu.matmul %364, %0, %cst_109 {dimension_numbers = #tpu.dot_dimension_numbers<[1], [0], [0], [1], [0, 0, 1, 1], [], []>} : vector<4x64xf32>, vector<64x128xf32>, vector<4x128xf32> -> vector<4x128xf32>
    %366 = arith.addf %365, %3 : vector<4x128xf32>
    %367 = vector.extract_strided_slice %366 {offsets = [0, 0], sizes = [4, 64], strides = [1, 1]} : vector<4x128xf32> to vector<4x64xf32>
    %368 = vector.extract_strided_slice %367 {offsets = [0, 0], sizes = [4, 16], strides = [1, 1]} : vector<4x64xf32> to vector<4x16xf32>
    %369 = arith.negf %368 : vector<4x16xf32>
    %370 = math.exp %369 : vector<4x16xf32>
    %cst_110 = arith.constant 1.000000e+00 : f32
    %371 = vector.broadcast %cst_110 : f32 to vector<4x16xf32>
    %372 = arith.addf %371, %370 : vector<4x16xf32>
    %373 = arith.divf %371, %372 : vector<4x16xf32>
    %374 = vector.extract_strided_slice %367 {offsets = [0, 16], sizes = [4, 16], strides = [1, 1]} : vector<4x64xf32> to vector<4x16xf32>
    %375 = arith.negf %374 : vector<4x16xf32>
    %376 = math.exp %375 : vector<4x16xf32>
    %cst_111 = arith.constant 1.000000e+00 : f32
    %377 = vector.broadcast %cst_111 : f32 to vector<4x16xf32>
    %378 = arith.addf %377, %376 : vector<4x16xf32>
    %379 = arith.divf %377, %378 : vector<4x16xf32>
    %380 = vector.extract_strided_slice %367 {offsets = [0, 32], sizes = [4, 16], strides = [1, 1]} : vector<4x64xf32> to vector<4x16xf32>
    %381 = math.tanh %380 : vector<4x16xf32>
    %382 = vector.extract_strided_slice %367 {offsets = [0, 48], sizes = [4, 16], strides = [1, 1]} : vector<4x64xf32> to vector<4x16xf32>
    %383 = arith.negf %382 : vector<4x16xf32>
    %384 = math.exp %383 : vector<4x16xf32>
    %cst_112 = arith.constant 1.000000e+00 : f32
    %385 = vector.broadcast %cst_112 : f32 to vector<4x16xf32>
    %386 = arith.addf %385, %384 : vector<4x16xf32>
    %387 = arith.divf %385, %386 : vector<4x16xf32>
    %388 = arith.mulf %379, %302 : vector<4x16xf32>
    %389 = arith.mulf %373, %381 : vector<4x16xf32>
    %390 = arith.addf %388, %389 : vector<4x16xf32>
    %391 = math.tanh %390 : vector<4x16xf32>
    %392 = arith.mulf %387, %391 : vector<4x16xf32>
    %393 = vector.extract_strided_slice %366 {offsets = [0, 64], sizes = [4, 64], strides = [1, 1]} : vector<4x128xf32> to vector<4x64xf32>
    %394 = vector.extract_strided_slice %393 {offsets = [0, 0], sizes = [4, 16], strides = [1, 1]} : vector<4x64xf32> to vector<4x16xf32>
    %395 = arith.negf %394 : vector<4x16xf32>
    %396 = math.exp %395 : vector<4x16xf32>
    %cst_113 = arith.constant 1.000000e+00 : f32
    %397 = vector.broadcast %cst_113 : f32 to vector<4x16xf32>
    %398 = arith.addf %397, %396 : vector<4x16xf32>
    %399 = arith.divf %397, %398 : vector<4x16xf32>
    %400 = vector.extract_strided_slice %393 {offsets = [0, 16], sizes = [4, 16], strides = [1, 1]} : vector<4x64xf32> to vector<4x16xf32>
    %401 = arith.negf %400 : vector<4x16xf32>
    %402 = math.exp %401 : vector<4x16xf32>
    %cst_114 = arith.constant 1.000000e+00 : f32
    %403 = vector.broadcast %cst_114 : f32 to vector<4x16xf32>
    %404 = arith.addf %403, %402 : vector<4x16xf32>
    %405 = arith.divf %403, %404 : vector<4x16xf32>
    %406 = vector.extract_strided_slice %393 {offsets = [0, 32], sizes = [4, 16], strides = [1, 1]} : vector<4x64xf32> to vector<4x16xf32>
    %407 = math.tanh %406 : vector<4x16xf32>
    %408 = vector.extract_strided_slice %393 {offsets = [0, 48], sizes = [4, 16], strides = [1, 1]} : vector<4x64xf32> to vector<4x16xf32>
    %409 = arith.negf %408 : vector<4x16xf32>
    %410 = math.exp %409 : vector<4x16xf32>
    %cst_115 = arith.constant 1.000000e+00 : f32
    %411 = vector.broadcast %cst_115 : f32 to vector<4x16xf32>
    %412 = arith.addf %411, %410 : vector<4x16xf32>
    %413 = arith.divf %411, %412 : vector<4x16xf32>
    %414 = arith.mulf %405, %328 : vector<4x16xf32>
    %415 = arith.mulf %399, %407 : vector<4x16xf32>
    %416 = arith.addf %414, %415 : vector<4x16xf32>
    %417 = math.tanh %416 : vector<4x16xf32>
    %418 = arith.mulf %413, %417 : vector<4x16xf32>
    %419 = vector.extract_strided_slice %392 {offsets = [0, 0], sizes = [2, 16], strides = [1, 1]} : vector<4x16xf32> to vector<2x16xf32>
    %c2_i32_116 = arith.constant 2 : i32
    %420 = arith.muli %c4_i32, %c2_i32_116 : i32
    %c0_117 = arith.constant 0 : index
    %421 = arith.index_cast %420 : i32 to index
    %c0_118 = arith.constant 0 : index
    %422 = vector.load %arg8[%c0_117, %421, %c0_118] : memref<2x16x32xf32, #tpu.memory_space<vmem>>, vector<1x2x16xf32>
    %423 = vector.shape_cast %422 : vector<1x2x16xf32> to vector<2x16xf32>
    %424 = vector.shape_cast %419 : vector<2x16xf32> to vector<1x2x16xf32>
    tpu.vector_store %arg8[%c0_117, %421, %c0_118], %424 {strides = array<i32>} : memref<2x16x32xf32, #tpu.memory_space<vmem>>, vector<1x2x16xf32>,
    %425 = vector.extract_strided_slice %418 {offsets = [0, 0], sizes = [2, 16], strides = [1, 1]} : vector<4x16xf32> to vector<2x16xf32>
    %c7_i32_119 = arith.constant 7 : i32
    %426 = arith.subi %c7_i32_119, %c4_i32 : i32
    %c2_i32_120 = arith.constant 2 : i32
    %427 = arith.muli %426, %c2_i32_120 : i32
    %c0_121 = arith.constant 0 : index
    %428 = arith.index_cast %427 : i32 to index
    %c16_122 = arith.constant 16 : index
    %429 = vector.load %arg8[%c0_121, %428, %c16_122] : memref<2x16x32xf32, #tpu.memory_space<vmem>>, vector<1x2x16xf32>
    %430 = vector.shape_cast %429 : vector<1x2x16xf32> to vector<2x16xf32>
    %431 = vector.shape_cast %425 : vector<2x16xf32> to vector<1x2x16xf32>
    tpu.vector_store %arg8[%c0_121, %428, %c16_122], %431 {strides = array<i32>} : memref<2x16x32xf32, #tpu.memory_space<vmem>>, vector<1x2x16xf32>,
    %432 = vector.extract_strided_slice %392 {offsets = [2, 0], sizes = [2, 16], strides = [1, 1]} : vector<4x16xf32> to vector<2x16xf32>
    %c2_i32_123 = arith.constant 2 : i32
    %433 = arith.muli %c4_i32, %c2_i32_123 : i32
    %c1_124 = arith.constant 1 : index
    %434 = arith.index_cast %433 : i32 to index
    %c0_125 = arith.constant 0 : index
    %435 = vector.load %arg8[%c1_124, %434, %c0_125] : memref<2x16x32xf32, #tpu.memory_space<vmem>>, vector<1x2x16xf32>
    %436 = vector.shape_cast %435 : vector<1x2x16xf32> to vector<2x16xf32>
    %437 = vector.shape_cast %432 : vector<2x16xf32> to vector<1x2x16xf32>
    tpu.vector_store %arg8[%c1_124, %434, %c0_125], %437 {strides = array<i32>} : memref<2x16x32xf32, #tpu.memory_space<vmem>>, vector<1x2x16xf32>,
    %438 = vector.extract_strided_slice %418 {offsets = [2, 0], sizes = [2, 16], strides = [1, 1]} : vector<4x16xf32> to vector<2x16xf32>
    %c7_i32_126 = arith.constant 7 : i32
    %439 = arith.subi %c7_i32_126, %c4_i32 : i32
    %c2_i32_127 = arith.constant 2 : i32
    %440 = arith.muli %439, %c2_i32_127 : i32
    %c1_128 = arith.constant 1 : index
    %441 = arith.index_cast %440 : i32 to index
    %c16_129 = arith.constant 16 : index
    %442 = vector.load %arg8[%c1_128, %441, %c16_129] : memref<2x16x32xf32, #tpu.memory_space<vmem>>, vector<1x2x16xf32>
    %443 = vector.shape_cast %442 : vector<1x2x16xf32> to vector<2x16xf32>
    %444 = vector.shape_cast %438 : vector<2x16xf32> to vector<1x2x16xf32>
    tpu.vector_store %arg8[%c1_128, %441, %c16_129], %444 {strides = array<i32>} : memref<2x16x32xf32, #tpu.memory_space<vmem>>, vector<1x2x16xf32>,
    %c5_i32 = arith.constant 5 : i32
    %445 = arith.index_cast %c5_i32 : i32 to index
    %c0_130 = arith.constant 0 : index
    %c0_131 = arith.constant 0 : index
    %446 = vector.load %arg1[%445, %c0_130, %c0_131] : memref<8x4x16xf32, #tpu.memory_space<vmem>>, vector<1x4x16xf32>
    %447 = vector.shape_cast %446 : vector<1x4x16xf32> to vector<4x16xf32>
    %c7_i32_132 = arith.constant 7 : i32
    %448 = arith.subi %c7_i32_132, %c5_i32 : i32
    %449 = arith.index_cast %448 : i32 to index
    %c0_133 = arith.constant 0 : index
    %c0_134 = arith.constant 0 : index
    %450 = vector.load %arg1[%449, %c0_133, %c0_134] : memref<8x4x16xf32, #tpu.memory_space<vmem>>, vector<1x4x16xf32>
    %451 = vector.shape_cast %450 : vector<1x4x16xf32> to vector<4x16xf32>
    %452 = tpu.concatenate %447, %392, %451, %418 in 1 : vector<4x16xf32>, vector<4x16xf32>, vector<4x16xf32>, vector<4x16xf32> -> vector<4x64xf32>
    %cst_135 = arith.constant dense<0.000000e+00> : vector<4x128xf32>
    %453 = tpu.matmul %452, %0, %cst_135 {dimension_numbers = #tpu.dot_dimension_numbers<[1], [0], [0], [1], [0, 0, 1, 1], [], []>} : vector<4x64xf32>, vector<64x128xf32>, vector<4x128xf32> -> vector<4x128xf32>
    %454 = arith.addf %453, %3 : vector<4x128xf32>
    %455 = vector.extract_strided_slice %454 {offsets = [0, 0], sizes = [4, 64], strides = [1, 1]} : vector<4x128xf32> to vector<4x64xf32>
    %456 = vector.extract_strided_slice %455 {offsets = [0, 0], sizes = [4, 16], strides = [1, 1]} : vector<4x64xf32> to vector<4x16xf32>
    %457 = arith.negf %456 : vector<4x16xf32>
    %458 = math.exp %457 : vector<4x16xf32>
    %cst_136 = arith.constant 1.000000e+00 : f32
    %459 = vector.broadcast %cst_136 : f32 to vector<4x16xf32>
    %460 = arith.addf %459, %458 : vector<4x16xf32>
    %461 = arith.divf %459, %460 : vector<4x16xf32>
    %462 = vector.extract_strided_slice %455 {offsets = [0, 16], sizes = [4, 16], strides = [1, 1]} : vector<4x64xf32> to vector<4x16xf32>
    %463 = arith.negf %462 : vector<4x16xf32>
    %464 = math.exp %463 : vector<4x16xf32>
    %cst_137 = arith.constant 1.000000e+00 : f32
    %465 = vector.broadcast %cst_137 : f32 to vector<4x16xf32>
    %466 = arith.addf %465, %464 : vector<4x16xf32>
    %467 = arith.divf %465, %466 : vector<4x16xf32>
    %468 = vector.extract_strided_slice %455 {offsets = [0, 32], sizes = [4, 16], strides = [1, 1]} : vector<4x64xf32> to vector<4x16xf32>
    %469 = math.tanh %468 : vector<4x16xf32>
    %470 = vector.extract_strided_slice %455 {offsets = [0, 48], sizes = [4, 16], strides = [1, 1]} : vector<4x64xf32> to vector<4x16xf32>
    %471 = arith.negf %470 : vector<4x16xf32>
    %472 = math.exp %471 : vector<4x16xf32>
    %cst_138 = arith.constant 1.000000e+00 : f32
    %473 = vector.broadcast %cst_138 : f32 to vector<4x16xf32>
    %474 = arith.addf %473, %472 : vector<4x16xf32>
    %475 = arith.divf %473, %474 : vector<4x16xf32>
    %476 = arith.mulf %467, %390 : vector<4x16xf32>
    %477 = arith.mulf %461, %469 : vector<4x16xf32>
    %478 = arith.addf %476, %477 : vector<4x16xf32>
    %479 = math.tanh %478 : vector<4x16xf32>
    %480 = arith.mulf %475, %479 : vector<4x16xf32>
    %481 = vector.extract_strided_slice %454 {offsets = [0, 64], sizes = [4, 64], strides = [1, 1]} : vector<4x128xf32> to vector<4x64xf32>
    %482 = vector.extract_strided_slice %481 {offsets = [0, 0], sizes = [4, 16], strides = [1, 1]} : vector<4x64xf32> to vector<4x16xf32>
    %483 = arith.negf %482 : vector<4x16xf32>
    %484 = math.exp %483 : vector<4x16xf32>
    %cst_139 = arith.constant 1.000000e+00 : f32
    %485 = vector.broadcast %cst_139 : f32 to vector<4x16xf32>
    %486 = arith.addf %485, %484 : vector<4x16xf32>
    %487 = arith.divf %485, %486 : vector<4x16xf32>
    %488 = vector.extract_strided_slice %481 {offsets = [0, 16], sizes = [4, 16], strides = [1, 1]} : vector<4x64xf32> to vector<4x16xf32>
    %489 = arith.negf %488 : vector<4x16xf32>
    %490 = math.exp %489 : vector<4x16xf32>
    %cst_140 = arith.constant 1.000000e+00 : f32
    %491 = vector.broadcast %cst_140 : f32 to vector<4x16xf32>
    %492 = arith.addf %491, %490 : vector<4x16xf32>
    %493 = arith.divf %491, %492 : vector<4x16xf32>
    %494 = vector.extract_strided_slice %481 {offsets = [0, 32], sizes = [4, 16], strides = [1, 1]} : vector<4x64xf32> to vector<4x16xf32>
    %495 = math.tanh %494 : vector<4x16xf32>
    %496 = vector.extract_strided_slice %481 {offsets = [0, 48], sizes = [4, 16], strides = [1, 1]} : vector<4x64xf32> to vector<4x16xf32>
    %497 = arith.negf %496 : vector<4x16xf32>
    %498 = math.exp %497 : vector<4x16xf32>
    %cst_141 = arith.constant 1.000000e+00 : f32
    %499 = vector.broadcast %cst_141 : f32 to vector<4x16xf32>
    %500 = arith.addf %499, %498 : vector<4x16xf32>
    %501 = arith.divf %499, %500 : vector<4x16xf32>
    %502 = arith.mulf %493, %416 : vector<4x16xf32>
    %503 = arith.mulf %487, %495 : vector<4x16xf32>
    %504 = arith.addf %502, %503 : vector<4x16xf32>
    %505 = math.tanh %504 : vector<4x16xf32>
    %506 = arith.mulf %501, %505 : vector<4x16xf32>
    %507 = vector.extract_strided_slice %480 {offsets = [0, 0], sizes = [2, 16], strides = [1, 1]} : vector<4x16xf32> to vector<2x16xf32>
    %c2_i32_142 = arith.constant 2 : i32
    %508 = arith.muli %c5_i32, %c2_i32_142 : i32
    %c0_143 = arith.constant 0 : index
    %509 = arith.index_cast %508 : i32 to index
    %c0_144 = arith.constant 0 : index
    %510 = vector.load %arg8[%c0_143, %509, %c0_144] : memref<2x16x32xf32, #tpu.memory_space<vmem>>, vector<1x2x16xf32>
    %511 = vector.shape_cast %510 : vector<1x2x16xf32> to vector<2x16xf32>
    %512 = vector.shape_cast %507 : vector<2x16xf32> to vector<1x2x16xf32>
    tpu.vector_store %arg8[%c0_143, %509, %c0_144], %512 {strides = array<i32>} : memref<2x16x32xf32, #tpu.memory_space<vmem>>, vector<1x2x16xf32>,
    %513 = vector.extract_strided_slice %506 {offsets = [0, 0], sizes = [2, 16], strides = [1, 1]} : vector<4x16xf32> to vector<2x16xf32>
    %c7_i32_145 = arith.constant 7 : i32
    %514 = arith.subi %c7_i32_145, %c5_i32 : i32
    %c2_i32_146 = arith.constant 2 : i32
    %515 = arith.muli %514, %c2_i32_146 : i32
    %c0_147 = arith.constant 0 : index
    %516 = arith.index_cast %515 : i32 to index
    %c16_148 = arith.constant 16 : index
    %517 = vector.load %arg8[%c0_147, %516, %c16_148] : memref<2x16x32xf32, #tpu.memory_space<vmem>>, vector<1x2x16xf32>
    %518 = vector.shape_cast %517 : vector<1x2x16xf32> to vector<2x16xf32>
    %519 = vector.shape_cast %513 : vector<2x16xf32> to vector<1x2x16xf32>
    tpu.vector_store %arg8[%c0_147, %516, %c16_148], %519 {strides = array<i32>} : memref<2x16x32xf32, #tpu.memory_space<vmem>>, vector<1x2x16xf32>,
    %520 = vector.extract_strided_slice %480 {offsets = [2, 0], sizes = [2, 16], strides = [1, 1]} : vector<4x16xf32> to vector<2x16xf32>
    %c2_i32_149 = arith.constant 2 : i32
    %521 = arith.muli %c5_i32, %c2_i32_149 : i32
    %c1_150 = arith.constant 1 : index
    %522 = arith.index_cast %521 : i32 to index
    %c0_151 = arith.constant 0 : index
    %523 = vector.load %arg8[%c1_150, %522, %c0_151] : memref<2x16x32xf32, #tpu.memory_space<vmem>>, vector<1x2x16xf32>
    %524 = vector.shape_cast %523 : vector<1x2x16xf32> to vector<2x16xf32>
    %525 = vector.shape_cast %520 : vector<2x16xf32> to vector<1x2x16xf32>
    tpu.vector_store %arg8[%c1_150, %522, %c0_151], %525 {strides = array<i32>} : memref<2x16x32xf32, #tpu.memory_space<vmem>>, vector<1x2x16xf32>,
    %526 = vector.extract_strided_slice %506 {offsets = [2, 0], sizes = [2, 16], strides = [1, 1]} : vector<4x16xf32> to vector<2x16xf32>
    %c7_i32_152 = arith.constant 7 : i32
    %527 = arith.subi %c7_i32_152, %c5_i32 : i32
    %c2_i32_153 = arith.constant 2 : i32
    %528 = arith.muli %527, %c2_i32_153 : i32
    %c1_154 = arith.constant 1 : index
    %529 = arith.index_cast %528 : i32 to index
    %c16_155 = arith.constant 16 : index
    %530 = vector.load %arg8[%c1_154, %529, %c16_155] : memref<2x16x32xf32, #tpu.memory_space<vmem>>, vector<1x2x16xf32>
    %531 = vector.shape_cast %530 : vector<1x2x16xf32> to vector<2x16xf32>
    %532 = vector.shape_cast %526 : vector<2x16xf32> to vector<1x2x16xf32>
    tpu.vector_store %arg8[%c1_154, %529, %c16_155], %532 {strides = array<i32>} : memref<2x16x32xf32, #tpu.memory_space<vmem>>, vector<1x2x16xf32>,
    %c6_i32 = arith.constant 6 : i32
    %533 = arith.index_cast %c6_i32 : i32 to index
    %c0_156 = arith.constant 0 : index
    %c0_157 = arith.constant 0 : index
    %534 = vector.load %arg1[%533, %c0_156, %c0_157] : memref<8x4x16xf32, #tpu.memory_space<vmem>>, vector<1x4x16xf32>
    %535 = vector.shape_cast %534 : vector<1x4x16xf32> to vector<4x16xf32>
    %c7_i32_158 = arith.constant 7 : i32
    %536 = arith.subi %c7_i32_158, %c6_i32 : i32
    %537 = arith.index_cast %536 : i32 to index
    %c0_159 = arith.constant 0 : index
    %c0_160 = arith.constant 0 : index
    %538 = vector.load %arg1[%537, %c0_159, %c0_160] : memref<8x4x16xf32, #tpu.memory_space<vmem>>, vector<1x4x16xf32>
    %539 = vector.shape_cast %538 : vector<1x4x16xf32> to vector<4x16xf32>
    %540 = tpu.concatenate %535, %480, %539, %506 in 1 : vector<4x16xf32>, vector<4x16xf32>, vector<4x16xf32>, vector<4x16xf32> -> vector<4x64xf32>
    %cst_161 = arith.constant dense<0.000000e+00> : vector<4x128xf32>
    %541 = tpu.matmul %540, %0, %cst_161 {dimension_numbers = #tpu.dot_dimension_numbers<[1], [0], [0], [1], [0, 0, 1, 1], [], []>} : vector<4x64xf32>, vector<64x128xf32>, vector<4x128xf32> -> vector<4x128xf32>
    %542 = arith.addf %541, %3 : vector<4x128xf32>
    %543 = vector.extract_strided_slice %542 {offsets = [0, 0], sizes = [4, 64], strides = [1, 1]} : vector<4x128xf32> to vector<4x64xf32>
    %544 = vector.extract_strided_slice %543 {offsets = [0, 0], sizes = [4, 16], strides = [1, 1]} : vector<4x64xf32> to vector<4x16xf32>
    %545 = arith.negf %544 : vector<4x16xf32>
    %546 = math.exp %545 : vector<4x16xf32>
    %cst_162 = arith.constant 1.000000e+00 : f32
    %547 = vector.broadcast %cst_162 : f32 to vector<4x16xf32>
    %548 = arith.addf %547, %546 : vector<4x16xf32>
    %549 = arith.divf %547, %548 : vector<4x16xf32>
    %550 = vector.extract_strided_slice %543 {offsets = [0, 16], sizes = [4, 16], strides = [1, 1]} : vector<4x64xf32> to vector<4x16xf32>
    %551 = arith.negf %550 : vector<4x16xf32>
    %552 = math.exp %551 : vector<4x16xf32>
    %cst_163 = arith.constant 1.000000e+00 : f32
    %553 = vector.broadcast %cst_163 : f32 to vector<4x16xf32>
    %554 = arith.addf %553, %552 : vector<4x16xf32>
    %555 = arith.divf %553, %554 : vector<4x16xf32>
    %556 = vector.extract_strided_slice %543 {offsets = [0, 32], sizes = [4, 16], strides = [1, 1]} : vector<4x64xf32> to vector<4x16xf32>
    %557 = math.tanh %556 : vector<4x16xf32>
    %558 = vector.extract_strided_slice %543 {offsets = [0, 48], sizes = [4, 16], strides = [1, 1]} : vector<4x64xf32> to vector<4x16xf32>
    %559 = arith.negf %558 : vector<4x16xf32>
    %560 = math.exp %559 : vector<4x16xf32>
    %cst_164 = arith.constant 1.000000e+00 : f32
    %561 = vector.broadcast %cst_164 : f32 to vector<4x16xf32>
    %562 = arith.addf %561, %560 : vector<4x16xf32>
    %563 = arith.divf %561, %562 : vector<4x16xf32>
    %564 = arith.mulf %555, %478 : vector<4x16xf32>
    %565 = arith.mulf %549, %557 : vector<4x16xf32>
    %566 = arith.addf %564, %565 : vector<4x16xf32>
    %567 = math.tanh %566 : vector<4x16xf32>
    %568 = arith.mulf %563, %567 : vector<4x16xf32>
    %569 = vector.extract_strided_slice %542 {offsets = [0, 64], sizes = [4, 64], strides = [1, 1]} : vector<4x128xf32> to vector<4x64xf32>
    %570 = vector.extract_strided_slice %569 {offsets = [0, 0], sizes = [4, 16], strides = [1, 1]} : vector<4x64xf32> to vector<4x16xf32>
    %571 = arith.negf %570 : vector<4x16xf32>
    %572 = math.exp %571 : vector<4x16xf32>
    %cst_165 = arith.constant 1.000000e+00 : f32
    %573 = vector.broadcast %cst_165 : f32 to vector<4x16xf32>
    %574 = arith.addf %573, %572 : vector<4x16xf32>
    %575 = arith.divf %573, %574 : vector<4x16xf32>
    %576 = vector.extract_strided_slice %569 {offsets = [0, 16], sizes = [4, 16], strides = [1, 1]} : vector<4x64xf32> to vector<4x16xf32>
    %577 = arith.negf %576 : vector<4x16xf32>
    %578 = math.exp %577 : vector<4x16xf32>
    %cst_166 = arith.constant 1.000000e+00 : f32
    %579 = vector.broadcast %cst_166 : f32 to vector<4x16xf32>
    %580 = arith.addf %579, %578 : vector<4x16xf32>
    %581 = arith.divf %579, %580 : vector<4x16xf32>
    %582 = vector.extract_strided_slice %569 {offsets = [0, 32], sizes = [4, 16], strides = [1, 1]} : vector<4x64xf32> to vector<4x16xf32>
    %583 = math.tanh %582 : vector<4x16xf32>
    %584 = vector.extract_strided_slice %569 {offsets = [0, 48], sizes = [4, 16], strides = [1, 1]} : vector<4x64xf32> to vector<4x16xf32>
    %585 = arith.negf %584 : vector<4x16xf32>
    %586 = math.exp %585 : vector<4x16xf32>
    %cst_167 = arith.constant 1.000000e+00 : f32
    %587 = vector.broadcast %cst_167 : f32 to vector<4x16xf32>
    %588 = arith.addf %587, %586 : vector<4x16xf32>
    %589 = arith.divf %587, %588 : vector<4x16xf32>
    %590 = arith.mulf %581, %504 : vector<4x16xf32>
    %591 = arith.mulf %575, %583 : vector<4x16xf32>
    %592 = arith.addf %590, %591 : vector<4x16xf32>
    %593 = math.tanh %592 : vector<4x16xf32>
    %594 = arith.mulf %589, %593 : vector<4x16xf32>
    %595 = vector.extract_strided_slice %568 {offsets = [0, 0], sizes = [2, 16], strides = [1, 1]} : vector<4x16xf32> to vector<2x16xf32>
    %c2_i32_168 = arith.constant 2 : i32
    %596 = arith.muli %c6_i32, %c2_i32_168 : i32
    %c0_169 = arith.constant 0 : index
    %597 = arith.index_cast %596 : i32 to index
    %c0_170 = arith.constant 0 : index
    %598 = vector.load %arg8[%c0_169, %597, %c0_170] : memref<2x16x32xf32, #tpu.memory_space<vmem>>, vector<1x2x16xf32>
    %599 = vector.shape_cast %598 : vector<1x2x16xf32> to vector<2x16xf32>
    %600 = vector.shape_cast %595 : vector<2x16xf32> to vector<1x2x16xf32>
    tpu.vector_store %arg8[%c0_169, %597, %c0_170], %600 {strides = array<i32>} : memref<2x16x32xf32, #tpu.memory_space<vmem>>, vector<1x2x16xf32>,
    %601 = vector.extract_strided_slice %594 {offsets = [0, 0], sizes = [2, 16], strides = [1, 1]} : vector<4x16xf32> to vector<2x16xf32>
    %c7_i32_171 = arith.constant 7 : i32
    %602 = arith.subi %c7_i32_171, %c6_i32 : i32
    %c2_i32_172 = arith.constant 2 : i32
    %603 = arith.muli %602, %c2_i32_172 : i32
    %c0_173 = arith.constant 0 : index
    %604 = arith.index_cast %603 : i32 to index
    %c16_174 = arith.constant 16 : index
    %605 = vector.load %arg8[%c0_173, %604, %c16_174] : memref<2x16x32xf32, #tpu.memory_space<vmem>>, vector<1x2x16xf32>
    %606 = vector.shape_cast %605 : vector<1x2x16xf32> to vector<2x16xf32>
    %607 = vector.shape_cast %601 : vector<2x16xf32> to vector<1x2x16xf32>
    tpu.vector_store %arg8[%c0_173, %604, %c16_174], %607 {strides = array<i32>} : memref<2x16x32xf32, #tpu.memory_space<vmem>>, vector<1x2x16xf32>,
    %608 = vector.extract_strided_slice %568 {offsets = [2, 0], sizes = [2, 16], strides = [1, 1]} : vector<4x16xf32> to vector<2x16xf32>
    %c2_i32_175 = arith.constant 2 : i32
    %609 = arith.muli %c6_i32, %c2_i32_175 : i32
    %c1_176 = arith.constant 1 : index
    %610 = arith.index_cast %609 : i32 to index
    %c0_177 = arith.constant 0 : index
    %611 = vector.load %arg8[%c1_176, %610, %c0_177] : memref<2x16x32xf32, #tpu.memory_space<vmem>>, vector<1x2x16xf32>
    %612 = vector.shape_cast %611 : vector<1x2x16xf32> to vector<2x16xf32>
    %613 = vector.shape_cast %608 : vector<2x16xf32> to vector<1x2x16xf32>
    tpu.vector_store %arg8[%c1_176, %610, %c0_177], %613 {strides = array<i32>} : memref<2x16x32xf32, #tpu.memory_space<vmem>>, vector<1x2x16xf32>,
    %614 = vector.extract_strided_slice %594 {offsets = [2, 0], sizes = [2, 16], strides = [1, 1]} : vector<4x16xf32> to vector<2x16xf32>
    %c7_i32_178 = arith.constant 7 : i32
    %615 = arith.subi %c7_i32_178, %c6_i32 : i32
    %c2_i32_179 = arith.constant 2 : i32
    %616 = arith.muli %615, %c2_i32_179 : i32
    %c1_180 = arith.constant 1 : index
    %617 = arith.index_cast %616 : i32 to index
    %c16_181 = arith.constant 16 : index
    %618 = vector.load %arg8[%c1_180, %617, %c16_181] : memref<2x16x32xf32, #tpu.memory_space<vmem>>, vector<1x2x16xf32>
    %619 = vector.shape_cast %618 : vector<1x2x16xf32> to vector<2x16xf32>
    %620 = vector.shape_cast %614 : vector<2x16xf32> to vector<1x2x16xf32>
    tpu.vector_store %arg8[%c1_180, %617, %c16_181], %620 {strides = array<i32>} : memref<2x16x32xf32, #tpu.memory_space<vmem>>, vector<1x2x16xf32>,
    %c7_i32_182 = arith.constant 7 : i32
    %621 = arith.index_cast %c7_i32_182 : i32 to index
    %c0_183 = arith.constant 0 : index
    %c0_184 = arith.constant 0 : index
    %622 = vector.load %arg1[%621, %c0_183, %c0_184] : memref<8x4x16xf32, #tpu.memory_space<vmem>>, vector<1x4x16xf32>
    %623 = vector.shape_cast %622 : vector<1x4x16xf32> to vector<4x16xf32>
    %c7_i32_185 = arith.constant 7 : i32
    %624 = arith.subi %c7_i32_185, %c7_i32_182 : i32
    %625 = arith.index_cast %624 : i32 to index
    %c0_186 = arith.constant 0 : index
    %c0_187 = arith.constant 0 : index
    %626 = vector.load %arg1[%625, %c0_186, %c0_187] : memref<8x4x16xf32, #tpu.memory_space<vmem>>, vector<1x4x16xf32>
    %627 = vector.shape_cast %626 : vector<1x4x16xf32> to vector<4x16xf32>
    %628 = tpu.concatenate %623, %568, %627, %594 in 1 : vector<4x16xf32>, vector<4x16xf32>, vector<4x16xf32>, vector<4x16xf32> -> vector<4x64xf32>
    %cst_188 = arith.constant dense<0.000000e+00> : vector<4x128xf32>
    %629 = tpu.matmul %628, %0, %cst_188 {dimension_numbers = #tpu.dot_dimension_numbers<[1], [0], [0], [1], [0, 0, 1, 1], [], []>} : vector<4x64xf32>, vector<64x128xf32>, vector<4x128xf32> -> vector<4x128xf32>
    %630 = arith.addf %629, %3 : vector<4x128xf32>
    %631 = vector.extract_strided_slice %630 {offsets = [0, 0], sizes = [4, 64], strides = [1, 1]} : vector<4x128xf32> to vector<4x64xf32>
    %632 = vector.extract_strided_slice %631 {offsets = [0, 0], sizes = [4, 16], strides = [1, 1]} : vector<4x64xf32> to vector<4x16xf32>
    %633 = arith.negf %632 : vector<4x16xf32>
    %634 = math.exp %633 : vector<4x16xf32>
    %cst_189 = arith.constant 1.000000e+00 : f32
    %635 = vector.broadcast %cst_189 : f32 to vector<4x16xf32>
    %636 = arith.addf %635, %634 : vector<4x16xf32>
    %637 = arith.divf %635, %636 : vector<4x16xf32>
    %638 = vector.extract_strided_slice %631 {offsets = [0, 16], sizes = [4, 16], strides = [1, 1]} : vector<4x64xf32> to vector<4x16xf32>
    %639 = arith.negf %638 : vector<4x16xf32>
    %640 = math.exp %639 : vector<4x16xf32>
    %cst_190 = arith.constant 1.000000e+00 : f32
    %641 = vector.broadcast %cst_190 : f32 to vector<4x16xf32>
    %642 = arith.addf %641, %640 : vector<4x16xf32>
    %643 = arith.divf %641, %642 : vector<4x16xf32>
    %644 = vector.extract_strided_slice %631 {offsets = [0, 32], sizes = [4, 16], strides = [1, 1]} : vector<4x64xf32> to vector<4x16xf32>
    %645 = math.tanh %644 : vector<4x16xf32>
    %646 = vector.extract_strided_slice %631 {offsets = [0, 48], sizes = [4, 16], strides = [1, 1]} : vector<4x64xf32> to vector<4x16xf32>
    %647 = arith.negf %646 : vector<4x16xf32>
    %648 = math.exp %647 : vector<4x16xf32>
    %cst_191 = arith.constant 1.000000e+00 : f32
    %649 = vector.broadcast %cst_191 : f32 to vector<4x16xf32>
    %650 = arith.addf %649, %648 : vector<4x16xf32>
    %651 = arith.divf %649, %650 : vector<4x16xf32>
    %652 = arith.mulf %643, %566 : vector<4x16xf32>
    %653 = arith.mulf %637, %645 : vector<4x16xf32>
    %654 = arith.addf %652, %653 : vector<4x16xf32>
    %655 = math.tanh %654 : vector<4x16xf32>
    %656 = arith.mulf %651, %655 : vector<4x16xf32>
    %657 = vector.extract_strided_slice %630 {offsets = [0, 64], sizes = [4, 64], strides = [1, 1]} : vector<4x128xf32> to vector<4x64xf32>
    %658 = vector.extract_strided_slice %657 {offsets = [0, 0], sizes = [4, 16], strides = [1, 1]} : vector<4x64xf32> to vector<4x16xf32>
    %659 = arith.negf %658 : vector<4x16xf32>
    %660 = math.exp %659 : vector<4x16xf32>
    %cst_192 = arith.constant 1.000000e+00 : f32
    %661 = vector.broadcast %cst_192 : f32 to vector<4x16xf32>
    %662 = arith.addf %661, %660 : vector<4x16xf32>
    %663 = arith.divf %661, %662 : vector<4x16xf32>
    %664 = vector.extract_strided_slice %657 {offsets = [0, 16], sizes = [4, 16], strides = [1, 1]} : vector<4x64xf32> to vector<4x16xf32>
    %665 = arith.negf %664 : vector<4x16xf32>
    %666 = math.exp %665 : vector<4x16xf32>
    %cst_193 = arith.constant 1.000000e+00 : f32
    %667 = vector.broadcast %cst_193 : f32 to vector<4x16xf32>
    %668 = arith.addf %667, %666 : vector<4x16xf32>
    %669 = arith.divf %667, %668 : vector<4x16xf32>
    %670 = vector.extract_strided_slice %657 {offsets = [0, 32], sizes = [4, 16], strides = [1, 1]} : vector<4x64xf32> to vector<4x16xf32>
    %671 = math.tanh %670 : vector<4x16xf32>
    %672 = vector.extract_strided_slice %657 {offsets = [0, 48], sizes = [4, 16], strides = [1, 1]} : vector<4x64xf32> to vector<4x16xf32>
    %673 = arith.negf %672 : vector<4x16xf32>
    %674 = math.exp %673 : vector<4x16xf32>
    %cst_194 = arith.constant 1.000000e+00 : f32
    %675 = vector.broadcast %cst_194 : f32 to vector<4x16xf32>
    %676 = arith.addf %675, %674 : vector<4x16xf32>
    %677 = arith.divf %675, %676 : vector<4x16xf32>
    %678 = arith.mulf %669, %592 : vector<4x16xf32>
    %679 = arith.mulf %663, %671 : vector<4x16xf32>
    %680 = arith.addf %678, %679 : vector<4x16xf32>
    %681 = math.tanh %680 : vector<4x16xf32>
    %682 = arith.mulf %677, %681 : vector<4x16xf32>
    %683 = vector.extract_strided_slice %656 {offsets = [0, 0], sizes = [2, 16], strides = [1, 1]} : vector<4x16xf32> to vector<2x16xf32>
    %c2_i32_195 = arith.constant 2 : i32
    %684 = arith.muli %c7_i32_182, %c2_i32_195 : i32
    %c0_196 = arith.constant 0 : index
    %685 = arith.index_cast %684 : i32 to index
    %c0_197 = arith.constant 0 : index
    %686 = vector.load %arg8[%c0_196, %685, %c0_197] : memref<2x16x32xf32, #tpu.memory_space<vmem>>, vector<1x2x16xf32>
    %687 = vector.shape_cast %686 : vector<1x2x16xf32> to vector<2x16xf32>
    %688 = vector.shape_cast %683 : vector<2x16xf32> to vector<1x2x16xf32>
    tpu.vector_store %arg8[%c0_196, %685, %c0_197], %688 {strides = array<i32>} : memref<2x16x32xf32, #tpu.memory_space<vmem>>, vector<1x2x16xf32>,
    %689 = vector.extract_strided_slice %682 {offsets = [0, 0], sizes = [2, 16], strides = [1, 1]} : vector<4x16xf32> to vector<2x16xf32>
    %c7_i32_198 = arith.constant 7 : i32
    %690 = arith.subi %c7_i32_198, %c7_i32_182 : i32
    %c2_i32_199 = arith.constant 2 : i32
    %691 = arith.muli %690, %c2_i32_199 : i32
    %c0_200 = arith.constant 0 : index
    %692 = arith.index_cast %691 : i32 to index
    %c16_201 = arith.constant 16 : index
    %693 = vector.load %arg8[%c0_200, %692, %c16_201] : memref<2x16x32xf32, #tpu.memory_space<vmem>>, vector<1x2x16xf32>
    %694 = vector.shape_cast %693 : vector<1x2x16xf32> to vector<2x16xf32>
    %695 = vector.shape_cast %689 : vector<2x16xf32> to vector<1x2x16xf32>
    tpu.vector_store %arg8[%c0_200, %692, %c16_201], %695 {strides = array<i32>} : memref<2x16x32xf32, #tpu.memory_space<vmem>>, vector<1x2x16xf32>,
    %696 = vector.extract_strided_slice %656 {offsets = [2, 0], sizes = [2, 16], strides = [1, 1]} : vector<4x16xf32> to vector<2x16xf32>
    %c2_i32_202 = arith.constant 2 : i32
    %697 = arith.muli %c7_i32_182, %c2_i32_202 : i32
    %c1_203 = arith.constant 1 : index
    %698 = arith.index_cast %697 : i32 to index
    %c0_204 = arith.constant 0 : index
    %699 = vector.load %arg8[%c1_203, %698, %c0_204] : memref<2x16x32xf32, #tpu.memory_space<vmem>>, vector<1x2x16xf32>
    %700 = vector.shape_cast %699 : vector<1x2x16xf32> to vector<2x16xf32>
    %701 = vector.shape_cast %696 : vector<2x16xf32> to vector<1x2x16xf32>
    tpu.vector_store %arg8[%c1_203, %698, %c0_204], %701 {strides = array<i32>} : memref<2x16x32xf32, #tpu.memory_space<vmem>>, vector<1x2x16xf32>,
    %702 = vector.extract_strided_slice %682 {offsets = [2, 0], sizes = [2, 16], strides = [1, 1]} : vector<4x16xf32> to vector<2x16xf32>
    %c7_i32_205 = arith.constant 7 : i32
    %703 = arith.subi %c7_i32_205, %c7_i32_182 : i32
    %c2_i32_206 = arith.constant 2 : i32
    %704 = arith.muli %703, %c2_i32_206 : i32
    %c1_207 = arith.constant 1 : index
    %705 = arith.index_cast %704 : i32 to index
    %c16_208 = arith.constant 16 : index
    %706 = vector.load %arg8[%c1_207, %705, %c16_208] : memref<2x16x32xf32, #tpu.memory_space<vmem>>, vector<1x2x16xf32>
    %707 = vector.shape_cast %706 : vector<1x2x16xf32> to vector<2x16xf32>
    %708 = vector.shape_cast %702 : vector<2x16xf32> to vector<1x2x16xf32>
    tpu.vector_store %arg8[%c1_207, %705, %c16_208], %708 {strides = array<i32>} : memref<2x16x32xf32, #tpu.memory_space<vmem>>, vector<1x2x16xf32>,
    %c8_i32 = arith.constant 8 : i32
    %c0_209 = arith.constant 0 : index
    %c0_210 = arith.constant 0 : index
    %709 = vector.load %arg4[%c0_209, %c0_210] : memref<32x64xf32, #tpu.memory_space<vmem>>, vector<32x64xf32>
    %c0_211 = arith.constant 0 : index
    %c0_212 = arith.constant 0 : index
    %c0_213 = arith.constant 0 : index
    %710 = vector.load %arg8[%c0_211, %c0_212, %c0_213] : memref<2x16x32xf32, #tpu.memory_space<vmem>>, vector<1x16x32xf32>
    %711 = vector.shape_cast %710 : vector<1x16x32xf32> to vector<16x32xf32>
    %cst_214 = arith.constant dense<0.000000e+00> : vector<16x64xf32>
    %712 = tpu.matmul %711, %709, %cst_214 {dimension_numbers = #tpu.dot_dimension_numbers<[1], [0], [0], [1], [0, 0, 1, 1], [], []>} : vector<16x32xf32>, vector<32x64xf32>, vector<16x64xf32> -> vector<16x64xf32>
    %c1_215 = arith.constant 1 : index
    %c0_216 = arith.constant 0 : index
    %c0_217 = arith.constant 0 : index
    %713 = vector.load %arg8[%c1_215, %c0_216, %c0_217] : memref<2x16x32xf32, #tpu.memory_space<vmem>>, vector<1x16x32xf32>
    %714 = vector.shape_cast %713 : vector<1x16x32xf32> to vector<16x32xf32>
    %cst_218 = arith.constant dense<0.000000e+00> : vector<16x64xf32>
    %715 = tpu.matmul %714, %709, %cst_218 {dimension_numbers = #tpu.dot_dimension_numbers<[1], [0], [0], [1], [0, 0, 1, 1], [], []>} : vector<16x32xf32>, vector<32x64xf32>, vector<16x64xf32> -> vector<16x64xf32>
    %716 = vector.extract_strided_slice %712 {offsets = [0, 0], sizes = [16, 32], strides = [1, 1]} : vector<16x64xf32> to vector<16x32xf32>
    %717 = vector.extract_strided_slice %715 {offsets = [0, 0], sizes = [16, 32], strides = [1, 1]} : vector<16x64xf32> to vector<16x32xf32>
    %718 = vector.shape_cast %716 : vector<16x32xf32> to vector<1x16x32xf32>
    %719 = vector.shape_cast %717 : vector<16x32xf32> to vector<1x16x32xf32>
    %720 = tpu.concatenate %718, %719 in 0 : vector<1x16x32xf32>, vector<1x16x32xf32> -> vector<2x16x32xf32>
    %721 = vector.extract_strided_slice %712 {offsets = [0, 32], sizes = [16, 32], strides = [1, 1]} : vector<16x64xf32> to vector<16x32xf32>
    %722 = vector.extract_strided_slice %715 {offsets = [0, 32], sizes = [16, 32], strides = [1, 1]} : vector<16x64xf32> to vector<16x32xf32>
    %723 = vector.shape_cast %721 : vector<16x32xf32> to vector<1x16x32xf32>
    %724 = vector.shape_cast %722 : vector<16x32xf32> to vector<1x16x32xf32>
    %725 = tpu.concatenate %723, %724 in 0 : vector<1x16x32xf32>, vector<1x16x32xf32> -> vector<2x16x32xf32>
    %726 = vector.shape_cast %720 : vector<2x16x32xf32> to vector<1x2x16x32xf32>
    %727 = vector.shape_cast %725 : vector<2x16x32xf32> to vector<1x2x16x32xf32>
    %728 = tpu.concatenate %726, %727 in 0 : vector<1x2x16x32xf32>, vector<1x2x16x32xf32> -> vector<2x2x16x32xf32>
    %cst_219 = arith.constant 0.000000e+00 : f32
    %729 = vector.broadcast %cst_219 : f32 to vector<2x2x16x1xf32>
    %cst_220 = arith.constant dense<0xFF800000> : vector<2x16x1xf32>
    %730 = vector.multi_reduction <maximumf>, %729, %cst_220 [0] : vector<2x2x16x1xf32> to vector<2x16x1xf32>
    %731 = vector.shape_cast %730 : vector<2x16x1xf32> to vector<1x2x16x1xf32>
    %732 = vector.broadcast %731 : vector<1x2x16x1xf32> to vector<2x2x16x1xf32>
    %733 = arith.subf %729, %732 : vector<2x2x16x1xf32>
    %734 = math.exp %733 : vector<2x2x16x1xf32>
    %cst_221 = arith.constant dense<0.000000e+00> : vector<2x16x1xf32>
    %735 = vector.multi_reduction <add>, %734, %cst_221 [0] : vector<2x2x16x1xf32> to vector<2x16x1xf32>
    %736 = vector.shape_cast %735 : vector<2x16x1xf32> to vector<1x2x16x1xf32>
    %737 = tpu.reciprocal %736 {approx = true} : vector<1x2x16x1xf32> -> vector<1x2x16x1xf32>
    %738 = vector.broadcast %737 : vector<1x2x16x1xf32> to vector<2x2x16x1xf32>
    %739 = arith.mulf %734, %738 : vector<2x2x16x1xf32>
    %740 = vector.broadcast %739 : vector<2x2x16x1xf32> to vector<2x2x16x32xf32>
    %741 = arith.mulf %728, %740 : vector<2x2x16x32xf32>
    %cst_222 = arith.constant dense<0.000000e+00> : vector<2x16x32xf32>
    %742 = vector.multi_reduction <add>, %741, %cst_222 [1] : vector<2x2x16x32xf32> to vector<2x16x32xf32>
    %743 = arith.mulf %742, %742 : vector<2x16x32xf32>
    %cst_223 = arith.constant dense<0.000000e+00> : vector<2x16xf32>
    %744 = vector.multi_reduction <add>, %743, %cst_223 [2] : vector<2x16x32xf32> to vector<2x16xf32>
    %745 = vector.shape_cast %744 : vector<2x16xf32> to vector<2x16x1xf32>
    %cst_224 = arith.constant 1.000000e+00 : f32
    %746 = vector.broadcast %cst_224 : f32 to vector<2x16x1xf32>
    %747 = arith.addf %746, %745 : vector<2x16x1xf32>
    %748 = tpu.reciprocal %747 {approx = true} : vector<2x16x1xf32> -> vector<2x16x1xf32>
    %749 = arith.mulf %745, %748 : vector<2x16x1xf32>
    %cst_225 = arith.constant 9.99999993E-9 : f32
    %750 = vector.broadcast %cst_225 : f32 to vector<2x16x1xf32>
    %751 = arith.addf %745, %750 : vector<2x16x1xf32>
    %752 = math.rsqrt %751 : vector<2x16x1xf32>
    %753 = arith.mulf %749, %752 : vector<2x16x1xf32>
    %754 = vector.broadcast %753 : vector<2x16x1xf32> to vector<2x16x32xf32>
    %755 = arith.mulf %742, %754 : vector<2x16x32xf32>
    %756 = vector.shape_cast %755 : vector<2x16x32xf32> to vector<2x1x16x32xf32>
    %757 = vector.broadcast %756 : vector<2x1x16x32xf32> to vector<2x2x16x32xf32>
    %758 = arith.mulf %757, %728 : vector<2x2x16x32xf32>
    %cst_226 = arith.constant dense<0.000000e+00> : vector<2x2x16xf32>
    %759 = vector.multi_reduction <add>, %758, %cst_226 [3] : vector<2x2x16x32xf32> to vector<2x2x16xf32>
    %760 = vector.shape_cast %759 : vector<2x2x16xf32> to vector<2x2x16x1xf32>
    %761 = arith.addf %729, %760 : vector<2x2x16x1xf32>
    %cst_227 = arith.constant dense<0xFF800000> : vector<2x16x1xf32>
    %762 = vector.multi_reduction <maximumf>, %761, %cst_227 [0] : vector<2x2x16x1xf32> to vector<2x16x1xf32>
    %763 = vector.shape_cast %762 : vector<2x16x1xf32> to vector<1x2x16x1xf32>
    %764 = vector.broadcast %763 : vector<1x2x16x1xf32> to vector<2x2x16x1xf32>
    %765 = arith.subf %761, %764 : vector<2x2x16x1xf32>
    %766 = math.exp %765 : vector<2x2x16x1xf32>
    %cst_228 = arith.constant dense<0.000000e+00> : vector<2x16x1xf32>
    %767 = vector.multi_reduction <add>, %766, %cst_228 [0] : vector<2x2x16x1xf32> to vector<2x16x1xf32>
    %768 = vector.shape_cast %767 : vector<2x16x1xf32> to vector<1x2x16x1xf32>
    %769 = tpu.reciprocal %768 {approx = true} : vector<1x2x16x1xf32> -> vector<1x2x16x1xf32>
    %770 = vector.broadcast %769 : vector<1x2x16x1xf32> to vector<2x2x16x1xf32>
    %771 = arith.mulf %766, %770 : vector<2x2x16x1xf32>
    %772 = vector.broadcast %771 : vector<2x2x16x1xf32> to vector<2x2x16x32xf32>
    %773 = arith.mulf %728, %772 : vector<2x2x16x32xf32>
    %cst_229 = arith.constant dense<0.000000e+00> : vector<2x16x32xf32>
    %774 = vector.multi_reduction <add>, %773, %cst_229 [1] : vector<2x2x16x32xf32> to vector<2x16x32xf32>
    %775 = arith.mulf %774, %774 : vector<2x16x32xf32>
    %cst_230 = arith.constant dense<0.000000e+00> : vector<2x16xf32>
    %776 = vector.multi_reduction <add>, %775, %cst_230 [2] : vector<2x16x32xf32> to vector<2x16xf32>
    %777 = vector.shape_cast %776 : vector<2x16xf32> to vector<2x16x1xf32>
    %cst_231 = arith.constant 1.000000e+00 : f32
    %778 = vector.broadcast %cst_231 : f32 to vector<2x16x1xf32>
    %779 = arith.addf %778, %777 : vector<2x16x1xf32>
    %780 = tpu.reciprocal %779 {approx = true} : vector<2x16x1xf32> -> vector<2x16x1xf32>
    %781 = arith.mulf %777, %780 : vector<2x16x1xf32>
    %cst_232 = arith.constant 9.99999993E-9 : f32
    %782 = vector.broadcast %cst_232 : f32 to vector<2x16x1xf32>
    %783 = arith.addf %777, %782 : vector<2x16x1xf32>
    %784 = math.rsqrt %783 : vector<2x16x1xf32>
    %785 = arith.mulf %781, %784 : vector<2x16x1xf32>
    %786 = vector.broadcast %785 : vector<2x16x1xf32> to vector<2x16x32xf32>
    %787 = arith.mulf %774, %786 : vector<2x16x32xf32>
    %788 = vector.shape_cast %787 : vector<2x16x32xf32> to vector<2x1x16x32xf32>
    %789 = vector.broadcast %788 : vector<2x1x16x32xf32> to vector<2x2x16x32xf32>
    %790 = arith.mulf %789, %728 : vector<2x2x16x32xf32>
    %cst_233 = arith.constant dense<0.000000e+00> : vector<2x2x16xf32>
    %791 = vector.multi_reduction <add>, %790, %cst_233 [3] : vector<2x2x16x32xf32> to vector<2x2x16xf32>
    %792 = vector.shape_cast %791 : vector<2x2x16xf32> to vector<2x2x16x1xf32>
    %793 = arith.addf %761, %792 : vector<2x2x16x1xf32>
    %c0_234 = arith.constant 0 : index
    %c0_235 = arith.constant 0 : index
    %c0_236 = arith.constant 0 : index
    %794 = vector.load %arg5[%c0_234, %c0_235, %c0_236] : memref<2x16x32xf32, #tpu.memory_space<vmem>>, vector<2x16x32xf32>
    tpu.vector_store %arg5[%c0_234, %c0_235, %c0_236], %787 {strides = array<i32>} : memref<2x16x32xf32, #tpu.memory_space<vmem>>, vector<2x16x32xf32>,
    %795 = vector.extract_strided_slice %771 {offsets = [0, 0, 0, 0], sizes = [1, 1, 16, 1], strides = [1, 1, 1, 1]} : vector<2x2x16x1xf32> to vector<1x1x16x1xf32>
    %796 = vector.shape_cast %795 : vector<1x1x16x1xf32> to vector<16x1xf32>
    %c0_237 = arith.constant 0 : index
    %c0_238 = arith.constant 0 : index
    %797 = vector.load %arg6[%c0_237, %c0_238] : memref<16x4xf32, #tpu.memory_space<vmem>>, vector<16x1xf32>
    tpu.vector_store %arg6[%c0_237, %c0_238], %796 {strides = array<i32>} : memref<16x4xf32, #tpu.memory_space<vmem>>, vector<16x1xf32>,
    %798 = vector.extract_strided_slice %793 {offsets = [0, 0, 0, 0], sizes = [1, 1, 16, 1], strides = [1, 1, 1, 1]} : vector<2x2x16x1xf32> to vector<1x1x16x1xf32>
    %799 = vector.shape_cast %798 : vector<1x1x16x1xf32> to vector<16x1xf32>
    %c0_239 = arith.constant 0 : index
    %c0_240 = arith.constant 0 : index
    %800 = vector.load %arg7[%c0_239, %c0_240] : memref<16x4xf32, #tpu.memory_space<vmem>>, vector<16x1xf32>
    tpu.vector_store %arg7[%c0_239, %c0_240], %799 {strides = array<i32>} : memref<16x4xf32, #tpu.memory_space<vmem>>, vector<16x1xf32>,
    %801 = vector.extract_strided_slice %771 {offsets = [1, 0, 0, 0], sizes = [1, 1, 16, 1], strides = [1, 1, 1, 1]} : vector<2x2x16x1xf32> to vector<1x1x16x1xf32>
    %802 = vector.shape_cast %801 : vector<1x1x16x1xf32> to vector<16x1xf32>
    %c0_241 = arith.constant 0 : index
    %c1_242 = arith.constant 1 : index
    %803 = vector.load %arg6[%c0_241, %c1_242] : memref<16x4xf32, #tpu.memory_space<vmem>>, vector<16x1xf32>
    tpu.vector_store %arg6[%c0_241, %c1_242], %802 {strides = array<i32>} : memref<16x4xf32, #tpu.memory_space<vmem>>, vector<16x1xf32>,
    %804 = vector.extract_strided_slice %793 {offsets = [1, 0, 0, 0], sizes = [1, 1, 16, 1], strides = [1, 1, 1, 1]} : vector<2x2x16x1xf32> to vector<1x1x16x1xf32>
    %805 = vector.shape_cast %804 : vector<1x1x16x1xf32> to vector<16x1xf32>
    %c0_243 = arith.constant 0 : index
    %c1_244 = arith.constant 1 : index
    %806 = vector.load %arg7[%c0_243, %c1_244] : memref<16x4xf32, #tpu.memory_space<vmem>>, vector<16x1xf32>
    tpu.vector_store %arg7[%c0_243, %c1_244], %805 {strides = array<i32>} : memref<16x4xf32, #tpu.memory_space<vmem>>, vector<16x1xf32>,
    %807 = vector.extract_strided_slice %771 {offsets = [0, 1, 0, 0], sizes = [1, 1, 16, 1], strides = [1, 1, 1, 1]} : vector<2x2x16x1xf32> to vector<1x1x16x1xf32>
    %808 = vector.shape_cast %807 : vector<1x1x16x1xf32> to vector<16x1xf32>
    %c0_245 = arith.constant 0 : index
    %c2 = arith.constant 2 : index
    %809 = vector.load %arg6[%c0_245, %c2] : memref<16x4xf32, #tpu.memory_space<vmem>>, vector<16x1xf32>
    tpu.vector_store %arg6[%c0_245, %c2], %808 {strides = array<i32>} : memref<16x4xf32, #tpu.memory_space<vmem>>, vector<16x1xf32>,
    %810 = vector.extract_strided_slice %793 {offsets = [0, 1, 0, 0], sizes = [1, 1, 16, 1], strides = [1, 1, 1, 1]} : vector<2x2x16x1xf32> to vector<1x1x16x1xf32>
    %811 = vector.shape_cast %810 : vector<1x1x16x1xf32> to vector<16x1xf32>
    %c0_246 = arith.constant 0 : index
    %c2_247 = arith.constant 2 : index
    %812 = vector.load %arg7[%c0_246, %c2_247] : memref<16x4xf32, #tpu.memory_space<vmem>>, vector<16x1xf32>
    tpu.vector_store %arg7[%c0_246, %c2_247], %811 {strides = array<i32>} : memref<16x4xf32, #tpu.memory_space<vmem>>, vector<16x1xf32>,
    %813 = vector.extract_strided_slice %771 {offsets = [1, 1, 0, 0], sizes = [1, 1, 16, 1], strides = [1, 1, 1, 1]} : vector<2x2x16x1xf32> to vector<1x1x16x1xf32>
    %814 = vector.shape_cast %813 : vector<1x1x16x1xf32> to vector<16x1xf32>
    %c0_248 = arith.constant 0 : index
    %c3 = arith.constant 3 : index
    %815 = vector.load %arg6[%c0_248, %c3] : memref<16x4xf32, #tpu.memory_space<vmem>>, vector<16x1xf32>
    tpu.vector_store %arg6[%c0_248, %c3], %814 {strides = array<i32>} : memref<16x4xf32, #tpu.memory_space<vmem>>, vector<16x1xf32>,
    %816 = vector.extract_strided_slice %793 {offsets = [1, 1, 0, 0], sizes = [1, 1, 16, 1], strides = [1, 1, 1, 1]} : vector<2x2x16x1xf32> to vector<1x1x16x1xf32>
    %817 = vector.shape_cast %816 : vector<1x1x16x1xf32> to vector<16x1xf32>
    %c0_249 = arith.constant 0 : index
    %c3_250 = arith.constant 3 : index
    %818 = vector.load %arg7[%c0_249, %c3_250] : memref<16x4xf32, #tpu.memory_space<vmem>>, vector<16x1xf32>
    tpu.vector_store %arg7[%c0_249, %c3_250], %817 {strides = array<i32>} : memref<16x4xf32, #tpu.memory_space<vmem>>, vector<16x1xf32>,
    return
  }
  func.func @transform_0(%arg0: i32) -> (i32, i32, i32) {
    %c0_i32 = arith.constant 0 : i32
    %c0_i32_0 = arith.constant 0 : i32
    %c0_i32_1 = arith.constant 0 : i32
    %c0_i32_2 = arith.constant 0 : i32
    return %c0_i32, %c0_i32_0, %c0_i32_1 : i32, i32, i32
  }
  func.func @transform_1(%arg0: i32) -> (i32, i32) {
    %c0_i32 = arith.constant 0 : i32
    %c0_i32_0 = arith.constant 0 : i32
    %c0_i32_1 = arith.constant 0 : i32
    return %c0_i32, %c0_i32_0 : i32, i32
  }
  func.func @transform_2(%arg0: i32) -> (i32, i32) {
    %c0_i32 = arith.constant 0 : i32
    %c0_i32_0 = arith.constant 0 : i32
    %c0_i32_1 = arith.constant 0 : i32
    return %c0_i32, %c0_i32_0 : i32, i32
  }
  func.func @transform_3(%arg0: i32) -> (i32, i32) {
    %c0_i32 = arith.constant 0 : i32
    %c0_i32_0 = arith.constant 0 : i32
    %c0_i32_1 = arith.constant 0 : i32
    return %c0_i32, %c0_i32_0 : i32, i32
  }
  func.func @transform_4(%arg0: i32) -> (i32, i32, i32) {
    %c0_i32 = arith.constant 0 : i32
    %c0_i32_0 = arith.constant 0 : i32
    %c0_i32_1 = arith.constant 0 : i32
    %c0_i32_2 = arith.constant 0 : i32
    return %c0_i32, %c0_i32_0, %c0_i32_1 : i32, i32, i32
  }
  func.func @transform_5(%arg0: i32) -> (i32, i32) {
    %c0_i32 = arith.constant 0 : i32
    %c0_i32_0 = arith.constant 0 : i32
    %c0_i32_1 = arith.constant 0 : i32
    return %c0_i32, %c0_i32_0 : i32, i32
  }
  func.func @transform_6(%arg0: i32) -> (i32, i32) {
    %c0_i32 = arith.constant 0 : i32
    %c0_i32_0 = arith.constant 0 : i32
    %c0_i32_1 = arith.constant 0 : i32
    return %c0_i32, %c0_i32_0 : i32, i32
  }
}

</mosaic_0001>

<bundles_post_ra>
// kernel: tpu_custom_call.1
= control target key start
LH: loop header
LB: loop body
LE: loop exit
PB: predicated region body
PF: predicated region fallthrough
CT: control target
= control target key end

     0   :  { %12 = vsyncpa [#allocation4], 0  ;;  %s2679_s0 = inlined_call_operand.hbm [shape: f32[8,4,16], index: 0, kind: input, shape index: {}]   ;;  %s2680_s1 = inlined_call_operand.hbm [shape: f32[64,128], index: 1, kind: input, shape index: {}]   ;;  %s2681_s2 = inlined_call_operand.vmem [shape: f32[1,128], index: 2, kind: input, shape index: {}]   ;;  %s2682_s3 = inlined_call_operand.hbm [shape: f32[32,64], index: 3, kind: input, shape index: {}]   ;;  %s2683_s4 = inlined_call_operand.hbm [shape: f32[2,16,32], index: 4, kind: output, shape index: {0}]   ;;  %s2684_s5 = inlined_call_operand.vmem [shape: f32[16,4], index: 5, kind: output, shape index: {1}]   ;;  %s2685_s6 = inlined_call_operand.vmem [shape: f32[16,4], index: 6, kind: output, shape index: {2}]  }
   0x1   :  { %13 = vsyncpa [#allocation7], 0 }
   0x2   :  { %14 = vsyncpa [#allocation5], 0  ;;  %s2059_s21 = smov [#allocation6]  }
   0x3   :  { %s32_s22 = sshll.u32 %s2059_s21, 4  ;;  %s33_s22 = int_to_ptr.vmem [resolvable:$true] %s32_s22 }
   0x4   :  { %s1981_s23 = scalar_lea.vmem %s33_s22, 1024  ;;  %p1986_p1 = scmp.lt.s32.totalorder %s33_s22, %s33_s22 }
   0x5   :  { %p1982_p0 = scmp.ne.s32.totalorder %s33_s22, %s1981_s23  ;;  %p1987_p2 = scmp.lt.s32.totalorder %s1981_s23, %s1981_s23 }
   0x7   :  { %p1988_p3 = por %p1987_p2, %p1986_p1 }
   0x9   :  { %p1989_p4 = pnand %p1988_p3, %p1982_p0 }
   0xb   :  { %1992 = shalt.err (!%p1989_p4)
}
   0xc   :  { %s2060_s24 = smov 128   ;;  %s2061_s25 = smov 8  }
   0xd   :  { %38 = dma.hbm_to_vmem [thread:$0]  %s2680_s1, 1024, %s33_s22, [#allocation7], %s2060_s24, %s2060_s24, %s2061_s25  }
   0xe   :  { %s2062_s28 = smov [#allocation3]  }
   0xf   :  { %s20_s29 = sshll.u32 %s2062_s28, 4  ;;  %s21_s29 = int_to_ptr.vmem [resolvable:$true] %s20_s29 }
  0x10   :  { %s2001_s30 = scalar_lea.vmem %s21_s29, 512  ;;  %p2006_p6 = scmp.lt.s32.totalorder %s21_s29, %s21_s29 }
  0x11   :  { %p2002_p5 = scmp.ne.s32.totalorder %s21_s29, %s2001_s30  ;;  %p2007_p7 = scmp.lt.s32.totalorder %s2001_s30, %s2001_s30 }
  0x13   :  { %p2008_p8 = por %p2007_p7, %p2006_p6 }
  0x15   :  { %p2009_p9 = pnand %p2008_p8, %p2002_p5 }
  0x17   :  { %2012 = shalt.err (!%p2009_p9)
}
  0x18   :  { %s2063_s7 = smov 64   ;;  %s2064_s8 = smov 4  }
  0x19   :  { %26 = dma.hbm_to_vmem [thread:$0]  %s2679_s0, 512, %s21_s29, [#allocation4], %s2063_s7, %s2063_s7, %s2064_s8  }
  0x1a   :  { %s2065_s11 = smov [#allocation8]  }
  0x1b   :  { %s46_s1 = sshll.u32 %s2065_s11, 4  ;;  %s47_s1 = int_to_ptr.vmem [resolvable:$true] %s46_s1 }
  0x1c   :  { %s2021_s12 = scalar_lea.vmem %s47_s1, 512  ;;  %p2026_p11 = scmp.lt.s32.totalorder %s47_s1, %s47_s1 }
  0x1d   :  { %p2022_p10 = scmp.ne.s32.totalorder %s47_s1, %s2021_s12  ;;  %p2027_p12 = scmp.lt.s32.totalorder %s2021_s12, %s2021_s12 }
  0x1f   :  { %p2028_p13 = por %p2027_p12, %p2026_p11 }
  0x21   :  { %p2029_p0 = pnand %p2028_p13, %p2022_p10 }
  0x23   :  { %2032 = shalt.err (!%p2029_p0)
}
  0x24   :  { %52 = dma.hbm_to_vmem [thread:$0]  %s2682_s3, 512, %s47_s1, [#allocation7], %s2060_s24, %s2060_s24, %s2061_s25  }
  0x25   :  { %2053 = dma.done.wait [#allocation4], 512  }
  0x26   :  { %2054 = vsyncadd [#allocation4], 4294966784 }
  0x27   :  { %2055 = dma.done.wait [#allocation7], 1536  }
  0x28   :  { %2056 = vsyncadd [#allocation7], 4294965760  ;;  %v2066_v0 = vmov 0.0   ;;  %vm2067_vm0 = vmmov 0   ;;  %v79_v1 = vld [vmem:[#allocation3 + $0x1c] sm:$0xf] }
  0x29   :  { %1665 = vmatprep.subr.mxu0 %v2066_v0  ;;  %1684 = vmatprep.subr.mxu1 %v2066_v0  ;;  %v2131_v2 = vld [vmem:[#allocation6 + $0x38] sm:$0xff]  ;;  %v2133_v3 = vld [vmem:[#allocation6 + $0x30] sm:$0xff]  ;;  %s2068_s0 = smov 32   ;;  %v2138_v4 = vld [vmem:[#allocation6 + $0x28] sm:$0xff]  ;;  %vm84_vm1 = vcmask 130048   ;;  %vm86_vm2 = vcmask 261120  }
  0x2a   :  { %1681 = vmatprep.mubr.msk.f32.mxu0 %vm2067_vm0, %v2066_v0  ;;  %1700 = vmatprep.mubr.msk.f32.mxu1 %vm2067_vm0, %v2066_v0  ;;  %v2144_v5 = vld [vmem:[#allocation6 + $0x20] sm:$0xff]  ;;  %v2150_v6 = vld [vmem:[#allocation6 + $0x18] sm:$0xff]  ;;  %v2156_v7 = vld [vmem:[#allocation6 + $0x10] sm:$0xff]  ;;  %vm88_vm3 = vcmask 392192   ;;  %vm90_vm4 = vcmask 523264   ;;  %s2069_s16 = smov 96  }
  0x2b   :  { %81 = vrot.lane.b32.xlu0 %v79_v1, %s2068_s0  ;;  %1666 = vmatpush3.msra.mxu0 %v2131_v2  ;;  %v2162_v8 = vld [vmem:[#allocation6 + $0x8] sm:$0xff]  ;;  %v2168_v9 = vld [vmem:[#allocation6] sm:$0xff]  ;;  %s2070_s17 = smov 16   ;;  %v207_v30 = vld [vmem:[#allocation3 + $0x18] sm:$0xf]  ;;  %vm192_vm5 = vcmask 123904  }
  0x2c   :  { %1667 = vmatprep.subr.mxu0 %v2066_v0  ;;  %1685 = vmatpush3.msra.mxu1 %v2131_v2  ;;  %v77_v10 = vld [vmem:[#allocation3] sm:$0xf]  ;;  %v205_v33 = vld [vmem:[#allocation3 + $0x4] sm:$0xf]  ;;  %v332_v54 = vld [vmem:[#allocation3 + $0x14] sm:$0xf] }
  0x2d   :  { %1668 = vmatpush3.msra.mxu0 %v2133_v3  ;;  %1686 = vmatprep.subr.mxu1 %v2066_v0  ;;  %v85_v11 = vsel %vm84_vm1, %v77_v10, 0.0  ;;  %v2205_v15 = vld [vmem:[%s2681_s2] ss:$0 sm:$0xff]  ;;  %v330_v57 = vld [vmem:[#allocation3 + $0x8] sm:$0xf]  ;;  %s2071_s2 = smov 80  }
  0x2e   :  { %1669 = vmatprep.subr.mxu0 %v2066_v0  ;;  %1687 = vmatpush3.msra.mxu1 %v2133_v3  ;;  %vm200_vm6 = vcmask 125954   ;;  %vm197_vm7 = vcmask 255104   ;;  %vm202_vm8 = vcmask 257154   ;;  %vm1514_vm9 = vcmask 7168  }
  0x2f   :  { %1670 = vmatpush3.msra.mxu0 %v2138_v4  ;;  %1688 = vmatprep.subr.mxu1 %v2066_v0  ;;  %vm1519_vm10 = vcmask 15368   ;;  %vm1524_vm11 = vcmask 23568   ;;  %vm1529_vm12 = vcmask 31768  }
  0x30   :  { %1671 = vmatprep.subr.mxu0 %v2066_v0  ;;  %1689 = vmatpush3.msra.mxu1 %v2138_v4 }
  0x31   :  { %1672 = vmatpush3.msra.mxu0 %v2144_v5  ;;  %1690 = vmatprep.subr.mxu1 %v2066_v0 }
  0x32   :  { %1673 = vmatprep.subr.mxu0 %v2066_v0  ;;  %1691 = vmatpush3.msra.mxu1 %v2144_v5 }
  0x33   :  { %1674 = vmatpush3.msra.mxu0 %v2150_v6  ;;  %1692 = vmatprep.subr.mxu1 %v2066_v0 }
  0x34   :  { %1675 = vmatprep.subr.mxu0 %v2066_v0  ;;  %1693 = vmatpush3.msra.mxu1 %v2150_v6 }
  0x35   :  { %1676 = vmatpush3.msra.mxu0 %v2156_v7  ;;  %1694 = vmatprep.subr.mxu1 %v2066_v0 }
  0x36   :  { %1677 = vmatprep.subr.mxu0 %v2066_v0  ;;  %1695 = vmatpush3.msra.mxu1 %v2156_v7 }
  0x37   :  { %1678 = vmatpush3.msra.mxu0 %v2162_v8  ;;  %1696 = vmatprep.subr.mxu1 %v2066_v0 }
  0x38   :  { %1679 = vmatprep.subr.mxu0 %v2066_v0  ;;  %1697 = vmatpush3.msra.mxu1 %v2162_v8 }
  0x39   :  { %1680 = vmatpush3.msra.mxu0 %v2168_v9  ;;  %1698 = vmatprep.subr.mxu1 %v2066_v0 }
  0x3a   :  { %1699 = vmatpush3.msra.mxu1 %v2168_v9  ;;  %1703 = vmatprep.subr.mxu0 %v2066_v0 }
  0x3b   :  { %1722 = vmatprep.subr.mxu1 %v2066_v0 }
  0x9d   :  { %v82_v12 = vpop.permute.xlu0 %81 }
  0x9e   :  { %v87_v13 = vsel %vm86_vm2, %v85_v11, %v82_v12 }
  0x9f   :  { %v89_v14 = vsel %vm88_vm3, %v87_v13, 0.0 }
  0xa0   :  { %1682 = vmatmul.mubr.msk.f32.vlgmr.msra.gmra.mxu0 %vm90_vm4, %v89_v14 }
  0xa1   :  { %1704 = vmatpush3.msra.mxu0 %v2131_v2  ;;  %1719 = vmatprep.mubr.msk.f32.mxu0 %vm2067_vm0, %v2066_v0 }
  0xa2   :  { %1705 = vmatprep.subr.mxu0 %v2066_v0 }
  0xa3   :  { %1706 = vmatpush3.msra.mxu0 %v2133_v3 }
  0xa4   :  { %1707 = vmatprep.subr.mxu0 %v2066_v0 }
  0xa5   :  { %1708 = vmatpush3.msra.mxu0 %v2138_v4 }
  0xa6   :  { %1709 = vmatprep.subr.mxu0 %v2066_v0 }
  0xa7   :  { %1710 = vmatpush3.msra.mxu0 %v2144_v5 }
  0xa8   :  { %1711 = vmatprep.subr.mxu0 %v2066_v0 }
  0xa9   :  { %1712 = vmatpush3.msra.mxu0 %v2150_v6 }
  0xaa   :  { %1713 = vmatprep.subr.mxu0 %v2066_v0 }
  0xab   :  { %1714 = vmatpush3.msra.mxu0 %v2156_v7 }
  0xac   :  { %1715 = vmatprep.subr.mxu0 %v2066_v0 }
  0xad   :  { %1716 = vmatpush3.msra.mxu0 %v2162_v8 }
  0xae   :  { %1717 = vmatprep.subr.mxu0 %v2066_v0 }
  0xaf   :  { %1718 = vmatpush3.msra.mxu0 %v2168_v9 }
  0xb0   :  { %1741 = vmatprep.subr.mxu0 %v2066_v0 }
 0x160   :  { %v160_v16 = vpop.f32.mrf.mxu0 }
 0x161   :  { %v161_v17 = vadd.f32 %v2205_v15, %v160_v16 }
 0x162   :  { %v1683_v18 = vpop.f32.mrf.mxu0 }
 0x163   :  { %1853 = vtanh.f32 %v161_v17  ;;  %v1562_v20 = vmul.f32 -1.442695, %v161_v17 }
 0x165   :  { %1855 = vpow2.f32 %v1562_v20 }
 0x170   :  { %v1854_v19 = vpop.eup %1853 }
 0x171   :  { %173 = vrot.lane.b32.xlu0 %v1854_v19, %s2069_s16 }
 0x172   :  { %v1856_v21 = vpop.eup %1855 }
 0x173   :  { %v167_v22 = vadd.f32 1.0, %v1856_v21 }
 0x175   :  { %1857 = vrcp.f32 %v167_v22 }
 0x182   :  { %v1858_v23 = vpop.eup %1857 }
 0x183   :  { %v171_v26 = vmul.f32 0.0, %v1858_v23 }
 0x1e3   :  { %v174_v24 = vpop.permute.xlu0 %173 }
 0x1e4   :  { %v176_v25 = vmul.f32 %v1858_v23, %v174_v24  ;;  %v457_v24 = vld [vmem:[#allocation3 + $0x10] sm:$0xf] }
 0x1e6   :  { %178 = vrot.lane.b32.xlu1 %v176_v25, %s2070_s17 }
 0x258   :  { %v179_v27 = vpop.permute.xlu1 %178 }
 0x259   :  { %v181_v28 = vadd.f32 %v179_v27, %v171_v26  ;;  %v455_v27 = vld [vmem:[#allocation3 + $0xc] sm:$0xf] }
 0x25b   :  { %1859 = vtanh.f32 %v181_v28 }
 0x268   :  { %v1860_v29 = vpop.eup %1859 }
 0x269   :  { %184 = vrot.lane.b32.xlu1 %v1860_v29, %s2068_s0 }
 0x26d   :  { %212 = vrot.lane.b32.xlu1 %v207_v30, %s2068_s0 }
 0x2db   :  { %v185_v31 = vpop.permute.xlu1 %184 }
 0x2dc   :  { %v2212_v32 = vmul.f32 %v1858_v23, %v185_v31 }
 0x2de   :  { %208 = vrot.lane.b32.xlu0 %v2212_v32, %s2069_s16 }
 0x2df   :  { %v213_v36 = vpop.permute.xlu1 %212 }
 0x2e2   :  { %215 = vrot.lane.b32.xlu0 %v2212_v32, %s2063_s7 }
 0x350   :  { %v209_v34 = vpop.permute.xlu0 %208 }
 0x351   :  { %v218_v35 = vsel %vm84_vm1, %v205_v33, %v209_v34 }
 0x352   :  { %v219_v37 = vsel %vm86_vm2, %v218_v35, %v213_v36 }
 0x354   :  { %v216_v38 = vpop.permute.xlu0 %215 }
 0x355   :  { %v220_v39 = vsel %vm88_vm3, %v219_v37, %v216_v38 }
 0x356   :  { %1701 = vmatmul.mubr.msk.f32.vlgmr.msra.gmra.mxu1 %vm90_vm4, %v220_v39 }
 0x357   :  { %1723 = vmatpush3.msra.mxu1 %v2131_v2  ;;  %1738 = vmatprep.mubr.msk.f32.mxu1 %vm2067_vm0, %v2066_v0 }
 0x358   :  { %1724 = vmatprep.subr.mxu1 %v2066_v0 }
 0x359   :  { %1725 = vmatpush3.msra.mxu1 %v2133_v3 }
 0x35a   :  { %1726 = vmatprep.subr.mxu1 %v2066_v0 }
 0x35b   :  { %1727 = vmatpush3.msra.mxu1 %v2138_v4 }
 0x35c   :  { %1728 = vmatprep.subr.mxu1 %v2066_v0 }
 0x35d   :  { %1729 = vmatpush3.msra.mxu1 %v2144_v5 }
 0x35e   :  { %1730 = vmatprep.subr.mxu1 %v2066_v0 }
 0x35f   :  { %1731 = vmatpush3.msra.mxu1 %v2150_v6 }
 0x360   :  { %1732 = vmatprep.subr.mxu1 %v2066_v0 }
 0x361   :  { %1733 = vmatpush3.msra.mxu1 %v2156_v7 }
 0x362   :  { %1734 = vmatprep.subr.mxu1 %v2066_v0 }
 0x363   :  { %1735 = vmatpush3.msra.mxu1 %v2162_v8 }
 0x364   :  { %1736 = vmatprep.subr.mxu1 %v2066_v0 }
 0x365   :  { %1737 = vmatpush3.msra.mxu1 %v2168_v9 }
 0x366   :  { %1760 = vmatprep.subr.mxu1 %v2066_v0 }
 0x416   :  { %v290_v40 = vpop.f32.mrf.mxu1 }
 0x417   :  { %v291_v41 = vadd.f32 %v2205_v15, %v290_v40 }
 0x418   :  { %v1702_v42 = vpop.f32.mrf.mxu1 }
 0x419   :  { %1861 = vtanh.f32 %v291_v41  ;;  %v1564_v44 = vmul.f32 -1.442695, %v291_v41 }
 0x41b   :  { %1863 = vpow2.f32 %v1564_v44 }
 0x426   :  { %v1862_v43 = vpop.eup %1861 }
 0x427   :  { %303 = vrot.lane.b32.xlu1 %v1862_v43, %s2069_s16 }
 0x428   :  { %v1864_v45 = vpop.eup %1863 }
 0x429   :  { %v297_v46 = vadd.f32 1.0, %v1864_v45 }
 0x42b   :  { %1865 = vrcp.f32 %v297_v46 }
 0x438   :  { %v1866_v47 = vpop.eup %1865 }
 0x439   :  { %v301_v50 = vmul.f32 %v1866_v47, %v181_v28 }
 0x499   :  { %v304_v48 = vpop.permute.xlu1 %303 }
 0x49a   :  { %v306_v49 = vmul.f32 %v1866_v47, %v304_v48 }
 0x49c   :  { %308 = vrot.lane.b32.xlu0 %v306_v49, %s2070_s17  ;;  %v580_v49 = vld [vmem:[#allocation3 + $0xc] sm:$0xf] }
 0x50e   :  { %v309_v51 = vpop.permute.xlu0 %308 }
 0x50f   :  { %v311_v52 = vadd.f32 %v309_v51, %v301_v50 }
 0x511   :  { %1867 = vtanh.f32 %v311_v52 }
 0x51e   :  { %v1868_v53 = vpop.eup %1867 }
 0x51f   :  { %314 = vrot.lane.b32.xlu1 %v1868_v53, %s2068_s0 }
 0x523   :  { %337 = vrot.lane.b32.xlu1 %v332_v54, %s2068_s0 }
 0x591   :  { %v315_v55 = vpop.permute.xlu1 %314 }
 0x592   :  { %v2245_v56 = vmul.f32 %v1866_v47, %v315_v55 }
 0x594   :  { %333 = vrot.lane.b32.xlu0 %v2245_v56, %s2069_s16 }
 0x595   :  { %v338_v60 = vpop.permute.xlu1 %337 }
 0x598   :  { %340 = vrot.lane.b32.xlu0 %v2245_v56, %s2063_s7 }
 0x606   :  { %v334_v58 = vpop.permute.xlu0 %333 }
 0x607   :  { %v343_v59 = vsel %vm84_vm1, %v330_v57, %v334_v58 }
 0x608   :  { %v344_v61 = vsel %vm86_vm2, %v343_v59, %v338_v60 }
 0x60a   :  { %v341_v62 = vpop.permute.xlu0 %340 }
 0x60b   :  { %v345_v63 = vsel %vm88_vm3, %v344_v61, %v341_v62 }
 0x60c   :  { %1720 = vmatmul.mubr.msk.f32.vlgmr.msra.gmra.mxu0 %vm90_vm4, %v345_v63 }
 0x60d   :  { %1742 = vmatpush3.msra.mxu0 %v2131_v2  ;;  %1757 = vmatprep.mubr.msk.f32.mxu0 %vm2067_vm0, %v2066_v0 }
 0x60e   :  { %1743 = vmatprep.subr.mxu0 %v2066_v0 }
 0x60f   :  { %1744 = vmatpush3.msra.mxu0 %v2133_v3 }
 0x610   :  { %1745 = vmatprep.subr.mxu0 %v2066_v0 }
 0x611   :  { %1746 = vmatpush3.msra.mxu0 %v2138_v4 }
 0x612   :  { %1747 = vmatprep.subr.mxu0 %v2066_v0 }
 0x613   :  { %1748 = vmatpush3.msra.mxu0 %v2144_v5 }
 0x614   :  { %1749 = vmatprep.subr.mxu0 %v2066_v0 }
 0x615   :  { %1750 = vmatpush3.msra.mxu0 %v2150_v6 }
 0x616   :  { %1751 = vmatprep.subr.mxu0 %v2066_v0 }
 0x617   :  { %1752 = vmatpush3.msra.mxu0 %v2156_v7 }
 0x618   :  { %1753 = vmatprep.subr.mxu0 %v2066_v0 }
 0x619   :  { %1754 = vmatpush3.msra.mxu0 %v2162_v8 }
 0x61a   :  { %1755 = vmatprep.subr.mxu0 %v2066_v0 }
 0x61b   :  { %1756 = vmatpush3.msra.mxu0 %v2168_v9 }
 0x61c   :  { %1779 = vmatprep.subr.mxu0 %v2066_v0 }
 0x6cc   :  { %v415_v1 = vpop.f32.mrf.mxu0 }
 0x6cd   :  { %v416_v10 = vadd.f32 %v2205_v15, %v415_v1 }
 0x6ce   :  { %v1721_v11 = vpop.f32.mrf.mxu0 }
 0x6cf   :  { %1869 = vtanh.f32 %v416_v10  ;;  %v1566_v13 = vmul.f32 -1.442695, %v416_v10 }
 0x6d1   :  { %1871 = vpow2.f32 %v1566_v13 }
 0x6dc   :  { %v1870_v12 = vpop.eup %1869 }
 0x6dd   :  { %428 = vrot.lane.b32.xlu1 %v1870_v12, %s2069_s16 }
 0x6de   :  { %v1872_v14 = vpop.eup %1871 }
 0x6df   :  { %v422_v16 = vadd.f32 1.0, %v1872_v14 }
 0x6e1   :  { %1873 = vrcp.f32 %v422_v16 }
 0x6ee   :  { %v1874_v17 = vpop.eup %1873 }
 0x6ef   :  { %v426_v20 = vmul.f32 %v1874_v17, %v311_v52  ;;  %v579_v52 = vld [vmem:[#allocation3 + $0x10] sm:$0xf] }
 0x74f   :  { %v429_v18 = vpop.permute.xlu1 %428 }
 0x750   :  { %v431_v19 = vmul.f32 %v1874_v17, %v429_v18 }
 0x752   :  { %433 = vrot.lane.b32.xlu0 %v431_v19, %s2070_s17 }
 0x7c4   :  { %v434_v21 = vpop.permute.xlu0 %433 }
 0x7c5   :  { %v436_v22 = vadd.f32 %v434_v21, %v426_v20  ;;  %v703_v20 = vld [vmem:[#allocation3 + $0x8] sm:$0xf] }
 0x7c7   :  { %1875 = vtanh.f32 %v436_v22 }
 0x7d4   :  { %v1876_v23 = vpop.eup %1875 }
 0x7d5   :  { %439 = vrot.lane.b32.xlu1 %v1876_v23, %s2068_s0  ;;  %v702_v23 = vld [vmem:[#allocation3 + $0x14] sm:$0xf] }
 0x7d9   :  { %462 = vrot.lane.b32.xlu1 %v457_v24, %s2068_s0 }
 0x847   :  { %v440_v25 = vpop.permute.xlu1 %439 }
 0x848   :  { %v2278_v26 = vmul.f32 %v1874_v17, %v440_v25 }
 0x84a   :  { %458 = vrot.lane.b32.xlu0 %v2278_v26, %s2069_s16 }
 0x84b   :  { %v463_v30 = vpop.permute.xlu1 %462 }
 0x84e   :  { %465 = vrot.lane.b32.xlu0 %v2278_v26, %s2063_s7 }
 0x8bc   :  { %v459_v28 = vpop.permute.xlu0 %458 }
 0x8bd   :  { %v468_v29 = vsel %vm84_vm1, %v455_v27, %v459_v28 }
 0x8be   :  { %v469_v31 = vsel %vm86_vm2, %v468_v29, %v463_v30 }
 0x8c0   :  { %v466_v33 = vpop.permute.xlu0 %465 }
 0x8c1   :  { %v470_v34 = vsel %vm88_vm3, %v469_v31, %v466_v33 }
 0x8c2   :  { %1739 = vmatmul.mubr.msk.f32.vlgmr.msra.gmra.mxu1 %vm90_vm4, %v470_v34 }
 0x8c3   :  { %1761 = vmatpush3.msra.mxu1 %v2131_v2  ;;  %1776 = vmatprep.mubr.msk.f32.mxu1 %vm2067_vm0, %v2066_v0 }
 0x8c4   :  { %1762 = vmatprep.subr.mxu1 %v2066_v0 }
 0x8c5   :  { %1763 = vmatpush3.msra.mxu1 %v2133_v3 }
 0x8c6   :  { %1764 = vmatprep.subr.mxu1 %v2066_v0 }
 0x8c7   :  { %1765 = vmatpush3.msra.mxu1 %v2138_v4 }
 0x8c8   :  { %1766 = vmatprep.subr.mxu1 %v2066_v0 }
 0x8c9   :  { %1767 = vmatpush3.msra.mxu1 %v2144_v5 }
 0x8ca   :  { %1768 = vmatprep.subr.mxu1 %v2066_v0 }
 0x8cb   :  { %1769 = vmatpush3.msra.mxu1 %v2150_v6 }
 0x8cc   :  { %1770 = vmatprep.subr.mxu1 %v2066_v0 }
 0x8cd   :  { %1771 = vmatpush3.msra.mxu1 %v2156_v7 }
 0x8ce   :  { %1772 = vmatprep.subr.mxu1 %v2066_v0 }
 0x8cf   :  { %1773 = vmatpush3.msra.mxu1 %v2162_v8 }
 0x8d0   :  { %1774 = vmatprep.subr.mxu1 %v2066_v0 }
 0x8d1   :  { %1775 = vmatpush3.msra.mxu1 %v2168_v9 }
 0x8d2   :  { %1798 = vmatprep.subr.mxu1 %v2066_v0 }
 0x982   :  { %v540_v35 = vpop.f32.mrf.mxu1 }
 0x983   :  { %v541_v36 = vadd.f32 %v2205_v15, %v540_v35 }
 0x984   :  { %v1740_v37 = vpop.f32.mrf.mxu1 }
 0x985   :  { %1877 = vtanh.f32 %v541_v36  ;;  %v1568_v39 = vmul.f32 -1.442695, %v541_v36  ;;  %v826_v37 = vld [vmem:[#allocation3 + $0x4] sm:$0xf] }
 0x987   :  { %1879 = vpow2.f32 %v1568_v39 }
 0x992   :  { %v1878_v38 = vpop.eup %1877 }
 0x993   :  { %553 = vrot.lane.b32.xlu1 %v1878_v38, %s2069_s16 }
 0x994   :  { %v1880_v40 = vpop.eup %1879 }
 0x995   :  { %v547_v41 = vadd.f32 1.0, %v1880_v40  ;;  %v825_v40 = vld [vmem:[#allocation3 + $0x18] sm:$0xf] }
 0x997   :  { %1881 = vrcp.f32 %v547_v41 }
 0x9a4   :  { %v1882_v42 = vpop.eup %1881 }
 0x9a5   :  { %v551_v45 = vmul.f32 %v1882_v42, %v436_v22 }
 0xa05   :  { %v554_v43 = vpop.permute.xlu1 %553 }
 0xa06   :  { %v556_v44 = vmul.f32 %v1882_v42, %v554_v43 }
 0xa08   :  { %558 = vrot.lane.b32.xlu0 %v556_v44, %s2070_s17 }
 0xa7a   :  { %v559_v46 = vpop.permute.xlu0 %558 }
 0xa7b   :  { %v561_v47 = vadd.f32 %v559_v46, %v551_v45 }
 0xa7d   :  { %1883 = vtanh.f32 %v561_v47 }
 0xa8a   :  { %v1884_v48 = vpop.eup %1883 }
 0xa8b   :  { %564 = vrot.lane.b32.xlu1 %v1884_v48, %s2068_s0 }
 0xa8f   :  { %585 = vrot.lane.b32.xlu1 %v580_v49, %s2068_s0 }
 0xafd   :  { %v565_v50 = vpop.permute.xlu1 %564 }
 0xafe   :  { %v2311_v51 = vmul.f32 %v1882_v42, %v565_v50 }
 0xb00   :  { %581 = vrot.lane.b32.xlu0 %v2311_v51, %s2069_s16 }
 0xb01   :  { %v586_v55 = vpop.permute.xlu1 %585 }
 0xb04   :  { %588 = vrot.lane.b32.xlu0 %v2311_v51, %s2063_s7 }
 0xb72   :  { %v582_v53 = vpop.permute.xlu0 %581 }
 0xb73   :  { %v591_v54 = vsel %vm84_vm1, %v579_v52, %v582_v53 }
 0xb74   :  { %v592_v57 = vsel %vm86_vm2, %v591_v54, %v586_v55 }
 0xb76   :  { %v589_v58 = vpop.permute.xlu0 %588 }
 0xb77   :  { %v593_v59 = vsel %vm88_vm3, %v592_v57, %v589_v58 }
 0xb78   :  { %1758 = vmatmul.mubr.msk.f32.vlgmr.msra.gmra.mxu0 %vm90_vm4, %v593_v59 }
 0xb79   :  { %1780 = vmatpush3.msra.mxu0 %v2131_v2  ;;  %1795 = vmatprep.mubr.msk.f32.mxu0 %vm2067_vm0, %v2066_v0 }
 0xb7a   :  { %1781 = vmatprep.subr.mxu0 %v2066_v0 }
 0xb7b   :  { %1782 = vmatpush3.msra.mxu0 %v2133_v3 }
 0xb7c   :  { %1783 = vmatprep.subr.mxu0 %v2066_v0 }
 0xb7d   :  { %1784 = vmatpush3.msra.mxu0 %v2138_v4 }
 0xb7e   :  { %1785 = vmatprep.subr.mxu0 %v2066_v0 }
 0xb7f   :  { %1786 = vmatpush3.msra.mxu0 %v2144_v5 }
 0xb80   :  { %1787 = vmatprep.subr.mxu0 %v2066_v0 }
 0xb81   :  { %1788 = vmatpush3.msra.mxu0 %v2150_v6 }
 0xb82   :  { %1789 = vmatprep.subr.mxu0 %v2066_v0 }
 0xb83   :  { %1790 = vmatpush3.msra.mxu0 %v2156_v7 }
 0xb84   :  { %1791 = vmatprep.subr.mxu0 %v2066_v0 }
 0xb85   :  { %1792 = vmatpush3.msra.mxu0 %v2162_v8 }
 0xb86   :  { %1793 = vmatprep.subr.mxu0 %v2066_v0 }
 0xb87   :  { %1794 = vmatpush3.msra.mxu0 %v2168_v9 }
 0xc38   :  { %v663_v60 = vpop.f32.mrf.mxu0 }
 0xc39   :  { %v664_v61 = vadd.f32 %v2205_v15, %v663_v60 }
 0xc3a   :  { %v1759_v62 = vpop.f32.mrf.mxu0 }
 0xc3b   :  { %1885 = vtanh.f32 %v664_v61  ;;  %v1570_v1 = vmul.f32 -1.442695, %v664_v61 }
 0xc3d   :  { %1887 = vpow2.f32 %v1570_v1 }
 0xc48   :  { %v1886_v63 = vpop.eup %1885 }
 0xc49   :  { %676 = vrot.lane.b32.xlu1 %v1886_v63, %s2069_s16  ;;  %v949_v63 = vld [vmem:[#allocation3] sm:$0xf] }
 0xc4a   :  { %v1888_v10 = vpop.eup %1887 }
 0xc4b   :  { %v670_v11 = vadd.f32 1.0, %v1888_v10 }
 0xc4d   :  { %1889 = vrcp.f32 %v670_v11  ;;  %v948_v11 = vld [vmem:[#allocation3 + $0x1c] sm:$0xf] }
 0xc5a   :  { %v1890_v12 = vpop.eup %1889 }
 0xc5b   :  { %v674_v16 = vmul.f32 %v1890_v12, %v561_v47 }
 0xcbb   :  { %v677_v13 = vpop.permute.xlu1 %676 }
 0xcbc   :  { %v679_v14 = vmul.f32 %v1890_v12, %v677_v13 }
 0xcbe   :  { %681 = vrot.lane.b32.xlu0 %v679_v14, %s2070_s17 }
 0xd30   :  { %v682_v17 = vpop.permute.xlu0 %681 }
 0xd31   :  { %v684_v18 = vadd.f32 %v682_v17, %v674_v16 }
 0xd33   :  { %1891 = vtanh.f32 %v684_v18 }
 0xd40   :  { %v1892_v19 = vpop.eup %1891 }
 0xd41   :  { %687 = vrot.lane.b32.xlu1 %v1892_v19, %s2068_s0 }
 0xd45   :  { %708 = vrot.lane.b32.xlu1 %v703_v20, %s2068_s0 }
 0xdb3   :  { %v688_v21 = vpop.permute.xlu1 %687 }
 0xdb4   :  { %v2343_v22 = vmul.f32 %v1890_v12, %v688_v21 }
 0xdb6   :  { %704 = vrot.lane.b32.xlu0 %v2343_v22, %s2069_s16 }
 0xdb7   :  { %v709_v27 = vpop.permute.xlu1 %708 }
 0xdba   :  { %711 = vrot.lane.b32.xlu0 %v2343_v22, %s2063_s7 }
 0xe28   :  { %v705_v24 = vpop.permute.xlu0 %704 }
 0xe29   :  { %v714_v25 = vsel %vm84_vm1, %v702_v23, %v705_v24 }
 0xe2a   :  { %v715_v28 = vsel %vm86_vm2, %v714_v25, %v709_v27 }
 0xe2c   :  { %v712_v29 = vpop.permute.xlu0 %711 }
 0xe2d   :  { %v716_v30 = vsel %vm88_vm3, %v715_v28, %v712_v29 }
 0xe2e   :  { %1777 = vmatmul.mubr.msk.f32.vlgmr.msra.gmra.mxu1 %vm90_vm4, %v716_v30 }
 0xe2f   :  { %1799 = vmatpush3.msra.mxu1 %v2131_v2  ;;  %1814 = vmatprep.mubr.msk.f32.mxu1 %vm2067_vm0, %v2066_v0 }
 0xe30   :  { %1800 = vmatprep.subr.mxu1 %v2066_v0 }
 0xe31   :  { %1801 = vmatpush3.msra.mxu1 %v2133_v3 }
 0xe32   :  { %1802 = vmatprep.subr.mxu1 %v2066_v0 }
 0xe33   :  { %1803 = vmatpush3.msra.mxu1 %v2138_v4 }
 0xe34   :  { %1804 = vmatprep.subr.mxu1 %v2066_v0 }
 0xe35   :  { %1805 = vmatpush3.msra.mxu1 %v2144_v5 }
 0xe36   :  { %1806 = vmatprep.subr.mxu1 %v2066_v0 }
 0xe37   :  { %1807 = vmatpush3.msra.mxu1 %v2150_v6 }
 0xe38   :  { %1808 = vmatprep.subr.mxu1 %v2066_v0 }
 0xe39   :  { %1809 = vmatpush3.msra.mxu1 %v2156_v7 }
 0xe3a   :  { %1810 = vmatprep.subr.mxu1 %v2066_v0 }
 0xe3b   :  { %1811 = vmatpush3.msra.mxu1 %v2162_v8 }
 0xe3c   :  { %1812 = vmatprep.subr.mxu1 %v2066_v0 }
 0xe3d   :  { %1813 = vmatpush3.msra.mxu1 %v2168_v9 }
 0xeee   :  { %v786_v2 = vpop.f32.mrf.mxu1 }
 0xeef   :  { %v787_v3 = vadd.f32 %v2205_v15, %v786_v2 }
 0xef0   :  { %v1778_v4 = vpop.f32.mrf.mxu1 }
 0xef1   :  { %1893 = vtanh.f32 %v787_v3  ;;  %v1572_v6 = vmul.f32 -1.442695, %v787_v3 }
 0xef3   :  { %1895 = vpow2.f32 %v1572_v6  ;;  %v1074_v6 = vld [vmem:[#allocation8 + $0x18] sm:$0xff] }
 0xef4   :  { %1817 = vmatprep.subr.mxu0 %v1074_v6  ;;  %1828 = vmatprep.subr.mxu1 %v1074_v6 }
 0xefe   :  { %v1894_v5 = vpop.eup %1893 }
 0xeff   :  { %799 = vrot.lane.b32.xlu1 %v1894_v5, %s2069_s16 }
 0xf00   :  { %v1896_v31 = vpop.eup %1895 }
 0xf01   :  { %v793_v7 = vadd.f32 1.0, %v1896_v31  ;;  %v1073_v31 = vld [vmem:[#allocation8 + $0x10] sm:$0xff] }
 0xf03   :  { %1897 = vrcp.f32 %v793_v7 }
 0xf10   :  { %v1898_v33 = vpop.eup %1897 }
 0xf11   :  { %v797_v0 = vmul.f32 %v1898_v33, %v684_v18 }
 0xf71   :  { %v800_v34 = vpop.permute.xlu1 %799 }
 0xf72   :  { %v802_v8 = vmul.f32 %v1898_v33, %v800_v34 }
 0xf74   :  { %804 = vrot.lane.b32.xlu0 %v802_v8, %s2070_s17 }
 0xfe6   :  { %v805_v9 = vpop.permute.xlu0 %804 }
 0xfe7   :  { %v807_v35 = vadd.f32 %v805_v9, %v797_v0 }
 0xfe9   :  { %1899 = vtanh.f32 %v807_v35 }
 0xff6   :  { %v1900_v36 = vpop.eup %1899 }
 0xff7   :  { %810 = vrot.lane.b32.xlu1 %v1900_v36, %s2068_s0 }
 0xffb   :  { %831 = vrot.lane.b32.xlu1 %v826_v37, %s2068_s0 }
0x1069   :  { %v811_v38 = vpop.permute.xlu1 %810 }
0x106a   :  { %v2375_v39 = vmul.f32 %v1898_v33, %v811_v38  ;;  %v1072_v33 = vld [vmem:[#allocation8 + $0x8] sm:$0xff] }
0x106c   :  { %827 = vrot.lane.b32.xlu0 %v2375_v39, %s2069_s16 }
0x106d   :  { %v832_v43 = vpop.permute.xlu1 %831 }
0x1070   :  { %834 = vrot.lane.b32.xlu0 %v2375_v39, %s2063_s7 }
0x10de   :  { %v828_v41 = vpop.permute.xlu0 %827 }
0x10df   :  { %v837_v42 = vsel %vm84_vm1, %v825_v40, %v828_v41 }
0x10e0   :  { %v838_v44 = vsel %vm86_vm2, %v837_v42, %v832_v43 }
0x10e2   :  { %v835_v45 = vpop.permute.xlu0 %834 }
0x10e3   :  { %v839_v46 = vsel %vm88_vm3, %v838_v44, %v835_v45 }
0x10e4   :  { %1796 = vmatmul.mubr.msk.f32.vlgmr.msra.gmra.mxu0 %vm90_vm4, %v839_v46 }
0x10e5   :  { %1818 = vmatpush3.msra.mxu0 %v1074_v6 }
0x10e6   :  { %1819 = vmatprep.subr.mxu0 %v1073_v31 }
0x10e7   :  { %1820 = vmatpush3.msra.mxu0 %v1073_v31 }
0x10e8   :  { %1821 = vmatprep.subr.mxu0 %v1072_v33 }
0x10e9   :  { %1822 = vmatpush3.msra.mxu0 %v1072_v33 }
0x11a4   :  { %v909_v47 = vpop.f32.mrf.mxu0 }
0x11a5   :  { %v910_v48 = vadd.f32 %v2205_v15, %v909_v47 }
0x11a6   :  { %v1797_v49 = vpop.f32.mrf.mxu0 }
0x11a7   :  { %1901 = vtanh.f32 %v910_v48  ;;  %v1574_v52 = vmul.f32 -1.442695, %v910_v48 }
0x11a9   :  { %1903 = vpow2.f32 %v1574_v52 }
0x11b4   :  { %v1902_v50 = vpop.eup %1901 }
0x11b5   :  { %922 = vrot.lane.b32.xlu1 %v1902_v50, %s2069_s16 }
0x11b6   :  { %v1904_v53 = vpop.eup %1903 }
0x11b7   :  { %v916_v54 = vadd.f32 1.0, %v1904_v53 }
0x11b9   :  { %1905 = vrcp.f32 %v916_v54 }
0x11c6   :  { %v1906_v55 = vpop.eup %1905 }
0x11c7   :  { %v920_v59 = vmul.f32 %v1906_v55, %v807_v35 }
0x1227   :  { %v923_v57 = vpop.permute.xlu1 %922 }
0x1228   :  { %v925_v58 = vmul.f32 %v1906_v55, %v923_v57 }
0x122a   :  { %927 = vrot.lane.b32.xlu0 %v925_v58, %s2070_s17 }
0x129c   :  { %v928_v60 = vpop.permute.xlu0 %927 }
0x129d   :  { %v930_v61 = vadd.f32 %v928_v60, %v920_v59 }
0x129f   :  { %1907 = vtanh.f32 %v930_v61 }
0x12ac   :  { %v1908_v62 = vpop.eup %1907 }
0x12ad   :  { %933 = vrot.lane.b32.xlu1 %v1908_v62, %s2068_s0 }
0x12b1   :  { %954 = vrot.lane.b32.xlu1 %v949_v63, %s2068_s0 }
0x131f   :  { %v934_v1 = vpop.permute.xlu1 %933 }
0x1320   :  { %v936_v10 = vmul.f32 %v1906_v55, %v934_v1 }
0x1322   :  { %950 = vrot.lane.b32.xlu0 %v936_v10, %s2069_s16 }
0x1323   :  { %v955_v14 = vpop.permute.xlu1 %954 }
0x1326   :  { %957 = vrot.lane.b32.xlu0 %v936_v10, %s2063_s7 }
0x1394   :  { %v951_v12 = vpop.permute.xlu0 %950 }
0x1395   :  { %v960_v13 = vsel %vm84_vm1, %v948_v11, %v951_v12 }
0x1396   :  { %v961_v16 = vsel %vm86_vm2, %v960_v13, %v955_v14 }
0x1398   :  { %v958_v17 = vpop.permute.xlu0 %957 }
0x1399   :  { %v962_v18 = vsel %vm88_vm3, %v961_v16, %v958_v17 }
0x139a   :  { %1815 = vmatmul.mubr.msk.f32.vlgmr.msra.gmra.mxu1 %vm90_vm4, %v962_v18 }
0x139b   :  { %1829 = vmatpush3.msra.mxu1 %v1074_v6 }
0x139c   :  { %1830 = vmatprep.subr.mxu1 %v1073_v31 }
0x139d   :  { %1831 = vmatpush3.msra.mxu1 %v1073_v31 }
0x139e   :  { %1832 = vmatprep.subr.mxu1 %v1072_v33 }
0x139f   :  { %1833 = vmatpush3.msra.mxu1 %v1072_v33 }
0x145a   :  { %v1032_v19 = vpop.f32.mrf.mxu1 }
0x145b   :  { %v1033_v20 = vadd.f32 %v2205_v15, %v1032_v19 }
0x145c   :  { %v1816_v21 = vpop.f32.mrf.mxu1 }
0x145d   :  { %1909 = vtanh.f32 %v1033_v20  ;;  %v1576_v24 = vmul.f32 -1.442695, %v1033_v20 }
0x145f   :  { %1911 = vpow2.f32 %v1576_v24 }
0x146a   :  { %v1910_v23 = vpop.eup %1909 }
0x146b   :  { %1045 = vrot.lane.b32.xlu1 %v1910_v23, %s2069_s16 }
0x146c   :  { %v1912_v25 = vpop.eup %1911 }
0x146d   :  { %v1039_v27 = vadd.f32 1.0, %v1912_v25 }
0x146f   :  { %1913 = vrcp.f32 %v1039_v27 }
0x147c   :  { %v1914_v28 = vpop.eup %1913 }
0x147d   :  { %v1043_v15 = vmul.f32 %v1914_v28, %v930_v61 }
0x14dd   :  { %v1046_v29 = vpop.permute.xlu1 %1045 }
0x14de   :  { %v1048_v30 = vmul.f32 %v1914_v28, %v1046_v29 }
0x14e0   :  { %1050 = vrot.lane.b32.xlu0 %v1048_v30, %s2070_s17 }
0x14e4   :  { %189 = vrot.lane.b32.xlu0 %v2212_v32, %s2071_s2 }
0x14e8   :  { %444 = vrot.lane.b32.xlu0 %v2278_v26, %s2071_s2 }
0x14ec   :  { %194 = vrot.lane.b32.xlu0 %v2212_v32, %s2068_s0 }
0x14f0   :  { %448 = vrot.lane.b32.xlu0 %v2278_v26, %s2068_s0 }
0x14f4   :  { %696 = vrot.lane.b32.xlu0 %v2343_v22, %s2068_s0 }
0x14f8   :  { %942 = vrot.lane.b32.xlu0 %v936_v10, %s2068_s0 }
0x14fc   :  { %692 = vrot.lane.b32.xlu0 %v2343_v22, %s2071_s2 }
0x1500   :  { %938 = vrot.lane.b32.xlu0 %v936_v10, %s2071_s2 }
0x1552   :  { %v1051_v2 = vpop.permute.xlu0 %1050 }
0x1553   :  { %v1053_v3 = vadd.f32 %v1051_v2, %v1043_v15 }
0x1555   :  { %1915 = vtanh.f32 %v1053_v3 }
0x1556   :  { %v190_v32 = vpop.permute.xlu0 %189 }
0x1557   :  { %193 = vst.msk [vmem:[#allocation2] sm:$0x3] %vm192_vm5, %v190_v32 }
0x1558   :  { %201 = vst.msk [vmem:[#allocation2 + $0xe] sm:$0xc] %vm200_vm6, %v190_v32 }
0x155a   :  { %v445_v26 = vpop.permute.xlu0 %444 }
0x155b   :  { %447 = vst.msk [vmem:[#allocation2 + $0x4] sm:$0x3] %vm192_vm5, %v445_v26 }
0x155c   :  { %452 = vst.msk [vmem:[#allocation2 + $0x12] sm:$0xc] %vm200_vm6, %v445_v26 }
0x155e   :  { %v195_v22 = vpop.permute.xlu0 %194 }
0x155f   :  { %198 = vst.msk [vmem:[#allocation2 + $0xe] sm:$0x3] %vm197_vm7, %v195_v22 }
0x1560   :  { %203 = vst.msk [vmem:[#allocation2 + $0x1c] sm:$0xc] %vm202_vm8, %v195_v22 }
0x1562   :  { %v1916_v4 = vpop.eup %1915  ;;  %v449_v5 = vpop.permute.xlu0 %448 }
0x1563   :  { %451 = vst.msk [vmem:[#allocation2 + $0xa] sm:$0x3] %vm197_vm7, %v449_v5  ;;  %1056 = vrot.lane.b32.xlu1 %v1916_v4, %s2068_s0 }
0x1564   :  { %453 = vst.msk [vmem:[#allocation2 + $0x18] sm:$0xc] %vm202_vm8, %v449_v5 }
0x1566   :  { %v697_v7 = vpop.permute.xlu0 %696 }
0x1567   :  { %319 = vrot.lane.b32.xlu1 %v2245_v56, %s2071_s2 }
0x156a   :  { %v943_v34 = vpop.permute.xlu0 %942 }
0x156b   :  { %569 = vrot.lane.b32.xlu1 %v2311_v51, %s2071_s2 }
0x156e   :  { %v693_v9 = vpop.permute.xlu0 %692 }
0x156f   :  { %323 = vrot.lane.b32.xlu1 %v2245_v56, %s2068_s0  ;;  %v1071_v56 = vld [vmem:[#allocation8] sm:$0xff] }
0x1570   :  { %1823 = vmatprep.subr.mxu0 %v1071_v56  ;;  %1834 = vmatprep.subr.mxu1 %v1071_v56 }
0x1571   :  { %1824 = vmatpush3.msra.mxu0 %v1071_v56  ;;  %1835 = vmatpush3.msra.mxu1 %v1071_v56 }
0x1572   :  { %v939_v37 = vpop.permute.xlu0 %938 }
0x1573   :  { %573 = vrot.lane.b32.xlu1 %v2311_v51, %s2068_s0 }
0x1577   :  { %819 = vrot.lane.b32.xlu1 %v2375_v39, %s2068_s0 }
0x157b   :  { %815 = vrot.lane.b32.xlu1 %v2375_v39, %s2071_s2 }
0x15d5   :  { %v1057_v51 = vpop.permute.xlu1 %1056 }
0x15d6   :  { %v1059_v8 = vmul.f32 %v1914_v28, %v1057_v51 }
0x15d8   :  { %1065 = vrot.lane.b32.xlu1 %v1059_v8, %s2068_s0 }
0x15d9   :  { %v320_v0 = vpop.permute.xlu1 %319 }
0x15da   :  { %322 = vst.msk [vmem:[#allocation2 + $0x2] sm:$0x3] %vm192_vm5, %v320_v0 }
0x15db   :  { %327 = vst.msk [vmem:[#allocation2 + $0x10] sm:$0xc] %vm200_vm6, %v320_v0 }
0x15dc   :  { %945 = vst.msk [vmem:[#allocation2 + $0x2] sm:$0x3] %vm197_vm7, %v943_v34  ;;  %1061 = vrot.lane.b32.xlu1 %v1059_v8, %s2071_s2 }
0x15dd   :  { %947 = vst.msk [vmem:[#allocation2 + $0x10] sm:$0xc] %vm202_vm8, %v943_v34  ;;  %v570_v35 = vpop.permute.xlu1 %569 }
0x15de   :  { %572 = vst.msk [vmem:[#allocation2 + $0x6] sm:$0x3] %vm192_vm5, %v570_v35 }
0x15df   :  { %577 = vst.msk [vmem:[#allocation2 + $0x14] sm:$0xc] %vm200_vm6, %v570_v35 }
0x15e0   :  { %699 = vst.msk [vmem:[#allocation2 + $0x6] sm:$0x3] %vm197_vm7, %v697_v7 }
0x15e1   :  { %701 = vst.msk [vmem:[#allocation2 + $0x14] sm:$0xc] %vm202_vm8, %v697_v7  ;;  %v324_v36 = vpop.permute.xlu1 %323 }
0x15e2   :  { %326 = vst.msk [vmem:[#allocation2 + $0xc] sm:$0x3] %vm197_vm7, %v324_v36 }
0x15e3   :  { %328 = vst.msk [vmem:[#allocation2 + $0x1a] sm:$0xc] %vm202_vm8, %v324_v36 }
0x15e4   :  { %941 = vst.msk [vmem:[#allocation2 + $0xc] sm:$0x3] %vm192_vm5, %v939_v37 }
0x15e5   :  { %946 = vst.msk [vmem:[#allocation2 + $0x1a] sm:$0xc] %vm200_vm6, %v939_v37  ;;  %v574_v38 = vpop.permute.xlu1 %573 }
0x15e6   :  { %576 = vst.msk [vmem:[#allocation2 + $0x8] sm:$0x3] %vm197_vm7, %v574_v38 }
0x15e7   :  { %578 = vst.msk [vmem:[#allocation2 + $0x16] sm:$0xc] %vm202_vm8, %v574_v38 }
0x15e8   :  { %695 = vst.msk [vmem:[#allocation2 + $0x8] sm:$0x3] %vm192_vm5, %v693_v9 }
0x15e9   :  { %700 = vst.msk [vmem:[#allocation2 + $0x16] sm:$0xc] %vm200_vm6, %v693_v9  ;;  %v820_v39 = vpop.permute.xlu1 %819 }
0x15ea   :  { %822 = vst.msk [vmem:[#allocation2 + $0x4] sm:$0x3] %vm197_vm7, %v820_v39 }
0x15eb   :  { %824 = vst.msk [vmem:[#allocation2 + $0x12] sm:$0xc] %vm202_vm8, %v820_v39 }
0x15ed   :  { %v816_v40 = vpop.permute.xlu1 %815 }
0x15ee   :  { %818 = vst.msk [vmem:[#allocation2 + $0xa] sm:$0x3] %vm192_vm5, %v816_v40 }
0x15ef   :  { %823 = vst.msk [vmem:[#allocation2 + $0x18] sm:$0xc] %vm200_vm6, %v816_v40 }
0x164a   :  { %v1066_v41 = vpop.permute.xlu1 %1065 }
0x164b   :  { %1068 = vst.msk [vmem:[#allocation2] sm:$0x3] %vm197_vm7, %v1066_v41 }
0x164c   :  { %1070 = vst.msk [vmem:[#allocation2 + $0xe] sm:$0xc] %vm202_vm8, %v1066_v41 }
0x164e   :  { %v1062_v42 = vpop.permute.xlu1 %1061 }
0x164f   :  { %1064 = vst.msk [vmem:[#allocation2 + $0xe] sm:$0x3] %vm192_vm5, %v1062_v42 }
0x1650   :  { %1069 = vst.msk [vmem:[#allocation2 + $0x1c] sm:$0xc] %vm200_vm6, %v1062_v42 }
0x1652   :  { %v1075_v43 = vld [vmem:[#allocation2] sm:$0xff] }
0x1653   :  { %v1158_v44 = vld [vmem:[#allocation2 + $0x10] sm:$0xff]  ;;  %1825 = vmatprep.mubr.msk.f32.mxu0 %vm86_vm2, %v1075_v43 }
0x1654   :  { %1836 = vmatprep.mubr.msk.f32.mxu1 %vm86_vm2, %v1158_v44 }
0x1656   :  { %v1076_v45 = vld [vmem:[#allocation2 + $0x8] sm:$0xff] }
0x1657   :  { %v1159_v46 = vld [vmem:[#allocation2 + $0x18] sm:$0xff]  ;;  %1826 = vmatmul.mubr.msk.f32.vlgmr.msra.gmra.mxu0 %vm86_vm2, %v1076_v45 }
0x1658   :  { %1837 = vmatmul.mubr.msk.f32.vlgmr.msra.gmra.mxu1 %vm86_vm2, %v1159_v46 }
0x1717   :  { %v2464_v47 = vpop.f32.mrf.mxu0 }
0x1718   :  { %1247 = vrot.lane.b32.xlu1 %v2464_v47, %s2069_s16  ;;  %v2468_v48 = vpop.f32.mrf.mxu1  ;;  %v1259_v54 = vmul.f32 0.5, %v2464_v47 }
0x1719   :  { %v2470_v49 = vpop.f32.mrf.mxu0  ;;  %v1261_v55 = vmul.f32 0.5, %v2468_v48 }
0x171a   :  { %1245 = vrot.lane.b32.xlu0 %v2470_v49, %s2069_s16  ;;  %v2476_v50 = vpop.f32.mrf.mxu1  ;;  %v1258_v52 = vmul.f32 0.5, %v2470_v49  ;;  %v1269_v60 = vsel %vm86_vm2, %v1259_v54, 0.0 }
0x171b   :  { %v1260_v53 = vmul.f32 0.5, %v2476_v50  ;;  %v1270_v61 = vsel %vm86_vm2, %v1261_v55, 0.0 }
0x171c   :  { %1251 = vrot.lane.b32.xlu1 %v2468_v48, %s2069_s16  ;;  %v1266_v57 = vsel %vm86_vm2, %v1258_v52, 0.0  ;;  %v1271_v62 = vadd.f32 %v1270_v61, %v1269_v60 }
0x171d   :  { %v1267_v58 = vsel %vm86_vm2, %v1260_v53, 0.0 }
0x171e   :  { %1249 = vrot.lane.b32.xlu0 %v2476_v50, %s2069_s16  ;;  %v1268_v59 = vadd.f32 %v1267_v58, %v1266_v57  ;;  %v1279_v1 = vmul.f32 %v1271_v62, %v1271_v62 }
0x1720   :  { %v1278_v63 = vmul.f32 %v1268_v59, %v1268_v59  ;;  %v1285_v11 = vsel %vm86_vm2, %v1279_v1, 0.0 }
0x1722   :  { %v1282_v10 = vsel %vm86_vm2, %v1278_v63, 0.0 }
0x173d   :  { %1283 = vadd.xlane.f32.xlu0 %v1282_v10 }
0x1740   :  { %1286 = vadd.xlane.f32.xlu1 %v1285_v11 }
0x178a   :  { %v2490_v12 = vpop.permute.xlu1 %1247 }
0x178b   :  { %v1263_v16 = vmul.f32 0.5, %v2490_v12 }
0x178c   :  { %v2492_v13 = vpop.permute.xlu0 %1245 }
0x178d   :  { %v1262_v17 = vmul.f32 0.5, %v2492_v13  ;;  %v1275_v25 = vsel %vm86_vm2, %v1263_v16, 0.0 }
0x178e   :  { %v2494_v14 = vpop.permute.xlu1 %1251 }
0x178f   :  { %v1265_v18 = vmul.f32 0.5, %v2494_v14  ;;  %v1272_v23 = vsel %vm86_vm2, %v1262_v17, 0.0 }
0x1790   :  { %v2499_v19 = vpop.permute.xlu0 %1249 }
0x1791   :  { %v1264_v20 = vmul.f32 0.5, %v2499_v19  ;;  %v1276_v21 = vsel %vm86_vm2, %v1265_v18, 0.0 }
0x1792   :  { %v1277_v28 = vadd.f32 %v1276_v21, %v1275_v25 }
0x1793   :  { %v1273_v24 = vsel %vm86_vm2, %v1264_v20, 0.0 }
0x1794   :  { %v1274_v27 = vadd.f32 %v1273_v24, %v1272_v23  ;;  %v1281_v15 = vmul.f32 %v1277_v28, %v1277_v28 }
0x1796   :  { %v1280_v29 = vmul.f32 %v1274_v27, %v1274_v27  ;;  %v1291_v2 = vsel %vm86_vm2, %v1281_v15, 0.0 }
0x1798   :  { %v1288_v30 = vsel %vm86_vm2, %v1280_v29, 0.0 }
0x1799   :  { %1289 = vadd.xlane.f32.xlu0 %v1288_v30 }
0x179d   :  { %1292 = vadd.xlane.f32.xlu0 %v1291_v2 }
0x17c6   :  { %v1284_v3 = vpop.xlane.xlu0 %1283 }
0x17c7   :  { %v1294_v32 = vadd.f32 1.0, %v1284_v3  ;;  %v1306_v26 = vadd.f32 1e-08, %v1284_v3 }
0x17c9   :  { %1917 = vrcp.f32 %v1294_v32  ;;  %v1287_v22 = vpop.xlane.xlu1 %1286 }
0x17ca   :  { %v1295_v4 = vadd.f32 1.0, %v1287_v22  ;;  %v1307_v5 = vadd.f32 1e-08, %v1287_v22  ;;  %1919 = vrsqrt.f32 %v1306_v26 }
0x17cc   :  { %1921 = vrcp.f32 %v1295_v4 }
0x17cd   :  { %1923 = vrsqrt.f32 %v1307_v5 }
0x17d6   :  { %v1918_v6 = vpop.eup %1917 }
0x17d7   :  { %v1302_v31 = vmul.f32 %v1918_v6, %v1284_v3  ;;  %v1920_v7 = vpop.eup %1919 }
0x17d9   :  { %v1922_v33 = vpop.eup %1921  ;;  %v1314_v56 = vmul.f32 %v1920_v7, %v1302_v31 }
0x17da   :  { %v1303_v51 = vmul.f32 %v1922_v33, %v1287_v22  ;;  %v1924_v34 = vpop.eup %1923 }
0x17db   :  { %v1318_v8 = vmul.f32 %v1314_v56, %v1268_v59 }
0x17dc   :  { %v1315_v0 = vmul.f32 %v1924_v34, %v1303_v51 }
0x17dd   :  { %v1322_v9 = vmul.f32 %v1318_v8, %v2470_v49  ;;  %v1324_v37 = vmul.f32 %v1318_v8, %v2476_v50 }
0x17de   :  { %v1319_v35 = vmul.f32 %v1315_v0, %v1271_v62 }
0x17df   :  { %v1330_v36 = vsel %vm86_vm2, %v1322_v9, 0.0  ;;  %v1336_v41 = vsel %vm86_vm2, %v1324_v37, 0.0 }
0x17e0   :  { %1331 = vadd.xlane.f32.xlu1 %v1330_v36  ;;  %v1323_v38 = vmul.f32 %v2464_v47, %v1319_v35  ;;  %v1325_v40 = vmul.f32 %v2468_v48, %v1319_v35 }
0x17e2   :  { %v1333_v39 = vsel %vm86_vm2, %v1323_v38, 0.0  ;;  %v1339_v42 = vsel %vm86_vm2, %v1325_v40, 0.0 }
0x17e3   :  { %1334 = vadd.xlane.f32.xlu0 %v1333_v39 }
0x17e4   :  { %1337 = vadd.xlane.f32.xlu1 %v1336_v41 }
0x17e7   :  { %1340 = vadd.xlane.f32.xlu0 %v1339_v42 }
0x1822   :  { %v1290_v43 = vpop.xlane.xlu0 %1289 }
0x1823   :  { %v1296_v44 = vadd.f32 1.0, %v1290_v43  ;;  %v1308_v45 = vadd.f32 1e-08, %v1290_v43 }
0x1825   :  { %1925 = vrcp.f32 %v1296_v44 }
0x1826   :  { %v1293_v46 = vpop.xlane.xlu0 %1292  ;;  %1927 = vrsqrt.f32 %v1308_v45 }
0x1827   :  { %v1297_v52 = vadd.f32 1.0, %v1293_v46  ;;  %v1309_v53 = vadd.f32 1e-08, %v1293_v46 }
0x1829   :  { %1929 = vrcp.f32 %v1297_v52 }
0x182a   :  { %1931 = vrsqrt.f32 %v1309_v53 }
0x1832   :  { %v1926_v54 = vpop.eup %1925 }
0x1833   :  { %v1304_v55 = vmul.f32 %v1926_v54, %v1290_v43  ;;  %v1928_v57 = vpop.eup %1927 }
0x1835   :  { %v1316_v58 = vmul.f32 %v1928_v57, %v1304_v55 }
0x1836   :  { %v1930_v59 = vpop.eup %1929 }
0x1837   :  { %v1305_v60 = vmul.f32 %v1930_v59, %v1293_v46  ;;  %v1320_v61 = vmul.f32 %v1316_v58, %v1274_v27  ;;  %v1932_v62 = vpop.eup %1931 }
0x1839   :  { %v1317_v63 = vmul.f32 %v1932_v62, %v1305_v60  ;;  %v1326_v1 = vmul.f32 %v1320_v61, %v2492_v13  ;;  %v1328_v11 = vmul.f32 %v1320_v61, %v2499_v19 }
0x183b   :  { %v1342_v10 = vsel %vm86_vm2, %v1326_v1, 0.0  ;;  %v1321_v16 = vmul.f32 %v1317_v63, %v1277_v28  ;;  %v1348_v18 = vsel %vm86_vm2, %v1328_v11, 0.0 }
0x183c   :  { %1343 = vadd.xlane.f32.xlu1 %v1342_v10 }
0x183d   :  { %v1327_v17 = vmul.f32 %v1321_v16, %v2490_v12  ;;  %v1329_v21 = vmul.f32 %v1321_v16, %v2494_v14 }
0x183f   :  { %v1345_v20 = vsel %vm86_vm2, %v1327_v17, 0.0  ;;  %v1351_v23 = vsel %vm86_vm2, %v1329_v21, 0.0 }
0x1840   :  { %1349 = vadd.xlane.f32.xlu1 %v1348_v18  ;;  %1346 = vadd.xlane.f32.xlu0 %v1345_v20 }
0x1844   :  { %1352 = vadd.xlane.f32.xlu0 %v1351_v23 }
0x1869   :  { %v2524_v24 = vpop.xlane.xlu1 %1331 }
0x186c   :  { %v2526_v25 = vpop.xlane.xlu0 %1334 }
0x186d   :  { %v2528_v27 = vpop.xlane.xlu1 %1337 }
0x1870   :  { %v2530_v28 = vpop.xlane.xlu0 %1340 }
0x18c5   :  { %v2532_v29 = vpop.xlane.xlu1 %1343 }
0x18c6   :  { %v1362_v30 = vmax.f32 %v2524_v24, %v2532_v29 }
0x18c8   :  { %v1366_v15 = vsub.f32 %v2524_v24, %v1362_v30  ;;  %v1370_v2 = vsub.f32 %v2532_v29, %v1362_v30 }
0x18c9   :  { %v2538_v3 = vpop.xlane.xlu1 %1349  ;;  %v2540_v32 = vpop.xlane.xlu0 %1346 }
0x18ca   :  { %v1374_v26 = vmul.f32 1.442695, %v1366_v15  ;;  %v1382_v22 = vmul.f32 1.442695, %v1370_v2  ;;  %v1364_v4 = vmax.f32 %v2528_v27, %v2538_v3  ;;  %v1363_v5 = vmax.f32 %v2526_v25, %v2540_v32 }
0x18cc   :  { %1933 = vpow2.f32 %v1374_v26  ;;  %v1368_v6 = vsub.f32 %v2528_v27, %v1364_v4  ;;  %v1372_v31 = vsub.f32 %v2538_v3, %v1364_v4  ;;  %v1367_v7 = vsub.f32 %v2526_v25, %v1363_v5 }
0x18cd   :  { %1935 = vpow2.f32 %v1382_v22  ;;  %v1371_v33 = vsub.f32 %v2540_v32, %v1363_v5  ;;  %v2550_v56 = vpop.xlane.xlu0 %1352 }
0x18ce   :  { %v1378_v51 = vmul.f32 1.442695, %v1368_v6  ;;  %v1386_v34 = vmul.f32 1.442695, %v1372_v31  ;;  %v1376_v8 = vmul.f32 1.442695, %v1367_v7  ;;  %v1365_v0 = vmax.f32 %v2530_v28, %v2550_v56 }
0x18cf   :  { %v1384_v9 = vmul.f32 1.442695, %v1371_v33 }
0x18d0   :  { %1937 = vpow2.f32 %v1378_v51  ;;  %v1369_v35 = vsub.f32 %v2530_v28, %v1365_v0  ;;  %v1373_v36 = vsub.f32 %v2550_v56, %v1365_v0 }
0x18d1   :  { %1939 = vpow2.f32 %v1386_v34 }
0x18d2   :  { %1941 = vpow2.f32 %v1376_v8  ;;  %v1380_v37 = vmul.f32 1.442695, %v1369_v35  ;;  %v1388_v38 = vmul.f32 1.442695, %v1373_v36 }
0x18d3   :  { %1943 = vpow2.f32 %v1384_v9 }
0x18d4   :  { %1945 = vpow2.f32 %v1380_v37 }
0x18d5   :  { %1947 = vpow2.f32 %v1388_v38 }
0x18d9   :  { %v1934_v39 = vpop.eup %1933 }
0x18da   :  { %v1936_v40 = vpop.eup %1935 }
0x18db   :  { %v1390_v41 = vadd.f32 %v1936_v40, %v1934_v39 }
0x18dd   :  { %v1938_v42 = vpop.eup %1937  ;;  %1949 = vrcp.f32 %v1390_v41 }
0x18de   :  { %v1940_v43 = vpop.eup %1939 }
0x18df   :  { %v1942_v44 = vpop.eup %1941  ;;  %v1392_v45 = vadd.f32 %v1940_v43, %v1938_v42 }
0x18e0   :  { %v1944_v46 = vpop.eup %1943 }
0x18e1   :  { %v1946_v52 = vpop.eup %1945  ;;  %1951 = vrcp.f32 %v1392_v45  ;;  %v1391_v53 = vadd.f32 %v1944_v46, %v1942_v44 }
0x18e2   :  { %v1948_v54 = vpop.eup %1947 }
0x18e3   :  { %1953 = vrcp.f32 %v1391_v53  ;;  %v1393_v55 = vadd.f32 %v1948_v54, %v1946_v52 }
0x18e5   :  { %1955 = vrcp.f32 %v1393_v55 }
0x18ea   :  { %v1950_v57 = vpop.eup %1949 }
0x18eb   :  { %v1398_v58 = vmul.f32 %v1950_v57, %v1934_v39  ;;  %v1402_v59 = vmul.f32 %v1950_v57, %v1936_v40 }
0x18ed   :  { %1515 = vst.msk [vmem:[%s2684_s5] sm:$0xff] %vm1514_vm9, %v1398_v58  ;;  %v1406_v61 = vmul.f32 %v1398_v58, %v2470_v49  ;;  %v1410_v62 = vmul.f32 %v1402_v59, %v2492_v13 }
0x18ee   :  { %v1952_v60 = vpop.eup %1951  ;;  %1520 = vst.msk [vmem:[%s2684_s5] sm:$0xff] %vm1519_vm10, %v1402_v59 }
0x18ef   :  { %v1400_v63 = vmul.f32 %v1952_v60, %v1938_v42  ;;  %v1404_v1 = vmul.f32 %v1952_v60, %v1940_v43  ;;  %v1414_v21 = vsel %vm86_vm2, %v1406_v61, 0.0  ;;  %v1420_v23 = vsel %vm86_vm2, %v1410_v62, 0.0 }
0x18f0   :  { %v1954_v10 = vpop.eup %1953 }
0x18f1   :  { %v1408_v11 = vmul.f32 %v1400_v63, %v2476_v50  ;;  %v1412_v16 = vmul.f32 %v1404_v1, %v2499_v19  ;;  %v1399_v17 = vmul.f32 %v1954_v10, %v1942_v44  ;;  %v1403_v18 = vmul.f32 %v1954_v10, %v1944_v46  ;;  %1525 = vst.msk [vmem:[%s2684_s5] sm:$0xff] %vm1524_vm11, %v1400_v63 }
0x18f2   :  { %v1956_v20 = vpop.eup %1955  ;;  %1530 = vst.msk [vmem:[%s2684_s5] sm:$0xff] %vm1529_vm12, %v1404_v1 }
0x18f3   :  { %v1415_v30 = vsel %vm86_vm2, %v1408_v11, 0.0  ;;  %v1421_v15 = vsel %vm86_vm2, %v1412_v16, 0.0  ;;  %v1401_v2 = vmul.f32 %v1956_v20, %v1946_v52  ;;  %v1407_v26 = vmul.f32 %v2464_v47, %v1399_v17  ;;  %1516 = vst.msk [vmem:[%s2684_s5 + $0x8] sm:$0xff] %vm1514_vm9, %v1399_v17 }
0x18f4   :  { %v1416_v22 = vadd.f32 %v1415_v30, %v1414_v21  ;;  %v2585_v4 = vadd.f32 %v1421_v15, %v1420_v23  ;;  %v1405_v5 = vmul.f32 %v1956_v20, %v1948_v54  ;;  %v1411_v6 = vmul.f32 %v1403_v18, %v2490_v12  ;;  %1521 = vst.msk [vmem:[%s2684_s5 + $0x8] sm:$0xff] %vm1519_vm10, %v1403_v18 }
0x18f5   :  { %v1409_v31 = vmul.f32 %v2468_v48, %v1401_v2  ;;  %1526 = vst.msk [vmem:[%s2684_s5 + $0x8] sm:$0xff] %vm1524_vm11, %v1401_v2  ;;  %v1417_v34 = vsel %vm86_vm2, %v1407_v26, 0.0 }
0x18f6   :  { %v1426_v7 = vmul.f32 %v1416_v22, %v1416_v22  ;;  %v1413_v33 = vmul.f32 %v1405_v5, %v2494_v14  ;;  %1531 = vst.msk [vmem:[%s2684_s5 + $0x8] sm:$0xff] %vm1529_vm12, %v1405_v5  ;;  %v1428_v51 = vmul.f32 %v2585_v4, %v2585_v4  ;;  %v1423_v35 = vsel %vm86_vm2, %v1411_v6, 0.0  ;;  %s2072_s5 = smov [#allocation9]  }
0x18f7   :  { %v1418_v8 = vsel %vm86_vm2, %v1409_v31, 0.0  ;;  %s1539_s1 = sshll.u32 %s2072_s5, 4  ;;  %s1540_s1 = int_to_ptr.vmem [resolvable:$true] %s1539_s1 }
0x18f8   :  { %v1430_v0 = vsel %vm86_vm2, %v1426_v7, 0.0  ;;  %v1419_v9 = vadd.f32 %v1418_v8, %v1417_v34  ;;  %v1424_v36 = vsel %vm86_vm2, %v1413_v33, 0.0  ;;  %v1436_v39 = vsel %vm86_vm2, %v1428_v51, 0.0  ;;  %s2033_s12 = scalar_lea.vmem %s1540_s1, 512  ;;  %p2038_p2 = scmp.lt.s32.totalorder %s1540_s1, %s1540_s1 }
0x18f9   :  { %1431 = vadd.xlane.f32.xlu1 %v1430_v0  ;;  %v1425_v37 = vadd.f32 %v1424_v36, %v1423_v35  ;;  %p2034_p1 = scmp.ne.s32.totalorder %s1540_s1, %s2033_s12  ;;  %p2039_p3 = scmp.lt.s32.totalorder %s2033_s12, %s2033_s12 }
0x18fa   :  { %v1427_v38 = vmul.f32 %v1419_v9, %v1419_v9 }
0x18fb   :  { %v1429_v41 = vmul.f32 %v1425_v37, %v1425_v37  ;;  %p2040_p4 = por %p2039_p3, %p2038_p2 }
0x18fc   :  { %v1433_v40 = vsel %vm86_vm2, %v1427_v38, 0.0 }
0x18fd   :  { %1437 = vadd.xlane.f32.xlu1 %v1436_v39  ;;  %1434 = vadd.xlane.f32.xlu0 %v1433_v40  ;;  %v1439_v42 = vsel %vm86_vm2, %v1429_v41, 0.0  ;;  %p2041_p5 = pnand %p2040_p4, %p2034_p1 }
0x1901   :  { %1440 = vadd.xlane.f32.xlu0 %v1439_v42 }
0x1982   :  { %v1432_v43 = vpop.xlane.xlu1 %1431 }
0x1983   :  { %v1442_v44 = vadd.f32 1.0, %v1432_v43  ;;  %v1454_v45 = vadd.f32 1e-08, %v1432_v43 }
0x1985   :  { %1957 = vrcp.f32 %v1442_v44 }
0x1986   :  { %v1438_v46 = vpop.xlane.xlu1 %1437  ;;  %v1435_v52 = vpop.xlane.xlu0 %1434  ;;  %1959 = vrsqrt.f32 %v1454_v45 }
0x1987   :  { %v1444_v53 = vadd.f32 1.0, %v1438_v46  ;;  %v1456_v54 = vadd.f32 1e-08, %v1438_v46  ;;  %v1443_v55 = vadd.f32 1.0, %v1435_v52  ;;  %v1455_v57 = vadd.f32 1e-08, %v1435_v52 }
0x1989   :  { %1961 = vrcp.f32 %v1444_v53 }
0x198a   :  { %1963 = vrsqrt.f32 %v1456_v54  ;;  %v1441_v58 = vpop.xlane.xlu0 %1440 }
0x198b   :  { %1965 = vrcp.f32 %v1443_v55  ;;  %v1445_v59 = vadd.f32 1.0, %v1441_v58  ;;  %v1457_v60 = vadd.f32 1e-08, %v1441_v58 }
0x198c   :  { %1967 = vrsqrt.f32 %v1455_v57 }
0x198d   :  { %1969 = vrcp.f32 %v1445_v59 }
0x198e   :  { %1971 = vrsqrt.f32 %v1457_v60 }
0x1992   :  { %v1958_v61 = vpop.eup %1957 }
0x1993   :  { %v1450_v62 = vmul.f32 %v1958_v61, %v1432_v43  ;;  %v1960_v63 = vpop.eup %1959 }
0x1995   :  { %v1462_v1 = vmul.f32 %v1960_v63, %v1450_v62 }
0x1996   :  { %v1962_v10 = vpop.eup %1961 }
0x1997   :  { %v1964_v11 = vpop.eup %1963  ;;  %v1452_v16 = vmul.f32 %v1962_v10, %v1438_v46  ;;  %v1466_v17 = vmul.f32 %v1462_v1, %v1416_v22 }
0x1998   :  { %v1966_v18 = vpop.eup %1965 }
0x1999   :  { %v1968_v20 = vpop.eup %1967  ;;  %v1464_v21 = vmul.f32 %v1964_v11, %v1452_v16  ;;  %v1451_v23 = vmul.f32 %v1966_v18, %v1435_v52  ;;  %v1470_v30 = vmul.f32 %v1466_v17, %v2470_v49  ;;  %1510 = vst.msk [vmem:[#allocation9] sm:$0xff] %vm86_vm2, %v1466_v17  ;;  %v1472_v34 = vmul.f32 %v1466_v17, %v2476_v50 }
0x199a   :  { %v1970_v15 = vpop.eup %1969 }
0x199b   :  { %v1463_v2 = vmul.f32 %v1968_v20, %v1451_v23  ;;  %v1453_v26 = vmul.f32 %v1970_v15, %v1441_v58  ;;  %v1478_v5 = vsel %vm86_vm2, %v1470_v30, 0.0  ;;  %v1468_v6 = vmul.f32 %v1464_v21, %v2585_v4  ;;  %v1972_v31 = vpop.eup %1971 }
0x199c   :  { %1479 = vadd.xlane.f32.xlu1 %v1478_v5 }
0x199d   :  { %v1465_v7 = vmul.f32 %v1972_v31, %v1453_v26  ;;  %v1474_v22 = vmul.f32 %v1468_v6, %v2492_v13  ;;  %1512 = vst.msk [vmem:[#allocation9 + $0x10] sm:$0xff] %vm86_vm2, %v1468_v6  ;;  %v1467_v33 = vmul.f32 %v1463_v2, %v1419_v9  ;;  %v1484_v13 = vsel %vm86_vm2, %v1472_v34, 0.0 }
0x199e   :  { %v1476_v35 = vmul.f32 %v1468_v6, %v2499_v19 }
0x199f   :  { %v1490_v51 = vsel %vm86_vm2, %v1474_v22, 0.0  ;;  %v1471_v49 = vmul.f32 %v2464_v47, %v1467_v33  ;;  %1511 = vst.msk [vmem:[#allocation9 + $0x8] sm:$0xff] %vm86_vm2, %v1467_v33  ;;  %v1469_v8 = vmul.f32 %v1465_v7, %v1425_v37  ;;  %v1473_v47 = vmul.f32 %v2468_v48, %v1467_v33 }
0x19a0   :  { %1491 = vadd.xlane.f32.xlu1 %v1490_v51  ;;  %v1496_v50 = vsel %vm86_vm2, %v1476_v35, 0.0 }
0x19a1   :  { %v1481_v4 = vsel %vm86_vm2, %v1471_v49, 0.0  ;;  %v1475_v0 = vmul.f32 %v1469_v8, %v2490_v12  ;;  %1513 = vst.msk [vmem:[#allocation9 + $0x18] sm:$0xff] %vm86_vm2, %v1469_v8  ;;  %v1487_v36 = vsel %vm86_vm2, %v1473_v47, 0.0  ;;  %v1477_v12 = vmul.f32 %v1469_v8, %v2494_v14 }
0x19a2   :  { %1482 = vadd.xlane.f32.xlu0 %v1481_v4 }
0x19a3   :  { %v1493_v9 = vsel %vm86_vm2, %v1475_v0, 0.0  ;;  %v1499_v37 = vsel %vm86_vm2, %v1477_v12, 0.0 }
0x19a4   :  { %1485 = vadd.xlane.f32.xlu1 %v1484_v13 }
0x19a6   :  { %1494 = vadd.xlane.f32.xlu0 %v1493_v9 }
0x19a8   :  { %1497 = vadd.xlane.f32.xlu1 %v1496_v50 }
0x19aa   :  { %1488 = vadd.xlane.f32.xlu0 %v1487_v36 }
0x19ae   :  { %1500 = vadd.xlane.f32.xlu0 %v1499_v37 }
0x19af   :  { %2044 = shalt.err (!%p2041_p5)
}
0x19b0   :  { %1545 = dma.vmem_to_hbm [thread:$0]  %s1540_s1, 512, %s2683_s4, [#allocation5], %s2060_s24, %s2060_s24, %s2061_s25  }
0x1a25   :  { %v1480_v48 = vpop.xlane.xlu1 %1479 }
0x1a26   :  { %v1502_v14 = vadd.f32 %v1480_v48, %v2524_v24 }
0x1a28   :  { %1517 = vst.msk [vmem:[%s2685_s6] sm:$0xff] %vm1514_vm9, %v1502_v14 }
0x1a29   :  { %v1492_v19 = vpop.xlane.xlu1 %1491 }
0x1a2a   :  { %v1506_v38 = vadd.f32 %v1492_v19, %v2532_v29 }
0x1a2b   :  { %v1483_v39 = vpop.xlane.xlu0 %1482 }
0x1a2c   :  { %1522 = vst.msk [vmem:[%s2685_s6] sm:$0xff] %vm1519_vm10, %v1506_v38  ;;  %v1503_v40 = vadd.f32 %v1483_v39, %v2526_v25 }
0x1a2d   :  { %v1486_v41 = vpop.xlane.xlu1 %1485 }
0x1a2e   :  { %1518 = vst.msk [vmem:[%s2685_s6 + $0x8] sm:$0xff] %vm1514_vm9, %v1503_v40  ;;  %v1504_v24 = vadd.f32 %v1486_v41, %v2528_v27 }
0x1a2f   :  { %v1495_v42 = vpop.xlane.xlu0 %1494 }
0x1a30   :  { %1527 = vst.msk [vmem:[%s2685_s6] sm:$0xff] %vm1524_vm11, %v1504_v24  ;;  %v1507_v29 = vadd.f32 %v1495_v42, %v2540_v32 }
0x1a31   :  { %v1498_v43 = vpop.xlane.xlu1 %1497 }
0x1a32   :  { %1523 = vst.msk [vmem:[%s2685_s6 + $0x8] sm:$0xff] %vm1519_vm10, %v1507_v29  ;;  %v1508_v25 = vadd.f32 %v1498_v43, %v2538_v3 }
0x1a33   :  { %v1489_v44 = vpop.xlane.xlu0 %1488 }
0x1a34   :  { %1532 = vst.msk [vmem:[%s2685_s6] sm:$0xff] %vm1529_vm12, %v1508_v25  ;;  %v1505_v27 = vadd.f32 %v1489_v44, %v2530_v28 }
0x1a36   :  { %1528 = vst.msk [vmem:[%s2685_s6 + $0x8] sm:$0xff] %vm1524_vm11, %v1505_v27 }
0x1a37   :  { %v1501_v32 = vpop.xlane.xlu0 %1500 }
0x1a38   :  { %v1509_v45 = vadd.f32 %v1501_v32, %v2550_v56 }
0x1a3a   :  { %1533 = vst.msk [vmem:[%s2685_s6 + $0x8] sm:$0xff] %vm1529_vm12, %v1509_v45 }
0x1a3b   :  { %2057 = dma.done.wait [#allocation5], 512  }
0x1a3c   :  { %2058 = vsyncadd [#allocation5], 4294966784 }
0x1a3d   :  { %1557 = vsyncpa [#allocation4], 1 }
0x1a3e   :  { %1558 = vsyncpa [#allocation7], 1 }
0x1a3f   :  { %1559 = vsyncpa [#allocation5], 1 }

</bundles_post_ra>
